<compile_context>
chip_gen: v7x
topology: tpu7x:2x2x1
jax: 0.10.0
libtpu: 0.0.40
codegen_flags: <defaults>
</compile_context>

<pallas_src>
import jax
import jax.numpy as jnp
from jax.experimental import pallas as pl
from jax.experimental.pallas import tpu as pltpu


def _round_up(n, m):
    return ((n + m - 1) // m) * m


# ----------------------------------------------------------------------------- kernel ---

def _make_flow_kernel(T, Chp, Hp, K, L, F, dilation_rate, compute_dtype):
    cdt = compute_dtype
    max_pad = max(((K - 1) * dilation_rate ** i) // 2 for i in range(L)) if K > 1 else 0

    def kernel(x0_ref, x1_ref, mask_ref,
               wpre_ref, bpre_ref,
               wint_ref, bint_ref, wins_ref, bins_ref,
               wres_ref, bres_ref, wskip_ref, bskip_ref,
               wpost_ref, bpost_ref,
               outa_ref, outb_ref,
               a_sc, b_sc, hpad_sc):
        f = pl.program_id(1)

        # New batch item: load the two halves into the persistent f32 state scratches and
        # zero the halo strips of the padded conv-input slab (the center [max_pad:max_pad+T]
        # is rewritten every layer, the halo stays zero).
        @pl.when(f == 0)
        def _():
            a_sc[...] = x0_ref[0]
            b_sc[...] = x1_ref[0]
            if max_pad > 0:
                hpad_sc[:max_pad, :] = jnp.zeros((max_pad, Hp), cdt)
                hpad_sc[max_pad + T:, :] = jnp.zeros((max_pad, Hp), cdt)

        mask = mask_ref[0]                 # (T, 1)   f32
        A = a_sc[...]                      # (T, Chp) f32  "x0" of this flow (Flip folded)
        B = b_sc[...]                      # (T, Chp) f32  "x1" of this flow

        # pre 1x1 conv: (T, Chp) @ (Chp, Hp) on the MXU.  The previous Flip is already
        # folded into this flow's w_pre rows.
        h = (jnp.dot(A.astype(cdt), wpre_ref[0],
                     preferred_element_type=jnp.float32)
             + bpre_ref[0]) * mask                                       # (T, Hp) f32

        # ----- WN stack: K-tap dilated conv -> tanh*sigmoid gate -> res/skip 1x1 convs ----
        skip = None
        for i in range(L):
            dil = dilation_rate ** i
            pad = ((K - 1) * dil) // 2
            base = max_pad - pad
            # Residual state h stays f32 across layers; only the conv operand copy in the
            # padded slab is quantized to the MXU compute dtype.
            hpad_sc[max_pad:max_pad + T, :] = h.astype(cdt)
            # Dilated conv as K shifted matmuls.  tanh / sigmoid halves of the gate weight
            # are separate (Hp, Hp) stacks -> no lane-boundary slicing of x_in.
            sl0 = hpad_sc[base:base + T, :]
            xt = (jnp.dot(sl0, wint_ref[0, i * K],
                          preferred_element_type=jnp.float32) + bint_ref[0, i])
            xs = (jnp.dot(sl0, wins_ref[0, i * K],
                          preferred_element_type=jnp.float32) + bins_ref[0, i])
            for tap in range(1, K):
                sl = hpad_sc[base + tap * dil:base + tap * dil + T, :]
                xt = xt + jnp.dot(sl, wint_ref[0, i * K + tap],
                                  preferred_element_type=jnp.float32)
                xs = xs + jnp.dot(sl, wins_ref[0, i * K + tap],
                                  preferred_element_type=jnp.float32)
            # fused_add_tanh_sigmoid_multiply (g == 0); f32 on VPU/EUP, cast once for MXU.
            acts = (jnp.tanh(xt) * jax.nn.sigmoid(xs)).astype(cdt)       # (T, Hp)
            sk = (jnp.dot(acts, wskip_ref[0, i],
                          preferred_element_type=jnp.float32) + bskip_ref[0, i])
            skip = sk if skip is None else skip + sk
            if i < L - 1:   # last layer is skip-only -> no wasted residual matmul
                res = (jnp.dot(acts, wres_ref[0, i],
                               preferred_element_type=jnp.float32) + bres_ref[0, i])
                h = (h + res) * mask

        # post 1x1 conv (zero-init in the module); this flow's Flip folded into its cols.
        stats = (jnp.dot((skip * mask).astype(cdt), wpost_ref[0],
                         preferred_element_type=jnp.float32)
                 + bpost_ref[0]) * mask                                  # (T, Chp)

        # mean_only coupling + folded Flip: new first half = x1*mask + stats, second = x0.
        a_new = stats + B * mask
        b_sc[...] = A
        a_sc[...] = a_new

        @pl.when(f == F - 1)
        def _():
            outa_ref[0] = a_new.astype(outa_ref.dtype)
            outb_ref[0] = A.astype(outb_ref.dtype)

    return kernel, max_pad


# ---------------------------------------------------------------------------- wrapper ---

def _compiler_params():
    # Batch axis "parallel" (v7x megacore; near-zero effect on 1-TC v5e/v6e); flow axis
    # carries state in scratch -> "arbitrary".
    kwargs = dict(dimension_semantics=("parallel", "arbitrary"))
    try:
        cap = int(pltpu.get_tpu_info().vmem_capacity_bytes)
        kwargs["vmem_limit_bytes"] = int(min(cap * 3 // 4, 112 * 1024 * 1024))
    except Exception:
        kwargs["vmem_limit_bytes"] = 48 * 1024 * 1024   # safe on v5e/v6e (128 MiB) and v7x (64 MiB)
    return pltpu.CompilerParams(**kwargs)


def flow_forward(x, x_mask, kparams):
    """Flow.forward: n_flows x (ResidualCouplingLayer -> Flip) in ONE pallas_call.

    x: (B, C, T) f32 (PyTorch NCT), x_mask: (B, 1, T).  Returns the transformed (B, C, T)
    (the original Flow.forward returns None due to an upstream bug; we return x).
    """
    meta = kparams['meta']
    Ch, Chp, Hp = meta['Ch'], meta['Chp'], meta['Hp']
    K, L, F = meta['K'], meta['L'], meta['F']
    dr, cdt = meta['dilation_rate'], meta['compute_dtype']
    B, C, T = x.shape
    assert C == 2 * Ch

    # Single NCT -> NTC transpose for the whole flow stack; halves split and zero-padded to
    # lane multiples wrapper-side so every kernel ref is lane-dense / 128-aligned.
    x_tc = jnp.transpose(x, (0, 2, 1)).astype(jnp.float32)            # (B, T, C)
    pad_c = [(0, 0), (0, 0), (0, Chp - Ch)]
    x0 = jnp.pad(x_tc[:, :, :Ch], pad_c)                              # (B, T, Chp)
    x1 = jnp.pad(x_tc[:, :, Ch:], pad_c)                              # (B, T, Chp)
    mask_tc = jnp.transpose(x_mask, (0, 2, 1)).astype(jnp.float32)    # (B, T, 1)

    kernel, max_pad = _make_flow_kernel(T, Chp, Hp, K, L, F, dr, cdt)

    # Advisory cost estimate for XLA scheduling.
    flops = 2 * B * F * T * (Chp * Hp + L * (2 * K + 2) * Hp * Hp + Hp * Chp)
    w_bytes = sum(int(kparams[k].size) * kparams[k].dtype.itemsize
                  for k in kparams if k != 'meta')
    io_bytes = (int(x0.size) + int(x1.size) + int(mask_tc.size) + 2 * B * T * Chp) * 4
    cost = pl.CostEstimate(flops=int(flops),
                           transcendentals=int(2 * B * F * T * Hp * L),
                           bytes_accessed=int(io_bytes + B * w_bytes))

    out_a, out_b = pl.pallas_call(
        kernel,
        out_shape=(jax.ShapeDtypeStruct((B, T, Chp), jnp.float32),
                   jax.ShapeDtypeStruct((B, T, Chp), jnp.float32)),
        grid=(B, F),
        in_specs=[
            pl.BlockSpec((1, T, Chp), lambda b, f: (b, 0, 0)),            # x0
            pl.BlockSpec((1, T, Chp), lambda b, f: (b, 0, 0)),            # x1
            pl.BlockSpec((1, T, 1), lambda b, f: (b, 0, 0)),              # mask
            pl.BlockSpec((1, Chp, Hp), lambda b, f: (f, 0, 0)),           # w_pre
            pl.BlockSpec((1, 1, Hp), lambda b, f: (f, 0, 0)),             # b_pre
            pl.BlockSpec((1, L * K, Hp, Hp), lambda b, f: (f, 0, 0, 0)),  # w_in_t
            pl.BlockSpec((1, L, 1, Hp), lambda b, f: (f, 0, 0, 0)),       # b_in_t
            pl.BlockSpec((1, L * K, Hp, Hp), lambda b, f: (f, 0, 0, 0)),  # w_in_s
            pl.BlockSpec((1, L, 1, Hp), lambda b, f: (f, 0, 0, 0)),       # b_in_s
            pl.BlockSpec((1, L, Hp, Hp), lambda b, f: (f, 0, 0, 0)),      # w_res
            pl.BlockSpec((1, L, 1, Hp), lambda b, f: (f, 0, 0, 0)),       # b_res
            pl.BlockSpec((1, L, Hp, Hp), lambda b, f: (f, 0, 0, 0)),      # w_skip
            pl.BlockSpec((1, L, 1, Hp), lambda b, f: (f, 0, 0, 0)),       # b_skip
            pl.BlockSpec((1, Hp, Chp), lambda b, f: (f, 0, 0)),           # w_post
            pl.BlockSpec((1, 1, Chp), lambda b, f: (f, 0, 0)),            # b_post
        ],
        out_specs=(pl.BlockSpec((1, T, Chp), lambda b, f: (b, 0, 0)),
                   pl.BlockSpec((1, T, Chp), lambda b, f: (b, 0, 0))),
        scratch_shapes=[pltpu.VMEM((T, Chp), jnp.float32),         # coupling state half A
                        pltpu.VMEM((T, Chp), jnp.float32),         # coupling state half B
                        pltpu.VMEM((T + 2 * max_pad, Hp), cdt)],   # zero-halo conv slab
        compiler_params=_compiler_params(),
        cost_estimate=cost,
    )(x0, x1, mask_tc,
      kparams['w_pre'], kparams['b_pre'],
      kparams['w_in_t'], kparams['b_in_t'], kparams['w_in_s'], kparams['b_in_s'],
      kparams['w_res'], kparams['b_res'], kparams['w_skip'], kparams['b_skip'],
      kparams['w_post'], kparams['b_post'])

    # Undo padding; apply the residual channel reversal left over from folding the F Flips
    # into weights (identity when F is even); single NTC -> NCT transpose.  XLA fuses
    # slice + reverse + concat + transpose into one output copy.
    out_a = out_a[:, :, :Ch]
    out_b = out_b[:, :, :Ch]
    if F % 2 == 1:
        out_a = out_a[:, :, ::-1]
        out_b = out_b[:, :, ::-1]
    out_tc = jnp.concatenate([out_a, out_b], axis=-1)                  # (B, T, C)
    return jnp.transpose(out_tc, (0, 2, 1))                           # (B, C, T)


# ----------------------------------------------------------- params (PyTorch-shaped) ----

def init_torch_params(key, channels, kernel_size, n_layers, zero_post=True):
    C, Ch, H, K, L = channels, channels // 2, channels, kernel_size, n_layers
    keys = iter(jax.random.split(key, 4 * L + 4))

    def rnd(shape, scale=0.1):
        return (scale * jax.random.normal(next(keys), shape)).astype(jnp.float32)

    p = {
        'pre_w': rnd((C, Ch, 1)),
        'pre_b': rnd((C,)),
        'in_w': [rnd((2 * H, H, K)) for _ in range(L)],
        'in_b': [rnd((2 * H,)) for _ in range(L)],
        'rs_w': [rnd((2 * H, H, 1)) for _ in range(L - 1)] + [rnd((H, H, 1))],
        'rs_b': [rnd((2 * H,)) for _ in range(L - 1)] + [rnd((H,))],
    }
    if zero_post:
        # nn.Conv1d post is zero-initialized in the module's __init__
        p['post_w'] = jnp.zeros((Ch, C, 1), jnp.float32)
        p['post_b'] = jnp.zeros((Ch,), jnp.float32)
    else:
        p['post_w'] = rnd((Ch, C, 1))
        p['post_b'] = rnd((Ch,), scale=0.05)
    return p


def to_flow_kernel_params(flow_tparams, channels, kernel_size, dilation_rate, n_layers,
                          compute_dtype=jnp.bfloat16, lane_multiple=128):
    """Stack + reshape all flows' PyTorch-shaped params for the fused kernel.

    Applies the Flip fold (reverse w_pre input rows / w_post output cols for odd flows),
    splits gate weights into tanh/sigmoid stacks and res/skip stacks, zero-pads channel
    dims to lane multiples, and casts matmul weights to compute_dtype once.
    """
    assert channels % 2 == 0
    C, Ch, H, K, L = channels, channels // 2, channels, kernel_size, n_layers
    F = len(flow_tparams)
    Chp = _round_up(Ch, lane_multiple)
    Hp = _round_up(H, lane_multiple)
    cdt = compute_dtype

    def padw(w, rows, cols):
        return jnp.pad(w, ((0, rows - w.shape[0]), (0, cols - w.shape[1])))

    w_pre, b_pre, w_post, b_post = [], [], [], []
    w_in_t, w_in_s, b_in_t, b_in_s = [], [], [], []
    w_res, b_res, w_skip, b_skip = [], [], [], []

    for t, tp in enumerate(flow_tparams):
        flip = (t % 2 == 1)

        wp = jnp.transpose(tp['pre_w'][:, :, 0])                 # (Ch, H)
        if flip:
            wp = wp[::-1, :]
        w_pre.append(padw(wp, Chp, Hp))
        b_pre.append(jnp.pad(tp['pre_b'], (0, Hp - H))[None, :])

        wit, wis, bit, bis = [], [], [], []
        for i in range(L):
            wi = jnp.transpose(tp['in_w'][i], (2, 1, 0))         # (K, H, 2H): [tap, in, out]
            bi = tp['in_b'][i]
            for tap in range(K):
                wit.append(padw(wi[tap, :, :H], Hp, Hp))
                wis.append(padw(wi[tap, :, H:], Hp, Hp))
            bit.append(jnp.pad(bi[:H], (0, Hp - H))[None, :])
            bis.append(jnp.pad(bi[H:], (0, Hp - H))[None, :])
        w_in_t.append(jnp.stack(wit))                            # (L*K, Hp, Hp)
        w_in_s.append(jnp.stack(wis))
        b_in_t.append(jnp.stack(bit))                            # (L, 1, Hp)
        b_in_s.append(jnp.stack(bis))

        wr, br, wk, bk = [], [], [], []
        for i in range(L):
            w = jnp.transpose(tp['rs_w'][i][:, :, 0])            # (H, 2H) or (H, H)
            b = tp['rs_b'][i]
            if i < L - 1:
                wr.append(padw(w[:, :H], Hp, Hp))
                br.append(jnp.pad(b[:H], (0, Hp - H))[None, :])
                wk.append(padw(w[:, H:], Hp, Hp))
                bk.append(jnp.pad(b[H:], (0, Hp - H))[None, :])
            else:   # last layer outputs only skip; res slot unused (kernel skips it)
                wr.append(jnp.zeros((Hp, Hp), jnp.float32))
                br.append(jnp.zeros((1, Hp), jnp.float32))
                wk.append(padw(w, Hp, Hp))
                bk.append(jnp.pad(b, (0, Hp - H))[None, :])
        w_res.append(jnp.stack(wr)); b_res.append(jnp.stack(br))
        w_skip.append(jnp.stack(wk)); b_skip.append(jnp.stack(bk))

        wpo = jnp.transpose(tp['post_w'][:, :, 0])               # (H, Ch)
        bpo = tp['post_b']
        if flip:
            wpo = wpo[:, ::-1]
            bpo = bpo[::-1]
        w_post.append(padw(wpo, Hp, Chp))
        b_post.append(jnp.pad(bpo, (0, Chp - Ch))[None, :])

    return {
        'w_pre': jnp.stack(w_pre).astype(cdt),    # (F, Chp, Hp)
        'b_pre': jnp.stack(b_pre),                # (F, 1, Hp)   f32
        'w_in_t': jnp.stack(w_in_t).astype(cdt),  # (F, L*K, Hp, Hp)
        'b_in_t': jnp.stack(b_in_t),              # (F, L, 1, Hp)
        'w_in_s': jnp.stack(w_in_s).astype(cdt),
        'b_in_s': jnp.stack(b_in_s),
        'w_res': jnp.stack(w_res).astype(cdt),    # (F, L, Hp, Hp)
        'b_res': jnp.stack(b_res),                # (F, L, 1, Hp)
        'w_skip': jnp.stack(w_skip).astype(cdt),
        'b_skip': jnp.stack(b_skip),
        'w_post': jnp.stack(w_post).astype(cdt),  # (F, Hp, Chp)
        'b_post': jnp.stack(b_post),              # (F, 1, Chp)
        'meta': dict(C=C, Ch=Ch, H=H, Chp=Chp, Hp=Hp, K=K, L=L, F=F,
                     dilation_rate=dilation_rate, compute_dtype=cdt),
    }


# --------------------------------------------------------------- pure-JAX reference -----

def _conv1d_ref(x, w, b, dilation=1, padding=0):
    out = jax.lax.conv_general_dilated(
        x, w, window_strides=(1,), padding=[(padding, padding)],
        rhs_dilation=(dilation,), dimension_numbers=('NCH', 'OIH', 'NCH'))
    return out + b[None, :, None]


def ref_coupling_forward(x, x_mask, tp, channels, kernel_size, dilation_rate, n_layers):
    C, Ch, H, K, L = channels, channels // 2, channels, kernel_size, n_layers
    x0, x1 = x[:, :Ch], x[:, Ch:]
    h = _conv1d_ref(x0, tp['pre_w'], tp['pre_b']) * x_mask
    skip = jnp.zeros_like(h)
    for i in range(L):
        dil = dilation_rate ** i
        pad = (K * dil - dil) // 2
        x_in = _conv1d_ref(h, tp['in_w'][i], tp['in_b'][i], dilation=dil, padding=pad)
        acts = jnp.tanh(x_in[:, :H]) * jax.nn.sigmoid(x_in[:, H:])
        rs = _conv1d_ref(acts, tp['rs_w'][i], tp['rs_b'][i])
        if i < L - 1:
            h = (h + rs[:, :H]) * x_mask
            skip = skip + rs[:, H:]
        else:
            skip = skip + rs
    out_wn = skip * x_mask
    stats = _conv1d_ref(out_wn, tp['post_w'], tp['post_b']) * x_mask
    x1n = stats + x1 * x_mask
    return jnp.concatenate([x0, x1n], axis=1)


def ref_flow_forward(x, x_mask, flow_tparams, channels, kernel_size, dilation_rate, n_layers):
    for tp in flow_tparams:
        x = ref_coupling_forward(x, x_mask, tp, channels, kernel_size, dilation_rate, n_layers)
        x = x[:, ::-1, :]    # Flip == torch.flip(x, dims=[1]) on NCT
    return x


# ------------------------------------------------------------------------------- main ---

if __name__ == "__main__":
    key = jax.random.PRNGKey(0)
    k0, k1, k2, k3, kx, kx2 = jax.random.split(key, 6)

    # --- config 1: channels=8, K=5, dilation_rate=2, n_layers=4 ---
    channels, kernel_size, dilation_rate, n_layers = 8, 5, 2, 4
    B, T = 2, 16
    x = jax.random.normal(kx, (B, channels, T), jnp.float32)
    lengths = jnp.array([T, T - 5])
    x_mask = (jnp.arange(T)[None, None, :] < lengths[:, None, None]).astype(jnp.float32)

    tp_a = init_torch_params(k0, channels, kernel_size, n_layers, zero_post=True)
    tp_b = init_torch_params(k1, channels, kernel_size, n_layers, zero_post=False)
    tp_c = init_torch_params(k2, channels, kernel_size, n_layers, zero_post=False)

    def run(flow_tp, cdt):
        kp = to_flow_kernel_params(flow_tp, channels, kernel_size, dilation_rate, n_layers,
                                   compute_dtype=cdt)
        return jax.block_until_ready(flow_forward(x, x_mask, kp))

    def ref(flow_tp):
        return ref_flow_forward(x, x_mask, flow_tp, channels, kernel_size,
                                dilation_rate, n_layers)

    # 1) module-faithful init (zero post conv), one flow, exact f32 path
    o = run([tp_a], jnp.float32); r = ref([tp_a])
    assert jnp.allclose(o, r, atol=1e-5, rtol=1e-5), float(jnp.max(jnp.abs(o - r)))

    # 2) two flows, non-zero post weights, exact f32 path (even-F flip fold)
    o = run([tp_b, tp_c], jnp.float32); r = ref([tp_b, tp_c])
    assert jnp.allclose(o, r, atol=1e-4, rtol=1e-4), float(jnp.max(jnp.abs(o - r)))

    # 3) three flows, bf16 MXU path (odd-F flip fold + final reversal), loose tolerance
    o = run([tp_b, tp_c, tp_a], jnp.bfloat16); r = ref([tp_b, tp_c, tp_a])
    assert jnp.allclose(o, r, atol=3e-2, rtol=3e-2), float(jnp.max(jnp.abs(o - r)))

    # 4) different hyper-params (channels=12, K=3, dilation_rate=1, n_layers=2), f32 exact
    channels2, kernel_size2, dilation_rate2, n_layers2 = 12, 3, 1, 2
    B2, T2 = 2, 24
    x2 = jax.random.normal(kx2, (B2, channels2, T2), jnp.float32)
    lengths2 = jnp.array([T2, T2 - 7])
    x_mask2 = (jnp.arange(T2)[None, None, :] < lengths2[:, None, None]).astype(jnp.float32)
    tps2 = [init_torch_params(k3, channels2, kernel_size2, n_layers2, zero_post=False),
            init_torch_params(k0, channels2, kernel_size2, n_layers2, zero_post=True)]
    kp2 = to_flow_kernel_params(tps2, channels2, kernel_size2, dilation_rate2, n_layers2,
                                compute_dtype=jnp.float32)
    o2 = jax.block_until_ready(flow_forward(x2, x_mask2, kp2))
    r2 = ref_flow_forward(x2, x_mask2, tps2, channels2, kernel_size2,
                          dilation_rate2, n_layers2)
    assert jnp.allclose(o2, r2, atol=1e-4, rtol=1e-4), float(jnp.max(jnp.abs(o2 - r2)))

    print("KERNEL_OK")
</pallas_src>

<mosaic_0001>
module attributes {stable_mosaic.version = 11 : i64} {
  func.func @kernel(%arg0: i32, %arg1: i32, %arg2: memref<1x16x128xf32, #tpu.memory_space<vmem>>, %arg3: memref<1x16x128xf32, #tpu.memory_space<vmem>>, %arg4: memref<1x16x1xf32, #tpu.memory_space<vmem>>, %arg5: memref<1x128x128xf32, #tpu.memory_space<vmem>>, %arg6: memref<1x1x128xf32, #tpu.memory_space<vmem>>, %arg7: memref<1x20x128x128xf32, #tpu.memory_space<vmem>>, %arg8: memref<1x4x1x128xf32, #tpu.memory_space<vmem>>, %arg9: memref<1x20x128x128xf32, #tpu.memory_space<vmem>>, %arg10: memref<1x4x1x128xf32, #tpu.memory_space<vmem>>, %arg11: memref<1x4x128x128xf32, #tpu.memory_space<vmem>>, %arg12: memref<1x4x1x128xf32, #tpu.memory_space<vmem>>, %arg13: memref<1x4x128x128xf32, #tpu.memory_space<vmem>>, %arg14: memref<1x4x1x128xf32, #tpu.memory_space<vmem>>, %arg15: memref<1x128x128xf32, #tpu.memory_space<vmem>>, %arg16: memref<1x1x128xf32, #tpu.memory_space<vmem>>, %arg17: memref<1x16x128xf32, #tpu.memory_space<vmem>>, %arg18: memref<1x16x128xf32, #tpu.memory_space<vmem>>, %arg19: memref<16x128xf32, #tpu.memory_space<vmem>>, %arg20: memref<16x128xf32, #tpu.memory_space<vmem>>, %arg21: memref<48x128xf32, #tpu.memory_space<vmem>>) attributes {dimension_semantics = [#tpu.dimension_semantics<parallel>, #tpu.dimension_semantics<arbitrary>], iteration_bounds = array<i64: 2, 1>, scalar_prefetch = 0 : i64, scratch_operands = 3 : i64, tpu.core_type = #tpu.core_type<tc>, window_params = [{transform_indices = @transform_0, window_bounds = array<i64: 1, 16, 128>}, {transform_indices = @transform_1, window_bounds = array<i64: 1, 16, 128>}, {transform_indices = @transform_2, window_bounds = array<i64: 1, 16, 1>}, {transform_indices = @transform_3, window_bounds = array<i64: 1, 128, 128>}, {transform_indices = @transform_4, window_bounds = array<i64: 1, 1, 128>}, {transform_indices = @transform_5, window_bounds = array<i64: 1, 20, 128, 128>}, {transform_indices = @transform_6, window_bounds = array<i64: 1, 4, 1, 128>}, {transform_indices = @transform_7, window_bounds = array<i64: 1, 20, 128, 128>}, {transform_indices = @transform_8, window_bounds = array<i64: 1, 4, 1, 128>}, {transform_indices = @transform_9, window_bounds = array<i64: 1, 4, 128, 128>}, {transform_indices = @transform_10, window_bounds = array<i64: 1, 4, 1, 128>}, {transform_indices = @transform_11, window_bounds = array<i64: 1, 4, 128, 128>}, {transform_indices = @transform_12, window_bounds = array<i64: 1, 4, 1, 128>}, {transform_indices = @transform_13, window_bounds = array<i64: 1, 128, 128>}, {transform_indices = @transform_14, window_bounds = array<i64: 1, 1, 128>}, {transform_indices = @transform_15, window_bounds = array<i64: 1, 16, 128>}, {transform_indices = @transform_16, window_bounds = array<i64: 1, 16, 128>}]} {
    %c0_i32 = arith.constant 0 : i32
    %0 = arith.cmpi eq, %arg1, %c0_i32 : i32
    %1 = arith.extui %0 : i1 to i32
    %c0_i32_0 = arith.constant 0 : i32
    %2 = arith.cmpi ne, %1, %c0_i32_0 : i32
    scf.if %2 {
      %c0_351 = arith.constant 0 : index
      %c0_352 = arith.constant 0 : index
      %c0_353 = arith.constant 0 : index
      %332 = vector.load %arg2[%c0_351, %c0_352, %c0_353] : memref<1x16x128xf32, #tpu.memory_space<vmem>>, vector<1x16x128xf32>
      %333 = vector.shape_cast %332 : vector<1x16x128xf32> to vector<16x128xf32>
      %c0_354 = arith.constant 0 : index
      %c0_355 = arith.constant 0 : index
      %334 = vector.load %arg19[%c0_354, %c0_355] : memref<16x128xf32, #tpu.memory_space<vmem>>, vector<16x128xf32>
      tpu.vector_store %arg19[%c0_354, %c0_355], %333 {strides = array<i32>} : memref<16x128xf32, #tpu.memory_space<vmem>>, vector<16x128xf32>,
      %c0_356 = arith.constant 0 : index
      %c0_357 = arith.constant 0 : index
      %c0_358 = arith.constant 0 : index
      %335 = vector.load %arg3[%c0_356, %c0_357, %c0_358] : memref<1x16x128xf32, #tpu.memory_space<vmem>>, vector<1x16x128xf32>
      %336 = vector.shape_cast %335 : vector<1x16x128xf32> to vector<16x128xf32>
      %c0_359 = arith.constant 0 : index
      %c0_360 = arith.constant 0 : index
      %337 = vector.load %arg20[%c0_359, %c0_360] : memref<16x128xf32, #tpu.memory_space<vmem>>, vector<16x128xf32>
      tpu.vector_store %arg20[%c0_359, %c0_360], %336 {strides = array<i32>} : memref<16x128xf32, #tpu.memory_space<vmem>>, vector<16x128xf32>,
      %cst_361 = arith.constant 0.000000e+00 : f32
      %338 = vector.broadcast %cst_361 : f32 to vector<16x128xf32>
      %c0_362 = arith.constant 0 : index
      %c0_363 = arith.constant 0 : index
      %339 = vector.load %arg21[%c0_362, %c0_363] : memref<48x128xf32, #tpu.memory_space<vmem>>, vector<16x128xf32>
      tpu.vector_store %arg21[%c0_362, %c0_363], %338 {strides = array<i32>} : memref<48x128xf32, #tpu.memory_space<vmem>>, vector<16x128xf32>,
      %cst_364 = arith.constant 0.000000e+00 : f32
      %340 = vector.broadcast %cst_364 : f32 to vector<16x128xf32>
      %c32_365 = arith.constant 32 : index
      %c0_366 = arith.constant 0 : index
      %341 = vector.load %arg21[%c32_365, %c0_366] : memref<48x128xf32, #tpu.memory_space<vmem>>, vector<16x128xf32>
      tpu.vector_store %arg21[%c32_365, %c0_366], %340 {strides = array<i32>} : memref<48x128xf32, #tpu.memory_space<vmem>>, vector<16x128xf32>,
    } else {
    }
    %c0 = arith.constant 0 : index
    %c0_1 = arith.constant 0 : index
    %c0_2 = arith.constant 0 : index
    %3 = vector.load %arg4[%c0, %c0_1, %c0_2] : memref<1x16x1xf32, #tpu.memory_space<vmem>>, vector<1x16x1xf32>
    %4 = vector.shape_cast %3 : vector<1x16x1xf32> to vector<16x1xf32>
    %c0_3 = arith.constant 0 : index
    %c0_4 = arith.constant 0 : index
    %5 = vector.load %arg19[%c0_3, %c0_4] : memref<16x128xf32, #tpu.memory_space<vmem>>, vector<16x128xf32>
    %c0_5 = arith.constant 0 : index
    %c0_6 = arith.constant 0 : index
    %6 = vector.load %arg20[%c0_5, %c0_6] : memref<16x128xf32, #tpu.memory_space<vmem>>, vector<16x128xf32>
    %c0_7 = arith.constant 0 : index
    %c0_8 = arith.constant 0 : index
    %c0_9 = arith.constant 0 : index
    %7 = vector.load %arg5[%c0_7, %c0_8, %c0_9] : memref<1x128x128xf32, #tpu.memory_space<vmem>>, vector<1x128x128xf32>
    %8 = vector.shape_cast %7 : vector<1x128x128xf32> to vector<128x128xf32>
    %cst = arith.constant dense<0.000000e+00> : vector<16x128xf32>
    %9 = tpu.matmul %5, %8, %cst {dimension_numbers = #tpu.dot_dimension_numbers<[1], [0], [0], [1], [0, 0, 1, 1], [], []>} : vector<16x128xf32>, vector<128x128xf32>, vector<16x128xf32> -> vector<16x128xf32>
    %c0_10 = arith.constant 0 : index
    %c0_11 = arith.constant 0 : index
    %c0_12 = arith.constant 0 : index
    %10 = vector.load %arg6[%c0_10, %c0_11, %c0_12] : memref<1x1x128xf32, #tpu.memory_space<vmem>>, vector<1x1x128xf32>
    %11 = vector.shape_cast %10 : vector<1x1x128xf32> to vector<1x128xf32>
    %12 = vector.broadcast %11 : vector<1x128xf32> to vector<16x128xf32>
    %13 = arith.addf %9, %12 : vector<16x128xf32>
    %14 = vector.broadcast %4 : vector<16x1xf32> to vector<16x128xf32>
    %15 = arith.mulf %13, %14 : vector<16x128xf32>
    %c16 = arith.constant 16 : index
    %c0_13 = arith.constant 0 : index
    %16 = vector.load %arg21[%c16, %c0_13] : memref<48x128xf32, #tpu.memory_space<vmem>>, vector<16x128xf32>
    tpu.vector_store %arg21[%c16, %c0_13], %15 {strides = array<i32>} : memref<48x128xf32, #tpu.memory_space<vmem>>, vector<16x128xf32>,
    %c14 = arith.constant 14 : index
    %c0_14 = arith.constant 0 : index
    %17 = vector.load %arg21[%c14, %c0_14] : memref<48x128xf32, #tpu.memory_space<vmem>>, vector<16x128xf32>
    %c0_15 = arith.constant 0 : index
    %c0_16 = arith.constant 0 : index
    %c0_17 = arith.constant 0 : index
    %c0_18 = arith.constant 0 : index
    %18 = vector.load %arg7[%c0_15, %c0_16, %c0_17, %c0_18] : memref<1x20x128x128xf32, #tpu.memory_space<vmem>>, vector<1x1x128x128xf32>
    %19 = vector.shape_cast %18 : vector<1x1x128x128xf32> to vector<128x128xf32>
    %cst_19 = arith.constant dense<0.000000e+00> : vector<16x128xf32>
    %20 = tpu.matmul %17, %19, %cst_19 {dimension_numbers = #tpu.dot_dimension_numbers<[1], [0], [0], [1], [0, 0, 1, 1], [], []>} : vector<16x128xf32>, vector<128x128xf32>, vector<16x128xf32> -> vector<16x128xf32>
    %c0_20 = arith.constant 0 : index
    %c0_21 = arith.constant 0 : index
    %c0_22 = arith.constant 0 : index
    %c0_23 = arith.constant 0 : index
    %21 = vector.load %arg8[%c0_20, %c0_21, %c0_22, %c0_23] : memref<1x4x1x128xf32, #tpu.memory_space<vmem>>, vector<1x1x1x128xf32>
    %22 = vector.shape_cast %21 : vector<1x1x1x128xf32> to vector<1x128xf32>
    %23 = vector.broadcast %22 : vector<1x128xf32> to vector<16x128xf32>
    %24 = arith.addf %20, %23 : vector<16x128xf32>
    %c0_24 = arith.constant 0 : index
    %c0_25 = arith.constant 0 : index
    %c0_26 = arith.constant 0 : index
    %c0_27 = arith.constant 0 : index
    %25 = vector.load %arg9[%c0_24, %c0_25, %c0_26, %c0_27] : memref<1x20x128x128xf32, #tpu.memory_space<vmem>>, vector<1x1x128x128xf32>
    %26 = vector.shape_cast %25 : vector<1x1x128x128xf32> to vector<128x128xf32>
    %cst_28 = arith.constant dense<0.000000e+00> : vector<16x128xf32>
    %27 = tpu.matmul %17, %26, %cst_28 {dimension_numbers = #tpu.dot_dimension_numbers<[1], [0], [0], [1], [0, 0, 1, 1], [], []>} : vector<16x128xf32>, vector<128x128xf32>, vector<16x128xf32> -> vector<16x128xf32>
    %c0_29 = arith.constant 0 : index
    %c0_30 = arith.constant 0 : index
    %c0_31 = arith.constant 0 : index
    %c0_32 = arith.constant 0 : index
    %28 = vector.load %arg10[%c0_29, %c0_30, %c0_31, %c0_32] : memref<1x4x1x128xf32, #tpu.memory_space<vmem>>, vector<1x1x1x128xf32>
    %29 = vector.shape_cast %28 : vector<1x1x1x128xf32> to vector<1x128xf32>
    %30 = vector.broadcast %29 : vector<1x128xf32> to vector<16x128xf32>
    %31 = arith.addf %27, %30 : vector<16x128xf32>
    %c15 = arith.constant 15 : index
    %c0_33 = arith.constant 0 : index
    %32 = vector.load %arg21[%c15, %c0_33] : memref<48x128xf32, #tpu.memory_space<vmem>>, vector<16x128xf32>
    %c0_34 = arith.constant 0 : index
    %c1 = arith.constant 1 : index
    %c0_35 = arith.constant 0 : index
    %c0_36 = arith.constant 0 : index
    %33 = vector.load %arg7[%c0_34, %c1, %c0_35, %c0_36] : memref<1x20x128x128xf32, #tpu.memory_space<vmem>>, vector<1x1x128x128xf32>
    %34 = vector.shape_cast %33 : vector<1x1x128x128xf32> to vector<128x128xf32>
    %cst_37 = arith.constant dense<0.000000e+00> : vector<16x128xf32>
    %35 = tpu.matmul %32, %34, %cst_37 {dimension_numbers = #tpu.dot_dimension_numbers<[1], [0], [0], [1], [0, 0, 1, 1], [], []>} : vector<16x128xf32>, vector<128x128xf32>, vector<16x128xf32> -> vector<16x128xf32>
    %36 = arith.addf %24, %35 : vector<16x128xf32>
    %c0_38 = arith.constant 0 : index
    %c1_39 = arith.constant 1 : index
    %c0_40 = arith.constant 0 : index
    %c0_41 = arith.constant 0 : index
    %37 = vector.load %arg9[%c0_38, %c1_39, %c0_40, %c0_41] : memref<1x20x128x128xf32, #tpu.memory_space<vmem>>, vector<1x1x128x128xf32>
    %38 = vector.shape_cast %37 : vector<1x1x128x128xf32> to vector<128x128xf32>
    %cst_42 = arith.constant dense<0.000000e+00> : vector<16x128xf32>
    %39 = tpu.matmul %32, %38, %cst_42 {dimension_numbers = #tpu.dot_dimension_numbers<[1], [0], [0], [1], [0, 0, 1, 1], [], []>} : vector<16x128xf32>, vector<128x128xf32>, vector<16x128xf32> -> vector<16x128xf32>
    %40 = arith.addf %31, %39 : vector<16x128xf32>
    %c16_43 = arith.constant 16 : index
    %c0_44 = arith.constant 0 : index
    %41 = vector.load %arg21[%c16_43, %c0_44] : memref<48x128xf32, #tpu.memory_space<vmem>>, vector<16x128xf32>
    %c0_45 = arith.constant 0 : index
    %c2 = arith.constant 2 : index
    %c0_46 = arith.constant 0 : index
    %c0_47 = arith.constant 0 : index
    %42 = vector.load %arg7[%c0_45, %c2, %c0_46, %c0_47] : memref<1x20x128x128xf32, #tpu.memory_space<vmem>>, vector<1x1x128x128xf32>
    %43 = vector.shape_cast %42 : vector<1x1x128x128xf32> to vector<128x128xf32>
    %cst_48 = arith.constant dense<0.000000e+00> : vector<16x128xf32>
    %44 = tpu.matmul %41, %43, %cst_48 {dimension_numbers = #tpu.dot_dimension_numbers<[1], [0], [0], [1], [0, 0, 1, 1], [], []>} : vector<16x128xf32>, vector<128x128xf32>, vector<16x128xf32> -> vector<16x128xf32>
    %45 = arith.addf %36, %44 : vector<16x128xf32>
    %c0_49 = arith.constant 0 : index
    %c2_50 = arith.constant 2 : index
    %c0_51 = arith.constant 0 : index
    %c0_52 = arith.constant 0 : index
    %46 = vector.load %arg9[%c0_49, %c2_50, %c0_51, %c0_52] : memref<1x20x128x128xf32, #tpu.memory_space<vmem>>, vector<1x1x128x128xf32>
    %47 = vector.shape_cast %46 : vector<1x1x128x128xf32> to vector<128x128xf32>
    %cst_53 = arith.constant dense<0.000000e+00> : vector<16x128xf32>
    %48 = tpu.matmul %41, %47, %cst_53 {dimension_numbers = #tpu.dot_dimension_numbers<[1], [0], [0], [1], [0, 0, 1, 1], [], []>} : vector<16x128xf32>, vector<128x128xf32>, vector<16x128xf32> -> vector<16x128xf32>
    %49 = arith.addf %40, %48 : vector<16x128xf32>
    %c17 = arith.constant 17 : index
    %c0_54 = arith.constant 0 : index
    %50 = vector.load %arg21[%c17, %c0_54] : memref<48x128xf32, #tpu.memory_space<vmem>>, vector<16x128xf32>
    %c0_55 = arith.constant 0 : index
    %c3 = arith.constant 3 : index
    %c0_56 = arith.constant 0 : index
    %c0_57 = arith.constant 0 : index
    %51 = vector.load %arg7[%c0_55, %c3, %c0_56, %c0_57] : memref<1x20x128x128xf32, #tpu.memory_space<vmem>>, vector<1x1x128x128xf32>
    %52 = vector.shape_cast %51 : vector<1x1x128x128xf32> to vector<128x128xf32>
    %cst_58 = arith.constant dense<0.000000e+00> : vector<16x128xf32>
    %53 = tpu.matmul %50, %52, %cst_58 {dimension_numbers = #tpu.dot_dimension_numbers<[1], [0], [0], [1], [0, 0, 1, 1], [], []>} : vector<16x128xf32>, vector<128x128xf32>, vector<16x128xf32> -> vector<16x128xf32>
    %54 = arith.addf %45, %53 : vector<16x128xf32>
    %c0_59 = arith.constant 0 : index
    %c3_60 = arith.constant 3 : index
    %c0_61 = arith.constant 0 : index
    %c0_62 = arith.constant 0 : index
    %55 = vector.load %arg9[%c0_59, %c3_60, %c0_61, %c0_62] : memref<1x20x128x128xf32, #tpu.memory_space<vmem>>, vector<1x1x128x128xf32>
    %56 = vector.shape_cast %55 : vector<1x1x128x128xf32> to vector<128x128xf32>
    %cst_63 = arith.constant dense<0.000000e+00> : vector<16x128xf32>
    %57 = tpu.matmul %50, %56, %cst_63 {dimension_numbers = #tpu.dot_dimension_numbers<[1], [0], [0], [1], [0, 0, 1, 1], [], []>} : vector<16x128xf32>, vector<128x128xf32>, vector<16x128xf32> -> vector<16x128xf32>
    %58 = arith.addf %49, %57 : vector<16x128xf32>
    %c18 = arith.constant 18 : index
    %c0_64 = arith.constant 0 : index
    %59 = vector.load %arg21[%c18, %c0_64] : memref<48x128xf32, #tpu.memory_space<vmem>>, vector<16x128xf32>
    %c0_65 = arith.constant 0 : index
    %c4 = arith.constant 4 : index
    %c0_66 = arith.constant 0 : index
    %c0_67 = arith.constant 0 : index
    %60 = vector.load %arg7[%c0_65, %c4, %c0_66, %c0_67] : memref<1x20x128x128xf32, #tpu.memory_space<vmem>>, vector<1x1x128x128xf32>
    %61 = vector.shape_cast %60 : vector<1x1x128x128xf32> to vector<128x128xf32>
    %cst_68 = arith.constant dense<0.000000e+00> : vector<16x128xf32>
    %62 = tpu.matmul %59, %61, %cst_68 {dimension_numbers = #tpu.dot_dimension_numbers<[1], [0], [0], [1], [0, 0, 1, 1], [], []>} : vector<16x128xf32>, vector<128x128xf32>, vector<16x128xf32> -> vector<16x128xf32>
    %63 = arith.addf %54, %62 : vector<16x128xf32>
    %c0_69 = arith.constant 0 : index
    %c4_70 = arith.constant 4 : index
    %c0_71 = arith.constant 0 : index
    %c0_72 = arith.constant 0 : index
    %64 = vector.load %arg9[%c0_69, %c4_70, %c0_71, %c0_72] : memref<1x20x128x128xf32, #tpu.memory_space<vmem>>, vector<1x1x128x128xf32>
    %65 = vector.shape_cast %64 : vector<1x1x128x128xf32> to vector<128x128xf32>
    %cst_73 = arith.constant dense<0.000000e+00> : vector<16x128xf32>
    %66 = tpu.matmul %59, %65, %cst_73 {dimension_numbers = #tpu.dot_dimension_numbers<[1], [0], [0], [1], [0, 0, 1, 1], [], []>} : vector<16x128xf32>, vector<128x128xf32>, vector<16x128xf32> -> vector<16x128xf32>
    %67 = arith.addf %58, %66 : vector<16x128xf32>
    %68 = math.tanh %63 : vector<16x128xf32>
    %69 = arith.negf %67 : vector<16x128xf32>
    %70 = math.exp %69 : vector<16x128xf32>
    %cst_74 = arith.constant 1.000000e+00 : f32
    %71 = vector.broadcast %cst_74 : f32 to vector<16x128xf32>
    %72 = arith.addf %71, %70 : vector<16x128xf32>
    %73 = arith.divf %71, %72 : vector<16x128xf32>
    %74 = arith.mulf %68, %73 : vector<16x128xf32>
    %c0_75 = arith.constant 0 : index
    %c0_76 = arith.constant 0 : index
    %c0_77 = arith.constant 0 : index
    %c0_78 = arith.constant 0 : index
    %75 = vector.load %arg13[%c0_75, %c0_76, %c0_77, %c0_78] : memref<1x4x128x128xf32, #tpu.memory_space<vmem>>, vector<1x1x128x128xf32>
    %76 = vector.shape_cast %75 : vector<1x1x128x128xf32> to vector<128x128xf32>
    %cst_79 = arith.constant dense<0.000000e+00> : vector<16x128xf32>
    %77 = tpu.matmul %74, %76, %cst_79 {dimension_numbers = #tpu.dot_dimension_numbers<[1], [0], [0], [1], [0, 0, 1, 1], [], []>} : vector<16x128xf32>, vector<128x128xf32>, vector<16x128xf32> -> vector<16x128xf32>
    %c0_80 = arith.constant 0 : index
    %c0_81 = arith.constant 0 : index
    %c0_82 = arith.constant 0 : index
    %c0_83 = arith.constant 0 : index
    %78 = vector.load %arg14[%c0_80, %c0_81, %c0_82, %c0_83] : memref<1x4x1x128xf32, #tpu.memory_space<vmem>>, vector<1x1x1x128xf32>
    %79 = vector.shape_cast %78 : vector<1x1x1x128xf32> to vector<1x128xf32>
    %80 = vector.broadcast %79 : vector<1x128xf32> to vector<16x128xf32>
    %81 = arith.addf %77, %80 : vector<16x128xf32>
    %c0_84 = arith.constant 0 : index
    %c0_85 = arith.constant 0 : index
    %c0_86 = arith.constant 0 : index
    %c0_87 = arith.constant 0 : index
    %82 = vector.load %arg11[%c0_84, %c0_85, %c0_86, %c0_87] : memref<1x4x128x128xf32, #tpu.memory_space<vmem>>, vector<1x1x128x128xf32>
    %83 = vector.shape_cast %82 : vector<1x1x128x128xf32> to vector<128x128xf32>
    %cst_88 = arith.constant dense<0.000000e+00> : vector<16x128xf32>
    %84 = tpu.matmul %74, %83, %cst_88 {dimension_numbers = #tpu.dot_dimension_numbers<[1], [0], [0], [1], [0, 0, 1, 1], [], []>} : vector<16x128xf32>, vector<128x128xf32>, vector<16x128xf32> -> vector<16x128xf32>
    %c0_89 = arith.constant 0 : index
    %c0_90 = arith.constant 0 : index
    %c0_91 = arith.constant 0 : index
    %c0_92 = arith.constant 0 : index
    %85 = vector.load %arg12[%c0_89, %c0_90, %c0_91, %c0_92] : memref<1x4x1x128xf32, #tpu.memory_space<vmem>>, vector<1x1x1x128xf32>
    %86 = vector.shape_cast %85 : vector<1x1x1x128xf32> to vector<1x128xf32>
    %87 = vector.broadcast %86 : vector<1x128xf32> to vector<16x128xf32>
    %88 = arith.addf %84, %87 : vector<16x128xf32>
    %89 = arith.addf %15, %88 : vector<16x128xf32>
    %90 = vector.broadcast %4 : vector<16x1xf32> to vector<16x128xf32>
    %91 = arith.mulf %89, %90 : vector<16x128xf32>
    %c16_93 = arith.constant 16 : index
    %c0_94 = arith.constant 0 : index
    %92 = vector.load %arg21[%c16_93, %c0_94] : memref<48x128xf32, #tpu.memory_space<vmem>>, vector<16x128xf32>
    tpu.vector_store %arg21[%c16_93, %c0_94], %91 {strides = array<i32>} : memref<48x128xf32, #tpu.memory_space<vmem>>, vector<16x128xf32>,
    %c12 = arith.constant 12 : index
    %c0_95 = arith.constant 0 : index
    %93 = vector.load %arg21[%c12, %c0_95] : memref<48x128xf32, #tpu.memory_space<vmem>>, vector<16x128xf32>
    %c0_96 = arith.constant 0 : index
    %c5 = arith.constant 5 : index
    %c0_97 = arith.constant 0 : index
    %c0_98 = arith.constant 0 : index
    %94 = vector.load %arg7[%c0_96, %c5, %c0_97, %c0_98] : memref<1x20x128x128xf32, #tpu.memory_space<vmem>>, vector<1x1x128x128xf32>
    %95 = vector.shape_cast %94 : vector<1x1x128x128xf32> to vector<128x128xf32>
    %cst_99 = arith.constant dense<0.000000e+00> : vector<16x128xf32>
    %96 = tpu.matmul %93, %95, %cst_99 {dimension_numbers = #tpu.dot_dimension_numbers<[1], [0], [0], [1], [0, 0, 1, 1], [], []>} : vector<16x128xf32>, vector<128x128xf32>, vector<16x128xf32> -> vector<16x128xf32>
    %c0_100 = arith.constant 0 : index
    %c1_101 = arith.constant 1 : index
    %c0_102 = arith.constant 0 : index
    %c0_103 = arith.constant 0 : index
    %97 = vector.load %arg8[%c0_100, %c1_101, %c0_102, %c0_103] : memref<1x4x1x128xf32, #tpu.memory_space<vmem>>, vector<1x1x1x128xf32>
    %98 = vector.shape_cast %97 : vector<1x1x1x128xf32> to vector<1x128xf32>
    %99 = vector.broadcast %98 : vector<1x128xf32> to vector<16x128xf32>
    %100 = arith.addf %96, %99 : vector<16x128xf32>
    %c0_104 = arith.constant 0 : index
    %c5_105 = arith.constant 5 : index
    %c0_106 = arith.constant 0 : index
    %c0_107 = arith.constant 0 : index
    %101 = vector.load %arg9[%c0_104, %c5_105, %c0_106, %c0_107] : memref<1x20x128x128xf32, #tpu.memory_space<vmem>>, vector<1x1x128x128xf32>
    %102 = vector.shape_cast %101 : vector<1x1x128x128xf32> to vector<128x128xf32>
    %cst_108 = arith.constant dense<0.000000e+00> : vector<16x128xf32>
    %103 = tpu.matmul %93, %102, %cst_108 {dimension_numbers = #tpu.dot_dimension_numbers<[1], [0], [0], [1], [0, 0, 1, 1], [], []>} : vector<16x128xf32>, vector<128x128xf32>, vector<16x128xf32> -> vector<16x128xf32>
    %c0_109 = arith.constant 0 : index
    %c1_110 = arith.constant 1 : index
    %c0_111 = arith.constant 0 : index
    %c0_112 = arith.constant 0 : index
    %104 = vector.load %arg10[%c0_109, %c1_110, %c0_111, %c0_112] : memref<1x4x1x128xf32, #tpu.memory_space<vmem>>, vector<1x1x1x128xf32>
    %105 = vector.shape_cast %104 : vector<1x1x1x128xf32> to vector<1x128xf32>
    %106 = vector.broadcast %105 : vector<1x128xf32> to vector<16x128xf32>
    %107 = arith.addf %103, %106 : vector<16x128xf32>
    %c14_113 = arith.constant 14 : index
    %c0_114 = arith.constant 0 : index
    %108 = vector.load %arg21[%c14_113, %c0_114] : memref<48x128xf32, #tpu.memory_space<vmem>>, vector<16x128xf32>
    %c0_115 = arith.constant 0 : index
    %c6 = arith.constant 6 : index
    %c0_116 = arith.constant 0 : index
    %c0_117 = arith.constant 0 : index
    %109 = vector.load %arg7[%c0_115, %c6, %c0_116, %c0_117] : memref<1x20x128x128xf32, #tpu.memory_space<vmem>>, vector<1x1x128x128xf32>
    %110 = vector.shape_cast %109 : vector<1x1x128x128xf32> to vector<128x128xf32>
    %cst_118 = arith.constant dense<0.000000e+00> : vector<16x128xf32>
    %111 = tpu.matmul %108, %110, %cst_118 {dimension_numbers = #tpu.dot_dimension_numbers<[1], [0], [0], [1], [0, 0, 1, 1], [], []>} : vector<16x128xf32>, vector<128x128xf32>, vector<16x128xf32> -> vector<16x128xf32>
    %112 = arith.addf %100, %111 : vector<16x128xf32>
    %c0_119 = arith.constant 0 : index
    %c6_120 = arith.constant 6 : index
    %c0_121 = arith.constant 0 : index
    %c0_122 = arith.constant 0 : index
    %113 = vector.load %arg9[%c0_119, %c6_120, %c0_121, %c0_122] : memref<1x20x128x128xf32, #tpu.memory_space<vmem>>, vector<1x1x128x128xf32>
    %114 = vector.shape_cast %113 : vector<1x1x128x128xf32> to vector<128x128xf32>
    %cst_123 = arith.constant dense<0.000000e+00> : vector<16x128xf32>
    %115 = tpu.matmul %108, %114, %cst_123 {dimension_numbers = #tpu.dot_dimension_numbers<[1], [0], [0], [1], [0, 0, 1, 1], [], []>} : vector<16x128xf32>, vector<128x128xf32>, vector<16x128xf32> -> vector<16x128xf32>
    %116 = arith.addf %107, %115 : vector<16x128xf32>
    %c16_124 = arith.constant 16 : index
    %c0_125 = arith.constant 0 : index
    %117 = vector.load %arg21[%c16_124, %c0_125] : memref<48x128xf32, #tpu.memory_space<vmem>>, vector<16x128xf32>
    %c0_126 = arith.constant 0 : index
    %c7 = arith.constant 7 : index
    %c0_127 = arith.constant 0 : index
    %c0_128 = arith.constant 0 : index
    %118 = vector.load %arg7[%c0_126, %c7, %c0_127, %c0_128] : memref<1x20x128x128xf32, #tpu.memory_space<vmem>>, vector<1x1x128x128xf32>
    %119 = vector.shape_cast %118 : vector<1x1x128x128xf32> to vector<128x128xf32>
    %cst_129 = arith.constant dense<0.000000e+00> : vector<16x128xf32>
    %120 = tpu.matmul %117, %119, %cst_129 {dimension_numbers = #tpu.dot_dimension_numbers<[1], [0], [0], [1], [0, 0, 1, 1], [], []>} : vector<16x128xf32>, vector<128x128xf32>, vector<16x128xf32> -> vector<16x128xf32>
    %121 = arith.addf %112, %120 : vector<16x128xf32>
    %c0_130 = arith.constant 0 : index
    %c7_131 = arith.constant 7 : index
    %c0_132 = arith.constant 0 : index
    %c0_133 = arith.constant 0 : index
    %122 = vector.load %arg9[%c0_130, %c7_131, %c0_132, %c0_133] : memref<1x20x128x128xf32, #tpu.memory_space<vmem>>, vector<1x1x128x128xf32>
    %123 = vector.shape_cast %122 : vector<1x1x128x128xf32> to vector<128x128xf32>
    %cst_134 = arith.constant dense<0.000000e+00> : vector<16x128xf32>
    %124 = tpu.matmul %117, %123, %cst_134 {dimension_numbers = #tpu.dot_dimension_numbers<[1], [0], [0], [1], [0, 0, 1, 1], [], []>} : vector<16x128xf32>, vector<128x128xf32>, vector<16x128xf32> -> vector<16x128xf32>
    %125 = arith.addf %116, %124 : vector<16x128xf32>
    %c18_135 = arith.constant 18 : index
    %c0_136 = arith.constant 0 : index
    %126 = vector.load %arg21[%c18_135, %c0_136] : memref<48x128xf32, #tpu.memory_space<vmem>>, vector<16x128xf32>
    %c0_137 = arith.constant 0 : index
    %c8 = arith.constant 8 : index
    %c0_138 = arith.constant 0 : index
    %c0_139 = arith.constant 0 : index
    %127 = vector.load %arg7[%c0_137, %c8, %c0_138, %c0_139] : memref<1x20x128x128xf32, #tpu.memory_space<vmem>>, vector<1x1x128x128xf32>
    %128 = vector.shape_cast %127 : vector<1x1x128x128xf32> to vector<128x128xf32>
    %cst_140 = arith.constant dense<0.000000e+00> : vector<16x128xf32>
    %129 = tpu.matmul %126, %128, %cst_140 {dimension_numbers = #tpu.dot_dimension_numbers<[1], [0], [0], [1], [0, 0, 1, 1], [], []>} : vector<16x128xf32>, vector<128x128xf32>, vector<16x128xf32> -> vector<16x128xf32>
    %130 = arith.addf %121, %129 : vector<16x128xf32>
    %c0_141 = arith.constant 0 : index
    %c8_142 = arith.constant 8 : index
    %c0_143 = arith.constant 0 : index
    %c0_144 = arith.constant 0 : index
    %131 = vector.load %arg9[%c0_141, %c8_142, %c0_143, %c0_144] : memref<1x20x128x128xf32, #tpu.memory_space<vmem>>, vector<1x1x128x128xf32>
    %132 = vector.shape_cast %131 : vector<1x1x128x128xf32> to vector<128x128xf32>
    %cst_145 = arith.constant dense<0.000000e+00> : vector<16x128xf32>
    %133 = tpu.matmul %126, %132, %cst_145 {dimension_numbers = #tpu.dot_dimension_numbers<[1], [0], [0], [1], [0, 0, 1, 1], [], []>} : vector<16x128xf32>, vector<128x128xf32>, vector<16x128xf32> -> vector<16x128xf32>
    %134 = arith.addf %125, %133 : vector<16x128xf32>
    %c20 = arith.constant 20 : index
    %c0_146 = arith.constant 0 : index
    %135 = vector.load %arg21[%c20, %c0_146] : memref<48x128xf32, #tpu.memory_space<vmem>>, vector<16x128xf32>
    %c0_147 = arith.constant 0 : index
    %c9 = arith.constant 9 : index
    %c0_148 = arith.constant 0 : index
    %c0_149 = arith.constant 0 : index
    %136 = vector.load %arg7[%c0_147, %c9, %c0_148, %c0_149] : memref<1x20x128x128xf32, #tpu.memory_space<vmem>>, vector<1x1x128x128xf32>
    %137 = vector.shape_cast %136 : vector<1x1x128x128xf32> to vector<128x128xf32>
    %cst_150 = arith.constant dense<0.000000e+00> : vector<16x128xf32>
    %138 = tpu.matmul %135, %137, %cst_150 {dimension_numbers = #tpu.dot_dimension_numbers<[1], [0], [0], [1], [0, 0, 1, 1], [], []>} : vector<16x128xf32>, vector<128x128xf32>, vector<16x128xf32> -> vector<16x128xf32>
    %139 = arith.addf %130, %138 : vector<16x128xf32>
    %c0_151 = arith.constant 0 : index
    %c9_152 = arith.constant 9 : index
    %c0_153 = arith.constant 0 : index
    %c0_154 = arith.constant 0 : index
    %140 = vector.load %arg9[%c0_151, %c9_152, %c0_153, %c0_154] : memref<1x20x128x128xf32, #tpu.memory_space<vmem>>, vector<1x1x128x128xf32>
    %141 = vector.shape_cast %140 : vector<1x1x128x128xf32> to vector<128x128xf32>
    %cst_155 = arith.constant dense<0.000000e+00> : vector<16x128xf32>
    %142 = tpu.matmul %135, %141, %cst_155 {dimension_numbers = #tpu.dot_dimension_numbers<[1], [0], [0], [1], [0, 0, 1, 1], [], []>} : vector<16x128xf32>, vector<128x128xf32>, vector<16x128xf32> -> vector<16x128xf32>
    %143 = arith.addf %134, %142 : vector<16x128xf32>
    %144 = math.tanh %139 : vector<16x128xf32>
    %145 = arith.negf %143 : vector<16x128xf32>
    %146 = math.exp %145 : vector<16x128xf32>
    %cst_156 = arith.constant 1.000000e+00 : f32
    %147 = vector.broadcast %cst_156 : f32 to vector<16x128xf32>
    %148 = arith.addf %147, %146 : vector<16x128xf32>
    %149 = arith.divf %147, %148 : vector<16x128xf32>
    %150 = arith.mulf %144, %149 : vector<16x128xf32>
    %c0_157 = arith.constant 0 : index
    %c1_158 = arith.constant 1 : index
    %c0_159 = arith.constant 0 : index
    %c0_160 = arith.constant 0 : index
    %151 = vector.load %arg13[%c0_157, %c1_158, %c0_159, %c0_160] : memref<1x4x128x128xf32, #tpu.memory_space<vmem>>, vector<1x1x128x128xf32>
    %152 = vector.shape_cast %151 : vector<1x1x128x128xf32> to vector<128x128xf32>
    %cst_161 = arith.constant dense<0.000000e+00> : vector<16x128xf32>
    %153 = tpu.matmul %150, %152, %cst_161 {dimension_numbers = #tpu.dot_dimension_numbers<[1], [0], [0], [1], [0, 0, 1, 1], [], []>} : vector<16x128xf32>, vector<128x128xf32>, vector<16x128xf32> -> vector<16x128xf32>
    %c0_162 = arith.constant 0 : index
    %c1_163 = arith.constant 1 : index
    %c0_164 = arith.constant 0 : index
    %c0_165 = arith.constant 0 : index
    %154 = vector.load %arg14[%c0_162, %c1_163, %c0_164, %c0_165] : memref<1x4x1x128xf32, #tpu.memory_space<vmem>>, vector<1x1x1x128xf32>
    %155 = vector.shape_cast %154 : vector<1x1x1x128xf32> to vector<1x128xf32>
    %156 = vector.broadcast %155 : vector<1x128xf32> to vector<16x128xf32>
    %157 = arith.addf %153, %156 : vector<16x128xf32>
    %158 = arith.addf %81, %157 : vector<16x128xf32>
    %c0_166 = arith.constant 0 : index
    %c1_167 = arith.constant 1 : index
    %c0_168 = arith.constant 0 : index
    %c0_169 = arith.constant 0 : index
    %159 = vector.load %arg11[%c0_166, %c1_167, %c0_168, %c0_169] : memref<1x4x128x128xf32, #tpu.memory_space<vmem>>, vector<1x1x128x128xf32>
    %160 = vector.shape_cast %159 : vector<1x1x128x128xf32> to vector<128x128xf32>
    %cst_170 = arith.constant dense<0.000000e+00> : vector<16x128xf32>
    %161 = tpu.matmul %150, %160, %cst_170 {dimension_numbers = #tpu.dot_dimension_numbers<[1], [0], [0], [1], [0, 0, 1, 1], [], []>} : vector<16x128xf32>, vector<128x128xf32>, vector<16x128xf32> -> vector<16x128xf32>
    %c0_171 = arith.constant 0 : index
    %c1_172 = arith.constant 1 : index
    %c0_173 = arith.constant 0 : index
    %c0_174 = arith.constant 0 : index
    %162 = vector.load %arg12[%c0_171, %c1_172, %c0_173, %c0_174] : memref<1x4x1x128xf32, #tpu.memory_space<vmem>>, vector<1x1x1x128xf32>
    %163 = vector.shape_cast %162 : vector<1x1x1x128xf32> to vector<1x128xf32>
    %164 = vector.broadcast %163 : vector<1x128xf32> to vector<16x128xf32>
    %165 = arith.addf %161, %164 : vector<16x128xf32>
    %166 = arith.addf %91, %165 : vector<16x128xf32>
    %167 = vector.broadcast %4 : vector<16x1xf32> to vector<16x128xf32>
    %168 = arith.mulf %166, %167 : vector<16x128xf32>
    %c16_175 = arith.constant 16 : index
    %c0_176 = arith.constant 0 : index
    %169 = vector.load %arg21[%c16_175, %c0_176] : memref<48x128xf32, #tpu.memory_space<vmem>>, vector<16x128xf32>
    tpu.vector_store %arg21[%c16_175, %c0_176], %168 {strides = array<i32>} : memref<48x128xf32, #tpu.memory_space<vmem>>, vector<16x128xf32>,
    %c8_177 = arith.constant 8 : index
    %c0_178 = arith.constant 0 : index
    %170 = vector.load %arg21[%c8_177, %c0_178] : memref<48x128xf32, #tpu.memory_space<vmem>>, vector<16x128xf32>
    %c0_179 = arith.constant 0 : index
    %c10 = arith.constant 10 : index
    %c0_180 = arith.constant 0 : index
    %c0_181 = arith.constant 0 : index
    %171 = vector.load %arg7[%c0_179, %c10, %c0_180, %c0_181] : memref<1x20x128x128xf32, #tpu.memory_space<vmem>>, vector<1x1x128x128xf32>
    %172 = vector.shape_cast %171 : vector<1x1x128x128xf32> to vector<128x128xf32>
    %cst_182 = arith.constant dense<0.000000e+00> : vector<16x128xf32>
    %173 = tpu.matmul %170, %172, %cst_182 {dimension_numbers = #tpu.dot_dimension_numbers<[1], [0], [0], [1], [0, 0, 1, 1], [], []>} : vector<16x128xf32>, vector<128x128xf32>, vector<16x128xf32> -> vector<16x128xf32>
    %c0_183 = arith.constant 0 : index
    %c2_184 = arith.constant 2 : index
    %c0_185 = arith.constant 0 : index
    %c0_186 = arith.constant 0 : index
    %174 = vector.load %arg8[%c0_183, %c2_184, %c0_185, %c0_186] : memref<1x4x1x128xf32, #tpu.memory_space<vmem>>, vector<1x1x1x128xf32>
    %175 = vector.shape_cast %174 : vector<1x1x1x128xf32> to vector<1x128xf32>
    %176 = vector.broadcast %175 : vector<1x128xf32> to vector<16x128xf32>
    %177 = arith.addf %173, %176 : vector<16x128xf32>
    %c0_187 = arith.constant 0 : index
    %c10_188 = arith.constant 10 : index
    %c0_189 = arith.constant 0 : index
    %c0_190 = arith.constant 0 : index
    %178 = vector.load %arg9[%c0_187, %c10_188, %c0_189, %c0_190] : memref<1x20x128x128xf32, #tpu.memory_space<vmem>>, vector<1x1x128x128xf32>
    %179 = vector.shape_cast %178 : vector<1x1x128x128xf32> to vector<128x128xf32>
    %cst_191 = arith.constant dense<0.000000e+00> : vector<16x128xf32>
    %180 = tpu.matmul %170, %179, %cst_191 {dimension_numbers = #tpu.dot_dimension_numbers<[1], [0], [0], [1], [0, 0, 1, 1], [], []>} : vector<16x128xf32>, vector<128x128xf32>, vector<16x128xf32> -> vector<16x128xf32>
    %c0_192 = arith.constant 0 : index
    %c2_193 = arith.constant 2 : index
    %c0_194 = arith.constant 0 : index
    %c0_195 = arith.constant 0 : index
    %181 = vector.load %arg10[%c0_192, %c2_193, %c0_194, %c0_195] : memref<1x4x1x128xf32, #tpu.memory_space<vmem>>, vector<1x1x1x128xf32>
    %182 = vector.shape_cast %181 : vector<1x1x1x128xf32> to vector<1x128xf32>
    %183 = vector.broadcast %182 : vector<1x128xf32> to vector<16x128xf32>
    %184 = arith.addf %180, %183 : vector<16x128xf32>
    %c12_196 = arith.constant 12 : index
    %c0_197 = arith.constant 0 : index
    %185 = vector.load %arg21[%c12_196, %c0_197] : memref<48x128xf32, #tpu.memory_space<vmem>>, vector<16x128xf32>
    %c0_198 = arith.constant 0 : index
    %c11 = arith.constant 11 : index
    %c0_199 = arith.constant 0 : index
    %c0_200 = arith.constant 0 : index
    %186 = vector.load %arg7[%c0_198, %c11, %c0_199, %c0_200] : memref<1x20x128x128xf32, #tpu.memory_space<vmem>>, vector<1x1x128x128xf32>
    %187 = vector.shape_cast %186 : vector<1x1x128x128xf32> to vector<128x128xf32>
    %cst_201 = arith.constant dense<0.000000e+00> : vector<16x128xf32>
    %188 = tpu.matmul %185, %187, %cst_201 {dimension_numbers = #tpu.dot_dimension_numbers<[1], [0], [0], [1], [0, 0, 1, 1], [], []>} : vector<16x128xf32>, vector<128x128xf32>, vector<16x128xf32> -> vector<16x128xf32>
    %189 = arith.addf %177, %188 : vector<16x128xf32>
    %c0_202 = arith.constant 0 : index
    %c11_203 = arith.constant 11 : index
    %c0_204 = arith.constant 0 : index
    %c0_205 = arith.constant 0 : index
    %190 = vector.load %arg9[%c0_202, %c11_203, %c0_204, %c0_205] : memref<1x20x128x128xf32, #tpu.memory_space<vmem>>, vector<1x1x128x128xf32>
    %191 = vector.shape_cast %190 : vector<1x1x128x128xf32> to vector<128x128xf32>
    %cst_206 = arith.constant dense<0.000000e+00> : vector<16x128xf32>
    %192 = tpu.matmul %185, %191, %cst_206 {dimension_numbers = #tpu.dot_dimension_numbers<[1], [0], [0], [1], [0, 0, 1, 1], [], []>} : vector<16x128xf32>, vector<128x128xf32>, vector<16x128xf32> -> vector<16x128xf32>
    %193 = arith.addf %184, %192 : vector<16x128xf32>
    %c16_207 = arith.constant 16 : index
    %c0_208 = arith.constant 0 : index
    %194 = vector.load %arg21[%c16_207, %c0_208] : memref<48x128xf32, #tpu.memory_space<vmem>>, vector<16x128xf32>
    %c0_209 = arith.constant 0 : index
    %c12_210 = arith.constant 12 : index
    %c0_211 = arith.constant 0 : index
    %c0_212 = arith.constant 0 : index
    %195 = vector.load %arg7[%c0_209, %c12_210, %c0_211, %c0_212] : memref<1x20x128x128xf32, #tpu.memory_space<vmem>>, vector<1x1x128x128xf32>
    %196 = vector.shape_cast %195 : vector<1x1x128x128xf32> to vector<128x128xf32>
    %cst_213 = arith.constant dense<0.000000e+00> : vector<16x128xf32>
    %197 = tpu.matmul %194, %196, %cst_213 {dimension_numbers = #tpu.dot_dimension_numbers<[1], [0], [0], [1], [0, 0, 1, 1], [], []>} : vector<16x128xf32>, vector<128x128xf32>, vector<16x128xf32> -> vector<16x128xf32>
    %198 = arith.addf %189, %197 : vector<16x128xf32>
    %c0_214 = arith.constant 0 : index
    %c12_215 = arith.constant 12 : index
    %c0_216 = arith.constant 0 : index
    %c0_217 = arith.constant 0 : index
    %199 = vector.load %arg9[%c0_214, %c12_215, %c0_216, %c0_217] : memref<1x20x128x128xf32, #tpu.memory_space<vmem>>, vector<1x1x128x128xf32>
    %200 = vector.shape_cast %199 : vector<1x1x128x128xf32> to vector<128x128xf32>
    %cst_218 = arith.constant dense<0.000000e+00> : vector<16x128xf32>
    %201 = tpu.matmul %194, %200, %cst_218 {dimension_numbers = #tpu.dot_dimension_numbers<[1], [0], [0], [1], [0, 0, 1, 1], [], []>} : vector<16x128xf32>, vector<128x128xf32>, vector<16x128xf32> -> vector<16x128xf32>
    %202 = arith.addf %193, %201 : vector<16x128xf32>
    %c20_219 = arith.constant 20 : index
    %c0_220 = arith.constant 0 : index
    %203 = vector.load %arg21[%c20_219, %c0_220] : memref<48x128xf32, #tpu.memory_space<vmem>>, vector<16x128xf32>
    %c0_221 = arith.constant 0 : index
    %c13 = arith.constant 13 : index
    %c0_222 = arith.constant 0 : index
    %c0_223 = arith.constant 0 : index
    %204 = vector.load %arg7[%c0_221, %c13, %c0_222, %c0_223] : memref<1x20x128x128xf32, #tpu.memory_space<vmem>>, vector<1x1x128x128xf32>
    %205 = vector.shape_cast %204 : vector<1x1x128x128xf32> to vector<128x128xf32>
    %cst_224 = arith.constant dense<0.000000e+00> : vector<16x128xf32>
    %206 = tpu.matmul %203, %205, %cst_224 {dimension_numbers = #tpu.dot_dimension_numbers<[1], [0], [0], [1], [0, 0, 1, 1], [], []>} : vector<16x128xf32>, vector<128x128xf32>, vector<16x128xf32> -> vector<16x128xf32>
    %207 = arith.addf %198, %206 : vector<16x128xf32>
    %c0_225 = arith.constant 0 : index
    %c13_226 = arith.constant 13 : index
    %c0_227 = arith.constant 0 : index
    %c0_228 = arith.constant 0 : index
    %208 = vector.load %arg9[%c0_225, %c13_226, %c0_227, %c0_228] : memref<1x20x128x128xf32, #tpu.memory_space<vmem>>, vector<1x1x128x128xf32>
    %209 = vector.shape_cast %208 : vector<1x1x128x128xf32> to vector<128x128xf32>
    %cst_229 = arith.constant dense<0.000000e+00> : vector<16x128xf32>
    %210 = tpu.matmul %203, %209, %cst_229 {dimension_numbers = #tpu.dot_dimension_numbers<[1], [0], [0], [1], [0, 0, 1, 1], [], []>} : vector<16x128xf32>, vector<128x128xf32>, vector<16x128xf32> -> vector<16x128xf32>
    %211 = arith.addf %202, %210 : vector<16x128xf32>
    %c24 = arith.constant 24 : index
    %c0_230 = arith.constant 0 : index
    %212 = vector.load %arg21[%c24, %c0_230] : memref<48x128xf32, #tpu.memory_space<vmem>>, vector<16x128xf32>
    %c0_231 = arith.constant 0 : index
    %c14_232 = arith.constant 14 : index
    %c0_233 = arith.constant 0 : index
    %c0_234 = arith.constant 0 : index
    %213 = vector.load %arg7[%c0_231, %c14_232, %c0_233, %c0_234] : memref<1x20x128x128xf32, #tpu.memory_space<vmem>>, vector<1x1x128x128xf32>
    %214 = vector.shape_cast %213 : vector<1x1x128x128xf32> to vector<128x128xf32>
    %cst_235 = arith.constant dense<0.000000e+00> : vector<16x128xf32>
    %215 = tpu.matmul %212, %214, %cst_235 {dimension_numbers = #tpu.dot_dimension_numbers<[1], [0], [0], [1], [0, 0, 1, 1], [], []>} : vector<16x128xf32>, vector<128x128xf32>, vector<16x128xf32> -> vector<16x128xf32>
    %216 = arith.addf %207, %215 : vector<16x128xf32>
    %c0_236 = arith.constant 0 : index
    %c14_237 = arith.constant 14 : index
    %c0_238 = arith.constant 0 : index
    %c0_239 = arith.constant 0 : index
    %217 = vector.load %arg9[%c0_236, %c14_237, %c0_238, %c0_239] : memref<1x20x128x128xf32, #tpu.memory_space<vmem>>, vector<1x1x128x128xf32>
    %218 = vector.shape_cast %217 : vector<1x1x128x128xf32> to vector<128x128xf32>
    %cst_240 = arith.constant dense<0.000000e+00> : vector<16x128xf32>
    %219 = tpu.matmul %212, %218, %cst_240 {dimension_numbers = #tpu.dot_dimension_numbers<[1], [0], [0], [1], [0, 0, 1, 1], [], []>} : vector<16x128xf32>, vector<128x128xf32>, vector<16x128xf32> -> vector<16x128xf32>
    %220 = arith.addf %211, %219 : vector<16x128xf32>
    %221 = math.tanh %216 : vector<16x128xf32>
    %222 = arith.negf %220 : vector<16x128xf32>
    %223 = math.exp %222 : vector<16x128xf32>
    %cst_241 = arith.constant 1.000000e+00 : f32
    %224 = vector.broadcast %cst_241 : f32 to vector<16x128xf32>
    %225 = arith.addf %224, %223 : vector<16x128xf32>
    %226 = arith.divf %224, %225 : vector<16x128xf32>
    %227 = arith.mulf %221, %226 : vector<16x128xf32>
    %c0_242 = arith.constant 0 : index
    %c2_243 = arith.constant 2 : index
    %c0_244 = arith.constant 0 : index
    %c0_245 = arith.constant 0 : index
    %228 = vector.load %arg13[%c0_242, %c2_243, %c0_244, %c0_245] : memref<1x4x128x128xf32, #tpu.memory_space<vmem>>, vector<1x1x128x128xf32>
    %229 = vector.shape_cast %228 : vector<1x1x128x128xf32> to vector<128x128xf32>
    %cst_246 = arith.constant dense<0.000000e+00> : vector<16x128xf32>
    %230 = tpu.matmul %227, %229, %cst_246 {dimension_numbers = #tpu.dot_dimension_numbers<[1], [0], [0], [1], [0, 0, 1, 1], [], []>} : vector<16x128xf32>, vector<128x128xf32>, vector<16x128xf32> -> vector<16x128xf32>
    %c0_247 = arith.constant 0 : index
    %c2_248 = arith.constant 2 : index
    %c0_249 = arith.constant 0 : index
    %c0_250 = arith.constant 0 : index
    %231 = vector.load %arg14[%c0_247, %c2_248, %c0_249, %c0_250] : memref<1x4x1x128xf32, #tpu.memory_space<vmem>>, vector<1x1x1x128xf32>
    %232 = vector.shape_cast %231 : vector<1x1x1x128xf32> to vector<1x128xf32>
    %233 = vector.broadcast %232 : vector<1x128xf32> to vector<16x128xf32>
    %234 = arith.addf %230, %233 : vector<16x128xf32>
    %235 = arith.addf %158, %234 : vector<16x128xf32>
    %c0_251 = arith.constant 0 : index
    %c2_252 = arith.constant 2 : index
    %c0_253 = arith.constant 0 : index
    %c0_254 = arith.constant 0 : index
    %236 = vector.load %arg11[%c0_251, %c2_252, %c0_253, %c0_254] : memref<1x4x128x128xf32, #tpu.memory_space<vmem>>, vector<1x1x128x128xf32>
    %237 = vector.shape_cast %236 : vector<1x1x128x128xf32> to vector<128x128xf32>
    %cst_255 = arith.constant dense<0.000000e+00> : vector<16x128xf32>
    %238 = tpu.matmul %227, %237, %cst_255 {dimension_numbers = #tpu.dot_dimension_numbers<[1], [0], [0], [1], [0, 0, 1, 1], [], []>} : vector<16x128xf32>, vector<128x128xf32>, vector<16x128xf32> -> vector<16x128xf32>
    %c0_256 = arith.constant 0 : index
    %c2_257 = arith.constant 2 : index
    %c0_258 = arith.constant 0 : index
    %c0_259 = arith.constant 0 : index
    %239 = vector.load %arg12[%c0_256, %c2_257, %c0_258, %c0_259] : memref<1x4x1x128xf32, #tpu.memory_space<vmem>>, vector<1x1x1x128xf32>
    %240 = vector.shape_cast %239 : vector<1x1x1x128xf32> to vector<1x128xf32>
    %241 = vector.broadcast %240 : vector<1x128xf32> to vector<16x128xf32>
    %242 = arith.addf %238, %241 : vector<16x128xf32>
    %243 = arith.addf %168, %242 : vector<16x128xf32>
    %244 = vector.broadcast %4 : vector<16x1xf32> to vector<16x128xf32>
    %245 = arith.mulf %243, %244 : vector<16x128xf32>
    %c16_260 = arith.constant 16 : index
    %c0_261 = arith.constant 0 : index
    %246 = vector.load %arg21[%c16_260, %c0_261] : memref<48x128xf32, #tpu.memory_space<vmem>>, vector<16x128xf32>
    tpu.vector_store %arg21[%c16_260, %c0_261], %245 {strides = array<i32>} : memref<48x128xf32, #tpu.memory_space<vmem>>, vector<16x128xf32>,
    %c0_262 = arith.constant 0 : index
    %c0_263 = arith.constant 0 : index
    %247 = vector.load %arg21[%c0_262, %c0_263] : memref<48x128xf32, #tpu.memory_space<vmem>>, vector<16x128xf32>
    %c0_264 = arith.constant 0 : index
    %c15_265 = arith.constant 15 : index
    %c0_266 = arith.constant 0 : index
    %c0_267 = arith.constant 0 : index
    %248 = vector.load %arg7[%c0_264, %c15_265, %c0_266, %c0_267] : memref<1x20x128x128xf32, #tpu.memory_space<vmem>>, vector<1x1x128x128xf32>
    %249 = vector.shape_cast %248 : vector<1x1x128x128xf32> to vector<128x128xf32>
    %cst_268 = arith.constant dense<0.000000e+00> : vector<16x128xf32>
    %250 = tpu.matmul %247, %249, %cst_268 {dimension_numbers = #tpu.dot_dimension_numbers<[1], [0], [0], [1], [0, 0, 1, 1], [], []>} : vector<16x128xf32>, vector<128x128xf32>, vector<16x128xf32> -> vector<16x128xf32>
    %c0_269 = arith.constant 0 : index
    %c3_270 = arith.constant 3 : index
    %c0_271 = arith.constant 0 : index
    %c0_272 = arith.constant 0 : index
    %251 = vector.load %arg8[%c0_269, %c3_270, %c0_271, %c0_272] : memref<1x4x1x128xf32, #tpu.memory_space<vmem>>, vector<1x1x1x128xf32>
    %252 = vector.shape_cast %251 : vector<1x1x1x128xf32> to vector<1x128xf32>
    %253 = vector.broadcast %252 : vector<1x128xf32> to vector<16x128xf32>
    %254 = arith.addf %250, %253 : vector<16x128xf32>
    %c0_273 = arith.constant 0 : index
    %c15_274 = arith.constant 15 : index
    %c0_275 = arith.constant 0 : index
    %c0_276 = arith.constant 0 : index
    %255 = vector.load %arg9[%c0_273, %c15_274, %c0_275, %c0_276] : memref<1x20x128x128xf32, #tpu.memory_space<vmem>>, vector<1x1x128x128xf32>
    %256 = vector.shape_cast %255 : vector<1x1x128x128xf32> to vector<128x128xf32>
    %cst_277 = arith.constant dense<0.000000e+00> : vector<16x128xf32>
    %257 = tpu.matmul %247, %256, %cst_277 {dimension_numbers = #tpu.dot_dimension_numbers<[1], [0], [0], [1], [0, 0, 1, 1], [], []>} : vector<16x128xf32>, vector<128x128xf32>, vector<16x128xf32> -> vector<16x128xf32>
    %c0_278 = arith.constant 0 : index
    %c3_279 = arith.constant 3 : index
    %c0_280 = arith.constant 0 : index
    %c0_281 = arith.constant 0 : index
    %258 = vector.load %arg10[%c0_278, %c3_279, %c0_280, %c0_281] : memref<1x4x1x128xf32, #tpu.memory_space<vmem>>, vector<1x1x1x128xf32>
    %259 = vector.shape_cast %258 : vector<1x1x1x128xf32> to vector<1x128xf32>
    %260 = vector.broadcast %259 : vector<1x128xf32> to vector<16x128xf32>
    %261 = arith.addf %257, %260 : vector<16x128xf32>
    %c8_282 = arith.constant 8 : index
    %c0_283 = arith.constant 0 : index
    %262 = vector.load %arg21[%c8_282, %c0_283] : memref<48x128xf32, #tpu.memory_space<vmem>>, vector<16x128xf32>
    %c0_284 = arith.constant 0 : index
    %c16_285 = arith.constant 16 : index
    %c0_286 = arith.constant 0 : index
    %c0_287 = arith.constant 0 : index
    %263 = vector.load %arg7[%c0_284, %c16_285, %c0_286, %c0_287] : memref<1x20x128x128xf32, #tpu.memory_space<vmem>>, vector<1x1x128x128xf32>
    %264 = vector.shape_cast %263 : vector<1x1x128x128xf32> to vector<128x128xf32>
    %cst_288 = arith.constant dense<0.000000e+00> : vector<16x128xf32>
    %265 = tpu.matmul %262, %264, %cst_288 {dimension_numbers = #tpu.dot_dimension_numbers<[1], [0], [0], [1], [0, 0, 1, 1], [], []>} : vector<16x128xf32>, vector<128x128xf32>, vector<16x128xf32> -> vector<16x128xf32>
    %266 = arith.addf %254, %265 : vector<16x128xf32>
    %c0_289 = arith.constant 0 : index
    %c16_290 = arith.constant 16 : index
    %c0_291 = arith.constant 0 : index
    %c0_292 = arith.constant 0 : index
    %267 = vector.load %arg9[%c0_289, %c16_290, %c0_291, %c0_292] : memref<1x20x128x128xf32, #tpu.memory_space<vmem>>, vector<1x1x128x128xf32>
    %268 = vector.shape_cast %267 : vector<1x1x128x128xf32> to vector<128x128xf32>
    %cst_293 = arith.constant dense<0.000000e+00> : vector<16x128xf32>
    %269 = tpu.matmul %262, %268, %cst_293 {dimension_numbers = #tpu.dot_dimension_numbers<[1], [0], [0], [1], [0, 0, 1, 1], [], []>} : vector<16x128xf32>, vector<128x128xf32>, vector<16x128xf32> -> vector<16x128xf32>
    %270 = arith.addf %261, %269 : vector<16x128xf32>
    %c16_294 = arith.constant 16 : index
    %c0_295 = arith.constant 0 : index
    %271 = vector.load %arg21[%c16_294, %c0_295] : memref<48x128xf32, #tpu.memory_space<vmem>>, vector<16x128xf32>
    %c0_296 = arith.constant 0 : index
    %c17_297 = arith.constant 17 : index
    %c0_298 = arith.constant 0 : index
    %c0_299 = arith.constant 0 : index
    %272 = vector.load %arg7[%c0_296, %c17_297, %c0_298, %c0_299] : memref<1x20x128x128xf32, #tpu.memory_space<vmem>>, vector<1x1x128x128xf32>
    %273 = vector.shape_cast %272 : vector<1x1x128x128xf32> to vector<128x128xf32>
    %cst_300 = arith.constant dense<0.000000e+00> : vector<16x128xf32>
    %274 = tpu.matmul %271, %273, %cst_300 {dimension_numbers = #tpu.dot_dimension_numbers<[1], [0], [0], [1], [0, 0, 1, 1], [], []>} : vector<16x128xf32>, vector<128x128xf32>, vector<16x128xf32> -> vector<16x128xf32>
    %275 = arith.addf %266, %274 : vector<16x128xf32>
    %c0_301 = arith.constant 0 : index
    %c17_302 = arith.constant 17 : index
    %c0_303 = arith.constant 0 : index
    %c0_304 = arith.constant 0 : index
    %276 = vector.load %arg9[%c0_301, %c17_302, %c0_303, %c0_304] : memref<1x20x128x128xf32, #tpu.memory_space<vmem>>, vector<1x1x128x128xf32>
    %277 = vector.shape_cast %276 : vector<1x1x128x128xf32> to vector<128x128xf32>
    %cst_305 = arith.constant dense<0.000000e+00> : vector<16x128xf32>
    %278 = tpu.matmul %271, %277, %cst_305 {dimension_numbers = #tpu.dot_dimension_numbers<[1], [0], [0], [1], [0, 0, 1, 1], [], []>} : vector<16x128xf32>, vector<128x128xf32>, vector<16x128xf32> -> vector<16x128xf32>
    %279 = arith.addf %270, %278 : vector<16x128xf32>
    %c24_306 = arith.constant 24 : index
    %c0_307 = arith.constant 0 : index
    %280 = vector.load %arg21[%c24_306, %c0_307] : memref<48x128xf32, #tpu.memory_space<vmem>>, vector<16x128xf32>
    %c0_308 = arith.constant 0 : index
    %c18_309 = arith.constant 18 : index
    %c0_310 = arith.constant 0 : index
    %c0_311 = arith.constant 0 : index
    %281 = vector.load %arg7[%c0_308, %c18_309, %c0_310, %c0_311] : memref<1x20x128x128xf32, #tpu.memory_space<vmem>>, vector<1x1x128x128xf32>
    %282 = vector.shape_cast %281 : vector<1x1x128x128xf32> to vector<128x128xf32>
    %cst_312 = arith.constant dense<0.000000e+00> : vector<16x128xf32>
    %283 = tpu.matmul %280, %282, %cst_312 {dimension_numbers = #tpu.dot_dimension_numbers<[1], [0], [0], [1], [0, 0, 1, 1], [], []>} : vector<16x128xf32>, vector<128x128xf32>, vector<16x128xf32> -> vector<16x128xf32>
    %284 = arith.addf %275, %283 : vector<16x128xf32>
    %c0_313 = arith.constant 0 : index
    %c18_314 = arith.constant 18 : index
    %c0_315 = arith.constant 0 : index
    %c0_316 = arith.constant 0 : index
    %285 = vector.load %arg9[%c0_313, %c18_314, %c0_315, %c0_316] : memref<1x20x128x128xf32, #tpu.memory_space<vmem>>, vector<1x1x128x128xf32>
    %286 = vector.shape_cast %285 : vector<1x1x128x128xf32> to vector<128x128xf32>
    %cst_317 = arith.constant dense<0.000000e+00> : vector<16x128xf32>
    %287 = tpu.matmul %280, %286, %cst_317 {dimension_numbers = #tpu.dot_dimension_numbers<[1], [0], [0], [1], [0, 0, 1, 1], [], []>} : vector<16x128xf32>, vector<128x128xf32>, vector<16x128xf32> -> vector<16x128xf32>
    %288 = arith.addf %279, %287 : vector<16x128xf32>
    %c32 = arith.constant 32 : index
    %c0_318 = arith.constant 0 : index
    %289 = vector.load %arg21[%c32, %c0_318] : memref<48x128xf32, #tpu.memory_space<vmem>>, vector<16x128xf32>
    %c0_319 = arith.constant 0 : index
    %c19 = arith.constant 19 : index
    %c0_320 = arith.constant 0 : index
    %c0_321 = arith.constant 0 : index
    %290 = vector.load %arg7[%c0_319, %c19, %c0_320, %c0_321] : memref<1x20x128x128xf32, #tpu.memory_space<vmem>>, vector<1x1x128x128xf32>
    %291 = vector.shape_cast %290 : vector<1x1x128x128xf32> to vector<128x128xf32>
    %cst_322 = arith.constant dense<0.000000e+00> : vector<16x128xf32>
    %292 = tpu.matmul %289, %291, %cst_322 {dimension_numbers = #tpu.dot_dimension_numbers<[1], [0], [0], [1], [0, 0, 1, 1], [], []>} : vector<16x128xf32>, vector<128x128xf32>, vector<16x128xf32> -> vector<16x128xf32>
    %293 = arith.addf %284, %292 : vector<16x128xf32>
    %c0_323 = arith.constant 0 : index
    %c19_324 = arith.constant 19 : index
    %c0_325 = arith.constant 0 : index
    %c0_326 = arith.constant 0 : index
    %294 = vector.load %arg9[%c0_323, %c19_324, %c0_325, %c0_326] : memref<1x20x128x128xf32, #tpu.memory_space<vmem>>, vector<1x1x128x128xf32>
    %295 = vector.shape_cast %294 : vector<1x1x128x128xf32> to vector<128x128xf32>
    %cst_327 = arith.constant dense<0.000000e+00> : vector<16x128xf32>
    %296 = tpu.matmul %289, %295, %cst_327 {dimension_numbers = #tpu.dot_dimension_numbers<[1], [0], [0], [1], [0, 0, 1, 1], [], []>} : vector<16x128xf32>, vector<128x128xf32>, vector<16x128xf32> -> vector<16x128xf32>
    %297 = arith.addf %288, %296 : vector<16x128xf32>
    %298 = math.tanh %293 : vector<16x128xf32>
    %299 = arith.negf %297 : vector<16x128xf32>
    %300 = math.exp %299 : vector<16x128xf32>
    %cst_328 = arith.constant 1.000000e+00 : f32
    %301 = vector.broadcast %cst_328 : f32 to vector<16x128xf32>
    %302 = arith.addf %301, %300 : vector<16x128xf32>
    %303 = arith.divf %301, %302 : vector<16x128xf32>
    %304 = arith.mulf %298, %303 : vector<16x128xf32>
    %c0_329 = arith.constant 0 : index
    %c3_330 = arith.constant 3 : index
    %c0_331 = arith.constant 0 : index
    %c0_332 = arith.constant 0 : index
    %305 = vector.load %arg13[%c0_329, %c3_330, %c0_331, %c0_332] : memref<1x4x128x128xf32, #tpu.memory_space<vmem>>, vector<1x1x128x128xf32>
    %306 = vector.shape_cast %305 : vector<1x1x128x128xf32> to vector<128x128xf32>
    %cst_333 = arith.constant dense<0.000000e+00> : vector<16x128xf32>
    %307 = tpu.matmul %304, %306, %cst_333 {dimension_numbers = #tpu.dot_dimension_numbers<[1], [0], [0], [1], [0, 0, 1, 1], [], []>} : vector<16x128xf32>, vector<128x128xf32>, vector<16x128xf32> -> vector<16x128xf32>
    %c0_334 = arith.constant 0 : index
    %c3_335 = arith.constant 3 : index
    %c0_336 = arith.constant 0 : index
    %c0_337 = arith.constant 0 : index
    %308 = vector.load %arg14[%c0_334, %c3_335, %c0_336, %c0_337] : memref<1x4x1x128xf32, #tpu.memory_space<vmem>>, vector<1x1x1x128xf32>
    %309 = vector.shape_cast %308 : vector<1x1x1x128xf32> to vector<1x128xf32>
    %310 = vector.broadcast %309 : vector<1x128xf32> to vector<16x128xf32>
    %311 = arith.addf %307, %310 : vector<16x128xf32>
    %312 = arith.addf %235, %311 : vector<16x128xf32>
    %313 = vector.broadcast %4 : vector<16x1xf32> to vector<16x128xf32>
    %314 = arith.mulf %312, %313 : vector<16x128xf32>
    %c0_338 = arith.constant 0 : index
    %c0_339 = arith.constant 0 : index
    %c0_340 = arith.constant 0 : index
    %315 = vector.load %arg15[%c0_338, %c0_339, %c0_340] : memref<1x128x128xf32, #tpu.memory_space<vmem>>, vector<1x128x128xf32>
    %316 = vector.shape_cast %315 : vector<1x128x128xf32> to vector<128x128xf32>
    %cst_341 = arith.constant dense<0.000000e+00> : vector<16x128xf32>
    %317 = tpu.matmul %314, %316, %cst_341 {dimension_numbers = #tpu.dot_dimension_numbers<[1], [0], [0], [1], [0, 0, 1, 1], [], []>} : vector<16x128xf32>, vector<128x128xf32>, vector<16x128xf32> -> vector<16x128xf32>
    %c0_342 = arith.constant 0 : index
    %c0_343 = arith.constant 0 : index
    %c0_344 = arith.constant 0 : index
    %318 = vector.load %arg16[%c0_342, %c0_343, %c0_344] : memref<1x1x128xf32, #tpu.memory_space<vmem>>, vector<1x1x128xf32>
    %319 = vector.shape_cast %318 : vector<1x1x128xf32> to vector<1x128xf32>
    %320 = vector.broadcast %319 : vector<1x128xf32> to vector<16x128xf32>
    %321 = arith.addf %317, %320 : vector<16x128xf32>
    %322 = vector.broadcast %4 : vector<16x1xf32> to vector<16x128xf32>
    %323 = arith.mulf %321, %322 : vector<16x128xf32>
    %324 = vector.broadcast %4 : vector<16x1xf32> to vector<16x128xf32>
    %325 = arith.mulf %6, %324 : vector<16x128xf32>
    %326 = arith.addf %323, %325 : vector<16x128xf32>
    %c0_345 = arith.constant 0 : index
    %c0_346 = arith.constant 0 : index
    %327 = vector.load %arg20[%c0_345, %c0_346] : memref<16x128xf32, #tpu.memory_space<vmem>>, vector<16x128xf32>
    tpu.vector_store %arg20[%c0_345, %c0_346], %5 {strides = array<i32>} : memref<16x128xf32, #tpu.memory_space<vmem>>, vector<16x128xf32>,
    %c0_347 = arith.constant 0 : index
    %c0_348 = arith.constant 0 : index
    %328 = vector.load %arg19[%c0_347, %c0_348] : memref<16x128xf32, #tpu.memory_space<vmem>>, vector<16x128xf32>
    tpu.vector_store %arg19[%c0_347, %c0_348], %326 {strides = array<i32>} : memref<16x128xf32, #tpu.memory_space<vmem>>, vector<16x128xf32>,
    %c0_i32_349 = arith.constant 0 : i32
    %329 = arith.cmpi eq, %arg1, %c0_i32_349 : i32
    %330 = arith.extui %329 : i1 to i32
    %c0_i32_350 = arith.constant 0 : i32
    %331 = arith.cmpi ne, %330, %c0_i32_350 : i32
    scf.if %331 {
      %c0_351 = arith.constant 0 : index
      %c0_352 = arith.constant 0 : index
      %c0_353 = arith.constant 0 : index
      %332 = vector.load %arg17[%c0_351, %c0_352, %c0_353] : memref<1x16x128xf32, #tpu.memory_space<vmem>>, vector<1x16x128xf32>
      %333 = vector.shape_cast %332 : vector<1x16x128xf32> to vector<16x128xf32>
      %334 = vector.shape_cast %326 : vector<16x128xf32> to vector<1x16x128xf32>
      tpu.vector_store %arg17[%c0_351, %c0_352, %c0_353], %334 {strides = array<i32>} : memref<1x16x128xf32, #tpu.memory_space<vmem>>, vector<1x16x128xf32>,
      %c0_354 = arith.constant 0 : index
      %c0_355 = arith.constant 0 : index
      %c0_356 = arith.constant 0 : index
      %335 = vector.load %arg18[%c0_354, %c0_355, %c0_356] : memref<1x16x128xf32, #tpu.memory_space<vmem>>, vector<1x16x128xf32>
      %336 = vector.shape_cast %335 : vector<1x16x128xf32> to vector<16x128xf32>
      %337 = vector.shape_cast %5 : vector<16x128xf32> to vector<1x16x128xf32>
      tpu.vector_store %arg18[%c0_354, %c0_355, %c0_356], %337 {strides = array<i32>} : memref<1x16x128xf32, #tpu.memory_space<vmem>>, vector<1x16x128xf32>,
    } else {
    }
    return
  }
  func.func @transform_0(%arg0: i32, %arg1: i32) -> (i32, i32, i32) {
    %c0_i32 = arith.constant 0 : i32
    %c0_i32_0 = arith.constant 0 : i32
    %c0_i32_1 = arith.constant 0 : i32
    return %arg0, %c0_i32, %c0_i32_0 : i32, i32, i32
  }
  func.func @transform_1(%arg0: i32, %arg1: i32) -> (i32, i32, i32) {
    %c0_i32 = arith.constant 0 : i32
    %c0_i32_0 = arith.constant 0 : i32
    %c0_i32_1 = arith.constant 0 : i32
    return %arg0, %c0_i32, %c0_i32_0 : i32, i32, i32
  }
  func.func @transform_2(%arg0: i32, %arg1: i32) -> (i32, i32, i32) {
    %c0_i32 = arith.constant 0 : i32
    %c0_i32_0 = arith.constant 0 : i32
    %c0_i32_1 = arith.constant 0 : i32
    return %arg0, %c0_i32, %c0_i32_0 : i32, i32, i32
  }
  func.func @transform_3(%arg0: i32, %arg1: i32) -> (i32, i32, i32) {
    %c0_i32 = arith.constant 0 : i32
    %c0_i32_0 = arith.constant 0 : i32
    %c0_i32_1 = arith.constant 0 : i32
    return %arg1, %c0_i32, %c0_i32_0 : i32, i32, i32
  }
  func.func @transform_4(%arg0: i32, %arg1: i32) -> (i32, i32, i32) {
    %c0_i32 = arith.constant 0 : i32
    %c0_i32_0 = arith.constant 0 : i32
    %c0_i32_1 = arith.constant 0 : i32
    return %arg1, %c0_i32, %c0_i32_0 : i32, i32, i32
  }
  func.func @transform_5(%arg0: i32, %arg1: i32) -> (i32, i32, i32, i32) {
    %c0_i32 = arith.constant 0 : i32
    %c0_i32_0 = arith.constant 0 : i32
    %c0_i32_1 = arith.constant 0 : i32
    %c0_i32_2 = arith.constant 0 : i32
    return %arg1, %c0_i32, %c0_i32_0, %c0_i32_1 : i32, i32, i32, i32
  }
  func.func @transform_6(%arg0: i32, %arg1: i32) -> (i32, i32, i32, i32) {
    %c0_i32 = arith.constant 0 : i32
    %c0_i32_0 = arith.constant 0 : i32
    %c0_i32_1 = arith.constant 0 : i32
    %c0_i32_2 = arith.constant 0 : i32
    return %arg1, %c0_i32, %c0_i32_0, %c0_i32_1 : i32, i32, i32, i32
  }
  func.func @transform_7(%arg0: i32, %arg1: i32) -> (i32, i32, i32, i32) {
    %c0_i32 = arith.constant 0 : i32
    %c0_i32_0 = arith.constant 0 : i32
    %c0_i32_1 = arith.constant 0 : i32
    %c0_i32_2 = arith.constant 0 : i32
    return %arg1, %c0_i32, %c0_i32_0, %c0_i32_1 : i32, i32, i32, i32
  }
  func.func @transform_8(%arg0: i32, %arg1: i32) -> (i32, i32, i32, i32) {
    %c0_i32 = arith.constant 0 : i32
    %c0_i32_0 = arith.constant 0 : i32
    %c0_i32_1 = arith.constant 0 : i32
    %c0_i32_2 = arith.constant 0 : i32
    return %arg1, %c0_i32, %c0_i32_0, %c0_i32_1 : i32, i32, i32, i32
  }
  func.func @transform_9(%arg0: i32, %arg1: i32) -> (i32, i32, i32, i32) {
    %c0_i32 = arith.constant 0 : i32
    %c0_i32_0 = arith.constant 0 : i32
    %c0_i32_1 = arith.constant 0 : i32
    %c0_i32_2 = arith.constant 0 : i32
    return %arg1, %c0_i32, %c0_i32_0, %c0_i32_1 : i32, i32, i32, i32
  }
  func.func @transform_10(%arg0: i32, %arg1: i32) -> (i32, i32, i32, i32) {
    %c0_i32 = arith.constant 0 : i32
    %c0_i32_0 = arith.constant 0 : i32
    %c0_i32_1 = arith.constant 0 : i32
    %c0_i32_2 = arith.constant 0 : i32
    return %arg1, %c0_i32, %c0_i32_0, %c0_i32_1 : i32, i32, i32, i32
  }
  func.func @transform_11(%arg0: i32, %arg1: i32) -> (i32, i32, i32, i32) {
    %c0_i32 = arith.constant 0 : i32
    %c0_i32_0 = arith.constant 0 : i32
    %c0_i32_1 = arith.constant 0 : i32
    %c0_i32_2 = arith.constant 0 : i32
    return %arg1, %c0_i32, %c0_i32_0, %c0_i32_1 : i32, i32, i32, i32
  }
  func.func @transform_12(%arg0: i32, %arg1: i32) -> (i32, i32, i32, i32) {
    %c0_i32 = arith.constant 0 : i32
    %c0_i32_0 = arith.constant 0 : i32
    %c0_i32_1 = arith.constant 0 : i32
    %c0_i32_2 = arith.constant 0 : i32
    return %arg1, %c0_i32, %c0_i32_0, %c0_i32_1 : i32, i32, i32, i32
  }
  func.func @transform_13(%arg0: i32, %arg1: i32) -> (i32, i32, i32) {
    %c0_i32 = arith.constant 0 : i32
    %c0_i32_0 = arith.constant 0 : i32
    %c0_i32_1 = arith.constant 0 : i32
    return %arg1, %c0_i32, %c0_i32_0 : i32, i32, i32
  }
  func.func @transform_14(%arg0: i32, %arg1: i32) -> (i32, i32, i32) {
    %c0_i32 = arith.constant 0 : i32
    %c0_i32_0 = arith.constant 0 : i32
    %c0_i32_1 = arith.constant 0 : i32
    return %arg1, %c0_i32, %c0_i32_0 : i32, i32, i32
  }
  func.func @transform_15(%arg0: i32, %arg1: i32) -> (i32, i32, i32) {
    %c0_i32 = arith.constant 0 : i32
    %c0_i32_0 = arith.constant 0 : i32
    %c0_i32_1 = arith.constant 0 : i32
    return %arg0, %c0_i32, %c0_i32_0 : i32, i32, i32
  }
  func.func @transform_16(%arg0: i32, %arg1: i32) -> (i32, i32, i32) {
    %c0_i32 = arith.constant 0 : i32
    %c0_i32_0 = arith.constant 0 : i32
    %c0_i32_1 = arith.constant 0 : i32
    return %arg0, %c0_i32, %c0_i32_0 : i32, i32, i32
  }
}

</mosaic_0001>

<bundles_post_ra>
// kernel: tpu_custom_call.1
= control target key start
LH: loop header
LB: loop body
LE: loop exit
PB: predicated region body
PF: predicated region fallthrough
CT: control target
= control target key end

     0   :  { %s12036_s0 = inlined_call_operand.hbm [shape: f32[2,16,128], index: 0, kind: input, shape index: {}]   ;;  %s12037_s1 = inlined_call_operand.hbm [shape: f32[2,16,128], index: 1, kind: input, shape index: {}]   ;;  %s12038_s2 = inlined_call_operand.vmem [shape: f32[2,16,1], index: 2, kind: input, shape index: {}]   ;;  %s12039_s3 = inlined_call_operand.hbm [shape: f32[1,128,128], index: 3, kind: input, shape index: {}]   ;;  %s12040_s4 = inlined_call_operand.hbm [shape: f32[1,1,128], index: 4, kind: input, shape index: {}]   ;;  %s12041_s5 = inlined_call_operand.hbm [shape: f32[1,20,128,128], index: 5, kind: input, shape index: {}]   ;;  %s12042_s6 = inlined_call_operand.hbm [shape: f32[1,4,1,128], index: 6, kind: input, shape index: {}]   ;;  %s12043_s7 = inlined_call_operand.hbm [shape: f32[1,20,128,128], index: 7, kind: input, shape index: {}]   ;;  %s12044_s8 = inlined_call_operand.hbm [shape: f32[1,4,1,128], index: 8, kind: input, shape index: {}]   ;;  %s12045_s9 = inlined_call_operand.hbm [shape: f32[1,4,128,128], index: 9, kind: input, shape index: {}]   ;;  %s12046_s10 = inlined_call_operand.hbm [shape: f32[1,4,1,128], index: 10, kind: input, shape index: {}]   ;;  %s12047_s11 = inlined_call_operand.hbm [shape: f32[1,4,128,128], index: 11, kind: input, shape index: {}]   ;;  %s12048_s12 = inlined_call_operand.hbm [shape: f32[1,4,1,128], index: 12, kind: input, shape index: {}]   ;;  %s12049_s13 = inlined_call_operand.hbm [shape: f32[1,128,128], index: 13, kind: input, shape index: {}]   ;;  %s12050_s14 = inlined_call_operand.hbm [shape: f32[1,1,128], index: 14, kind: input, shape index: {}]   ;;  %s12051_s15 = inlined_call_operand.hbm [shape: f32[2,16,128], index: 15, kind: output, shape index: {0}]   ;;  %s12052_s16 = inlined_call_operand.hbm [shape: f32[2,16,128], index: 16, kind: output, shape index: {1}]  }
   0x1   :  { %12070 = sst [smem:[#allocation47_spill]] %s12036_s0 }
   0x2   :  { %12071 = sst [smem:[#allocation48_spill]] %s12037_s1 }
   0x3   :  { %12072 = sst [smem:[#allocation49_spill]] %s12038_s2 }
   0x4   :  { %12073 = sst [smem:[#allocation50_spill]] %s12039_s3 }
   0x5   :  { %12074 = sst [smem:[#allocation51_spill]] %s12040_s4 }
   0x6   :  { %12075 = sst [smem:[#allocation52_spill]] %s12041_s5 }
   0x7   :  { %12076 = sst [smem:[#allocation53_spill]] %s12042_s6 }
   0x8   :  { %12077 = sst [smem:[#allocation54_spill]] %s12043_s7 }
   0x9   :  { %12078 = sst [smem:[#allocation55_spill]] %s12044_s8 }
   0xa   :  { %12079 = sst [smem:[#allocation56_spill]] %s12045_s9 }
   0xb   :  { %12080 = sst [smem:[#allocation57_spill]] %s12046_s10 }
   0xc   :  { %12081 = sst [smem:[#allocation58_spill]] %s12047_s11 }
   0xd   :  { %12082 = sst [smem:[#allocation59_spill]] %s12051_s15 }
   0xe   :  { %12083 = sst [smem:[#allocation60_spill]] %s12052_s16 }
   0xf   :  { %22 = vsyncpa [#allocation6], 0 }
  0x10   :  { %24 = vsyncpa [#allocation6 + $0x1], 0 }
  0x11   :  { %25 = vsyncpa [#allocation9], 0 }
  0x12   :  { %27 = vsyncpa [#allocation9 + $0x1], 0 }
  0x13   :  { %28 = vsyncpa [#allocation12], 0 }
  0x14   :  { %29 = vsyncpa [#allocation15], 0 }
  0x15   :  { %30 = vsyncpa [#allocation18], 0 }
  0x16   :  { %31 = vsyncpa [#allocation21], 0 }
  0x17   :  { %32 = vsyncpa [#allocation24], 0 }
  0x18   :  { %33 = vsyncpa [#allocation27], 0 }
  0x19   :  { %34 = vsyncpa [#allocation7], 0 }
  0x1a   :  { %36 = vsyncpa [#allocation7 + $0x1], 0 }
  0x1b   :  { %37 = vsyncpa [#allocation30], 0 }
  0x1c   :  { %39 = vsyncpa [#allocation30 + $0x1], 0  ;;  %s11336_s21 = smov 0   ;;  %s11338_s22 = smov 0  }
  0x1d   :  { %s11340_s23 = smov 0   ;;  %s11342_s24 = smov 0  }
  0x1e   :  { %s11344_s25 = smov 0   ;;  %s11346_s26 = smov 0  }
  0x1f LB: > { %12084 = sst [smem:[#allocation42_spill]] %s11205_s21  ;;  %s11367_s27 = sadd.s32 4294967295, %s11225_s26   ;;  %s11225_s26 = sphi %s11346_s26, %s45_s26   ;;  %s11221_s25 = sphi %s11344_s25, %s12144_s25   ;;  %s11217_s24 = sphi %s11342_s24, %s12143_s24   ;;  %s11213_s23 = sphi %s11340_s23, %s12142_s23   ;;  %s11209_s22 = sphi %s11338_s22, %s12141_s22   ;;  %s11205_s21 = sphi %s11336_s21, %s12140_s21  }
  0x20   : > { %12085 = sst [smem:[#allocation43_spill]] %s11209_s22  ;;  %p6089_p0 = scmp.ge.s32.totalorder %s11225_s26, 1 }
  0x21   : > { %12086 = sst [smem:[#allocation44_spill]] %s11217_s24  ;;  %p12063_p1 = scmp.eq.s32.totalorder %s11367_s27, 0 }
  0x22   : > { %12087 = sst [smem:[#allocation45_spill]] %s11367_s27  ;;  %p504_p2 = scmp.lt.s32.totalorder %s11225_s26, 3 }
  0x23   : > { %s11227_s29 = smov [#allocation10]   ;;  %s11228_s17 = smov [#allocation11]  }
  0x24   : > { %p11372_p3 = pnand %p6089_p0, %p504_p2  ;;  %s519_s30 = sshll.u32 %s11227_s29, 4  ;;  %s11376_s30 = int_to_ptr.vmem [resolvable:$true] %s519_s30 }
  0x25   : > { %s535_s18 = sshll.u32 %s11228_s17, 4  ;;  %s11229_s19 = smov [#allocation14]   ;;  %s11387_s18 = int_to_ptr.vmem [resolvable:$true] %s535_s18 }
  0x26   : > { %s12088_s28 = scalar_select %p11372_p3, 1, 0 }
  0x27   : > { %p10481_p4 = pneg %p11372_p3  ;;  %s11389_s20 = sshll.u32 %s11229_s19, 4  ;;  %s565_s20 = int_to_ptr.vmem [resolvable:$true] %s11389_s20 }
  0x28   : > { %12089 = sst [smem:[#allocation46_spill]] %s12088_s28  ;;  %s12091_s3 = sld [smem:[#allocation50_spill]] }
  0x29   : > { %p11383_p6 = pnand %p10481_p4, %p12063_p1 }
  0x2b   : > { %p11399_p8 = pneg %p11383_p6 }
  0x2e   : > { %s10683_s16 = scalar_lea.hbm %s12091_s3, 2048 }
  0x2f   : > { %p10684_p7 = scmp.ne.s32.totalorder %s12091_s3, %s10683_s16  ;;  %p10690_p11 = scmp.lt.u32.totalorder %s10683_s16, %s12091_s3 }
  0x31   : > { %p10686_p9 = pnand %p11399_p8, %p10684_p7 }
  0x33   : > { %p10687_p10 = pneg %p10686_p9 }
  0x35   : > { %p10692_p12 = pnand %p10690_p11, %p10687_p10 }
  0x37   : > { %10695 = shalt.err (!%p10692_p12)
}
  0x38   : > { %s10696_s2 = scalar_lea.vmem %s11376_s30, 2048  ;;  %p10704_p4 = scmp.lt.s32.totalorder %s11376_s30, %s11376_s30 }
  0x39   : > { %p10697_p13 = scmp.ne.s32.totalorder %s11376_s30, %s10696_s2  ;;  %p10705_p5 = scmp.lt.s32.totalorder %s10696_s2, %s10696_s2 }
  0x3b   : > { %p10699_p0 = pnand %p10697_p13, %p11399_p8  ;;  %p10706_p7 = por %p10705_p5, %p10704_p4 }
  0x3d   : > { %p10700_p2 = pneg %p10699_p0 }
  0x3f   : > { %p10707_p9 = pnand %p10706_p7, %p10700_p2 }
  0x41   : > { %10710 = shalt.err (!%p10707_p9)
}
  0x42   : > { %s12065_s15 = smov 128   ;;  %s12067_s16 = smov 8  }
  0x43   : > { %10484 = dma.hbm_to_vmem [thread:$0]  (!%p11383_p6), %s12091_s3, 2048, %s11376_s30, [#allocation9], %s12065_s15, %s12065_s15, %s12067_s16  }
  0x44   : > { %s12093_s4 = sld [smem:[#allocation51_spill]] }
  0x4a   : > { %s10711_s2 = scalar_lea.hbm %s12093_s4, 16 }
  0x4b   : > { %p10712_p5 = scmp.ne.s32.totalorder %s12093_s4, %s10711_s2  ;;  %p10718_p12 = scmp.lt.u32.totalorder %s10711_s2, %s12093_s4 }
  0x4d   : > { %p10714_p10 = pnand %p10712_p5, %p11399_p8 }
  0x4f   : > { %p10715_p11 = pneg %p10714_p10 }
  0x51   : > { %p10720_p13 = pnand %p10718_p12, %p10715_p11 }
  0x53   : > { %10723 = shalt.err (!%p10720_p13)
}
  0x54   : > { %s10724_s30 = scalar_lea.vmem %s11387_s18, 16  ;;  %s10731_s1 = scalar_lea.vmem %s11387_s18, 32 }
  0x55   : > { %p10725_p0 = scmp.ne.s32.totalorder %s11387_s18, %s10724_s30  ;;  %p10732_p7 = scmp.lt.s32.totalorder %s11387_s18, %s11387_s18 }
  0x56   : > { %p10733_p9 = scmp.lt.s32.totalorder %s10731_s1, %s10724_s30 }
  0x57   : > { %p10727_p2 = pnand %p10725_p0, %p11399_p8 }
  0x58   : > { %p10734_p5 = por %p10733_p9, %p10732_p7 }
  0x59   : > { %p10728_p4 = pneg %p10727_p2 }
  0x5b   : > { %p10735_p10 = pnand %p10734_p5, %p10728_p4 }
  0x5d   : > { %10738 = shalt.err (!%p10735_p10)
}
  0x5e   : > { %10487 = dma.hbm_to_vmem [thread:$0]  (!%p11383_p6), %s12093_s4, 16, %s11387_s18, [#allocation12]  }
  0x5f   : > { %s12094_s6 = sld [smem:[#allocation53_spill]] }
  0x65   : > { %s10739_s29 = scalar_lea.hbm %s12094_s6, 64 }
  0x66   : > { %p10740_p11 = scmp.ne.s32.totalorder %s12094_s6, %s10739_s29  ;;  %p10746_p0 = scmp.lt.u32.totalorder %s10739_s29, %s12094_s6 }
  0x68   : > { %p10742_p12 = pnand %p10740_p11, %p11399_p8 }
  0x6a   : > { %p10743_p13 = pneg %p10742_p12 }
  0x6c   : > { %p10748_p2 = pnand %p10746_p0, %p10743_p13 }
  0x6e   : > { %10751 = shalt.err (!%p10748_p2)
}
  0x6f   : > { %s10752_s1 = scalar_lea.vmem %s565_s20, 64  ;;  %p10760_p5 = scmp.lt.s32.totalorder %s565_s20, %s565_s20 }
  0x70   : > { %p10753_p4 = scmp.ne.s32.totalorder %s565_s20, %s10752_s1  ;;  %p10761_p10 = scmp.lt.s32.totalorder %s10752_s1, %s10752_s1 }
  0x72   : > { %p10755_p7 = pnand %p10753_p4, %p11399_p8  ;;  %p10762_p1 = por %p10761_p10, %p10760_p5 }
  0x74   : > { %p10756_p9 = pneg %p10755_p7 }
  0x76   : > { %p10763_p3 = pnand %p10762_p1, %p10756_p9 }
  0x78   : > { %10766 = shalt.err (!%p10763_p3)
}
  0x79   : > { %s11232_s18 = smov 16   ;;  %s11233_s21 = smov 1  }
  0x7a   : > { %10493 = dma.hbm_to_vmem [thread:$0]  (!%p11383_p6), %s12094_s6, 64, %s565_s20, [#allocation15], %s11232_s18, %s11232_s18, %s11233_s21  }
  0x7b   : > { %s11234_s24 = smov [#allocation17]   ;;  %s11235_s17 = smov [#allocation20]  }
  0x7c   : > { %s596_s29 = sshll.u32 %s11234_s24, 4  ;;  %s628_s19 = sshll.u32 %s11235_s17, 4  ;;  %s597_s29 = int_to_ptr.vmem [resolvable:$true] %s596_s29  ;;  %s629_s19 = int_to_ptr.vmem [resolvable:$true] %s628_s19 }
  0x7d   : > { %s12095_s8 = sld [smem:[#allocation55_spill]] }
  0x83   : > { %s10767_s1 = scalar_lea.hbm %s12095_s8, 64 }
  0x84   : > { %p10768_p1 = scmp.ne.s32.totalorder %s12095_s8, %s10767_s1  ;;  %p10774_p12 = scmp.lt.u32.totalorder %s10767_s1, %s12095_s8 }
  0x86   : > { %p10770_p3 = pnand %p10768_p1, %p11399_p8 }
  0x88   : > { %p10771_p11 = pneg %p10770_p3 }
  0x8a   : > { %p10776_p13 = pnand %p10774_p12, %p10771_p11 }
  0x8c   : > { %10779 = shalt.err (!%p10776_p13)
}
  0x8d   : > { %s10780_s20 = scalar_lea.vmem %s597_s29, 64  ;;  %p10788_p7 = scmp.lt.s32.totalorder %s597_s29, %s597_s29 }
  0x8e   : > { %p10781_p0 = scmp.ne.s32.totalorder %s597_s29, %s10780_s20  ;;  %p10789_p9 = scmp.lt.s32.totalorder %s10780_s20, %s10780_s20 }
  0x90   : > { %p10783_p2 = pnand %p10781_p0, %p11399_p8  ;;  %p10790_p5 = por %p10789_p9, %p10788_p7 }
  0x92   : > { %p10784_p4 = pneg %p10783_p2 }
  0x94   : > { %p10791_p10 = pnand %p10790_p5, %p10784_p4 }
  0x96   : > { %10794 = shalt.err (!%p10791_p10)
}
  0x97   : > { %10499 = dma.hbm_to_vmem [thread:$0]  (!%p11383_p6), %s12095_s8, 64, %s597_s29, [#allocation18], %s11232_s18, %s11232_s18, %s11233_s21  }
  0x98   : > { %s12096_s10 = sld [smem:[#allocation57_spill]] }
  0x9e   : > { %s10795_s22 = scalar_lea.hbm %s12096_s10, 64 }
  0x9f   : > { %p10796_p1 = scmp.ne.s32.totalorder %s12096_s10, %s10795_s22  ;;  %p10802_p12 = scmp.lt.u32.totalorder %s10795_s22, %s12096_s10 }
  0xa1   : > { %p10798_p3 = pnand %p10796_p1, %p11399_p8 }
  0xa3   : > { %p10799_p11 = pneg %p10798_p3 }
  0xa5   : > { %p10804_p13 = pnand %p10802_p12, %p10799_p11 }
  0xa7   : > { %10807 = shalt.err (!%p10804_p13)
}
  0xa8   : > { %s10808_s30 = scalar_lea.vmem %s629_s19, 64  ;;  %p10816_p7 = scmp.lt.s32.totalorder %s629_s19, %s629_s19 }
  0xa9   : > { %p10809_p0 = scmp.ne.s32.totalorder %s629_s19, %s10808_s30  ;;  %p10817_p9 = scmp.lt.s32.totalorder %s10808_s30, %s10808_s30 }
  0xab   : > { %p10811_p2 = pnand %p10809_p0, %p11399_p8  ;;  %p10818_p5 = por %p10817_p9, %p10816_p7 }
  0xad   : > { %p10812_p4 = pneg %p10811_p2 }
  0xaf   : > { %p10819_p10 = pnand %p10818_p5, %p10812_p4 }
  0xb1   : > { %10822 = shalt.err (!%p10819_p10)
}
  0xb2   : > { %10505 = dma.hbm_to_vmem [thread:$0]  (!%p11383_p6), %s12096_s10, 64, %s629_s19, [#allocation21], %s11232_s18, %s11232_s18, %s11233_s21  }
  0xb3   : > { %s11236_s20 = smov [#allocation23]   ;;  %s11237_s4 = smov [#allocation13]  }
  0xb4   : > { %s660_s3 = sshll.u32 %s11236_s20, 4  ;;  %s548_s15 = sshll.u32 %s11237_s4, 4  ;;  %s661_s3 = int_to_ptr.vmem [resolvable:$true] %s660_s3  ;;  %s549_s15 = int_to_ptr.vmem [resolvable:$true] %s548_s15 }
  0xb5   : > { %s10823_s27 = scalar_lea.hbm %s12048_s12, 64 }
  0xb6   : > { %p10824_p1 = scmp.ne.s32.totalorder %s12048_s12, %s10823_s27  ;;  %p10830_p12 = scmp.lt.u32.totalorder %s10823_s27, %s12048_s12 }
  0xb8   : > { %p10826_p3 = pnand %p10824_p1, %p11399_p8 }
  0xba   : > { %p10827_p11 = pneg %p10826_p3 }
  0xbc   : > { %p10832_p13 = pnand %p10830_p12, %p10827_p11 }
  0xbe   : > { %10835 = shalt.err (!%p10832_p13)
}
  0xbf   : > { %s10836_s19 = scalar_lea.vmem %s661_s3, 64  ;;  %p10844_p7 = scmp.lt.s32.totalorder %s661_s3, %s661_s3 }
  0xc0   : > { %p10837_p0 = scmp.ne.s32.totalorder %s661_s3, %s10836_s19  ;;  %p10845_p9 = scmp.lt.s32.totalorder %s10836_s19, %s10836_s19 }
  0xc2   : > { %p10839_p2 = pnand %p10837_p0, %p11399_p8  ;;  %p10846_p5 = por %p10845_p9, %p10844_p7 }
  0xc4   : > { %p10840_p4 = pneg %p10839_p2 }
  0xc6   : > { %p10847_p10 = pnand %p10846_p5, %p10840_p4 }
  0xc8   : > { %10850 = shalt.err (!%p10847_p10)
}
  0xc9   : > { %10511 = dma.hbm_to_vmem [thread:$0]  (!%p11383_p6), %s12048_s12, 64, %s661_s3, [#allocation24], %s11232_s18, %s11232_s18, %s11233_s21  }
  0xca   : > { %s12097_s5 = sld [smem:[#allocation52_spill]] }
  0xd0   : > { %s10851_s16 = scalar_lea.hbm %s12097_s5, 40960 }
  0xd1   : > { %p10852_p1 = scmp.ne.s32.totalorder %s12097_s5, %s10851_s16  ;;  %p10858_p12 = scmp.lt.u32.totalorder %s10851_s16, %s12097_s5 }
  0xd3   : > { %p10854_p3 = pnand %p10852_p1, %p11399_p8 }
  0xd5   : > { %p10855_p11 = pneg %p10854_p3 }
  0xd7   : > { %p10860_p13 = pnand %p10858_p12, %p10855_p11 }
  0xd9   : > { %10863 = shalt.err (!%p10860_p13)
}
  0xda   : > { %s10864_s2 = scalar_lea.vmem %s549_s15, 40960  ;;  %p10872_p7 = scmp.lt.s32.totalorder %s549_s15, %s549_s15 }
  0xdb   : > { %p10865_p0 = scmp.ne.s32.totalorder %s549_s15, %s10864_s2  ;;  %p10873_p9 = scmp.lt.s32.totalorder %s10864_s2, %s10864_s2 }
  0xdd   : > { %p10867_p2 = pnand %p10865_p0, %p11399_p8  ;;  %p10874_p5 = por %p10873_p9, %p10872_p7 }
  0xdf   : > { %p10868_p4 = pneg %p10867_p2 }
  0xe1   : > { %p10875_p10 = pnand %p10874_p5, %p10868_p4 }
  0xe3   : > { %10878 = shalt.err (!%p10875_p10)
}
  0xe4   : > { %s12098_s18 = smov 8   ;;  %s12099_s21 = smov 128  }
  0xe5   : > { %10490 = dma.hbm_to_vmem [thread:$0]  (!%p11383_p6), %s12097_s5, 40960, %s549_s15, [#allocation12], %s12099_s21, %s12099_s21, %s12098_s18  }
  0xe6   : > { %s11238_s19 = smov [#allocation16]   ;;  %s11239_s1 = smov [#allocation19]  }
  0xe7   : > { %s580_s29 = sshll.u32 %s11238_s19, 4  ;;  %s612_s20 = sshll.u32 %s11239_s1, 4  ;;  %s581_s29 = int_to_ptr.vmem [resolvable:$true] %s580_s29  ;;  %s613_s20 = int_to_ptr.vmem [resolvable:$true] %s612_s20 }
  0xe8   : > { %s12100_s7 = sld [smem:[#allocation54_spill]] }
  0xee   : > { %s10879_s22 = scalar_lea.hbm %s12100_s7, 40960 }
  0xef   : > { %p10880_p1 = scmp.ne.s32.totalorder %s12100_s7, %s10879_s22  ;;  %p10886_p12 = scmp.lt.u32.totalorder %s10879_s22, %s12100_s7 }
  0xf1   : > { %p10882_p3 = pnand %p10880_p1, %p11399_p8 }
  0xf3   : > { %p10883_p11 = pneg %p10882_p3 }
  0xf5   : > { %p10888_p13 = pnand %p10886_p12, %p10883_p11 }
  0xf7   : > { %10891 = shalt.err (!%p10888_p13)
}
  0xf8   : > { %s10892_s15 = scalar_lea.vmem %s581_s29, 40960  ;;  %p10900_p7 = scmp.lt.s32.totalorder %s581_s29, %s581_s29 }
  0xf9   : > { %p10893_p0 = scmp.ne.s32.totalorder %s581_s29, %s10892_s15  ;;  %p10901_p9 = scmp.lt.s32.totalorder %s10892_s15, %s10892_s15 }
  0xfb   : > { %p10895_p2 = pnand %p10893_p0, %p11399_p8  ;;  %p10902_p5 = por %p10901_p9, %p10900_p7 }
  0xfd   : > { %p10896_p4 = pneg %p10895_p2 }
  0xff   : > { %p10903_p10 = pnand %p10902_p5, %p10896_p4 }
 0x101   : > { %10906 = shalt.err (!%p10903_p10)
}
 0x102   : > { %10496 = dma.hbm_to_vmem [thread:$0]  (!%p11383_p6), %s12100_s7, 40960, %s581_s29, [#allocation15], %s12099_s21, %s12099_s21, %s12098_s18  }
 0x103   : > { %s12101_s9 = sld [smem:[#allocation56_spill]] }
 0x109   : > { %s10907_s4 = scalar_lea.hbm %s12101_s9, 8192 }
 0x10a   : > { %p10908_p1 = scmp.ne.s32.totalorder %s12101_s9, %s10907_s4  ;;  %p10914_p12 = scmp.lt.u32.totalorder %s10907_s4, %s12101_s9 }
 0x10c   : > { %p10910_p3 = pnand %p10908_p1, %p11399_p8 }
 0x10e   : > { %p10911_p11 = pneg %p10910_p3 }
 0x110   : > { %p10916_p13 = pnand %p10914_p12, %p10911_p11 }
 0x112   : > { %10919 = shalt.err (!%p10916_p13)
}
 0x113   : > { %s10920_s17 = scalar_lea.vmem %s613_s20, 8192  ;;  %p10928_p7 = scmp.lt.s32.totalorder %s613_s20, %s613_s20 }
 0x114   : > { %p10921_p0 = scmp.ne.s32.totalorder %s613_s20, %s10920_s17  ;;  %p10929_p9 = scmp.lt.s32.totalorder %s10920_s17, %s10920_s17 }
 0x116   : > { %p10923_p2 = pnand %p10921_p0, %p11399_p8  ;;  %p10930_p5 = por %p10929_p9, %p10928_p7 }
 0x118   : > { %p10924_p4 = pneg %p10923_p2 }
 0x11a   : > { %p10931_p10 = pnand %p10930_p5, %p10924_p4 }
 0x11c   : > { %10934 = shalt.err (!%p10931_p10)
}
 0x11d   : > { %10502 = dma.hbm_to_vmem [thread:$0]  (!%p11383_p6), %s12101_s9, 8192, %s613_s20, [#allocation18], %s12099_s21, %s12099_s21, %s12098_s18  }
 0x11e   : > { %s11240_s15 = smov [#allocation22]   ;;  %s11241_s30 = smov [#allocation25]  }
 0x11f   : > { %s644_s3 = sshll.u32 %s11240_s15, 4  ;;  %s676_s19 = sshll.u32 %s11241_s30, 4  ;;  %s645_s3 = int_to_ptr.vmem [resolvable:$true] %s644_s3  ;;  %s677_s19 = int_to_ptr.vmem [resolvable:$true] %s676_s19 }
 0x120   : > { %s12102_s11 = sld [smem:[#allocation58_spill]] }
 0x126   : > { %s10935_s16 = scalar_lea.hbm %s12102_s11, 8192 }
 0x127   : > { %p10936_p1 = scmp.ne.s32.totalorder %s12102_s11, %s10935_s16  ;;  %p10942_p12 = scmp.lt.u32.totalorder %s10935_s16, %s12102_s11 }
 0x129   : > { %p10938_p3 = pnand %p10936_p1, %p11399_p8 }
 0x12b   : > { %p10939_p11 = pneg %p10938_p3 }
 0x12d   : > { %p10944_p13 = pnand %p10942_p12, %p10939_p11 }
 0x12f   : > { %10947 = shalt.err (!%p10944_p13)
}
 0x130   : > { %s10948_s20 = scalar_lea.vmem %s645_s3, 8192  ;;  %p10956_p7 = scmp.lt.s32.totalorder %s645_s3, %s645_s3 }
 0x131   : > { %p10949_p0 = scmp.ne.s32.totalorder %s645_s3, %s10948_s20  ;;  %p10957_p9 = scmp.lt.s32.totalorder %s10948_s20, %s10948_s20 }
 0x133   : > { %p10951_p2 = pnand %p10949_p0, %p11399_p8  ;;  %p10958_p5 = por %p10957_p9, %p10956_p7 }
 0x135   : > { %p10952_p4 = pneg %p10951_p2 }
 0x137   : > { %p10959_p10 = pnand %p10958_p5, %p10952_p4 }
 0x139   : > { %10962 = shalt.err (!%p10959_p10)
}
 0x13a   : > { %10508 = dma.hbm_to_vmem [thread:$0]  (!%p11383_p6), %s12102_s11, 8192, %s645_s3, [#allocation21], %s12099_s21, %s12099_s21, %s12098_s18  }
 0x13b   : > { %s10963_s1 = scalar_lea.hbm %s12049_s13, 2048 }
 0x13c   : > { %p10964_p1 = scmp.ne.s32.totalorder %s12049_s13, %s10963_s1  ;;  %p10970_p12 = scmp.lt.u32.totalorder %s10963_s1, %s12049_s13 }
 0x13e   : > { %p10966_p3 = pnand %p10964_p1, %p11399_p8 }
 0x140   : > { %p10967_p11 = pneg %p10966_p3 }
 0x142   : > { %p10972_p13 = pnand %p10970_p12, %p10967_p11 }
 0x144   : > { %10975 = shalt.err (!%p10972_p13)
}
 0x145   : > { %s10976_s24 = scalar_lea.vmem %s677_s19, 2048  ;;  %p10984_p7 = scmp.lt.s32.totalorder %s677_s19, %s677_s19 }
 0x146   : > { %p10977_p0 = scmp.ne.s32.totalorder %s677_s19, %s10976_s24  ;;  %p10985_p9 = scmp.lt.s32.totalorder %s10976_s24, %s10976_s24 }
 0x148   : > { %p10979_p2 = pnand %p10977_p0, %p11399_p8  ;;  %p10986_p5 = por %p10985_p9, %p10984_p7 }
 0x14a   : > { %p10980_p4 = pneg %p10979_p2 }
 0x14c   : > { %p10987_p10 = pnand %p10986_p5, %p10980_p4 }
 0x14e   : > { %10990 = shalt.err (!%p10987_p10)
}
 0x14f   : > { %10514 = dma.hbm_to_vmem [thread:$0]  (!%p11383_p6), %s12049_s13, 2048, %s677_s19, [#allocation24], %s12099_s21, %s12099_s21, %s12098_s18  }
 0x150   : > { %s11242_s20 = smov [#allocation26]   ;;  %s10991_s30 = scalar_lea.hbm %s12050_s14, 16 }
 0x151   : > { %s692_s29 = sshll.u32 %s11242_s20, 4  ;;  %p10992_p1 = scmp.ne.s32.totalorder %s12050_s14, %s10991_s30  ;;  %s693_s29 = int_to_ptr.vmem [resolvable:$true] %s692_s29 }
 0x152   : > { %p10998_p12 = scmp.lt.u32.totalorder %s10991_s30, %s12050_s14 }
 0x153   : > { %p10994_p3 = pnand %p10992_p1, %p11399_p8 }
 0x155   : > { %p10995_p11 = pneg %p10994_p3 }
 0x157   : > { %p11000_p13 = pnand %p10998_p12, %p10995_p11 }
 0x159   : > { %11003 = shalt.err (!%p11000_p13)
}
 0x15a   : > { %s11004_s19 = scalar_lea.vmem %s693_s29, 16  ;;  %s11011_s27 = scalar_lea.vmem %s693_s29, 32 }
 0x15b   : > { %p11005_p0 = scmp.ne.s32.totalorder %s693_s29, %s11004_s19  ;;  %p11012_p7 = scmp.lt.s32.totalorder %s693_s29, %s693_s29 }
 0x15c   : > { %p11013_p9 = scmp.lt.s32.totalorder %s11011_s27, %s11004_s19 }
 0x15d   : > { %p11007_p2 = pnand %p11005_p0, %p11399_p8 }
 0x15e   : > { %p11014_p5 = por %p11013_p9, %p11012_p7 }
 0x15f   : > { %p11008_p4 = pneg %p11007_p2 }
 0x161   : > { %p11015_p10 = pnand %p11014_p5, %p11008_p4 }
 0x163   : > { %11018 = shalt.err (!%p11015_p10)
}
 0x164   : > { %s12103_s17 = sld [smem:[#allocation43_spill]]  ;;  %s12104_s28 = sld [smem:[#allocation42_spill]] }
 0x165   : > { %s12105_s20 = sld [smem:[#allocation45_spill]]  ;;  %s6088_s2 = sadd.s32 4294967294, %s11225_s26  }
 0x166   : > { %10517 = dma.hbm_to_vmem [thread:$0]  (!%p11383_p6), %s12050_s14, 16, %s693_s29, [#allocation27]  }
 0x167   : > { %s57_s15 = sadd.s32 1, %s11221_s25  ;;  %s64_s0 = sadd.s32 1, %s11213_s23 }
 0x168   : > { %p59_p8 = scmp.ge.s32.totalorder %s57_s15, 2  ;;  %p72_p3 = scmp.eq.s32.totalorder %s11225_s26, 0 }
 0x169   : > { %p471_p7 = scmp.eq.s32.totalorder %s6088_s2, 1  ;;  %p10544_p5 = scmp.lt.s32.totalorder %s11225_s26, 2 }
 0x16a   : > { %p71_p1 = scmp.ne.s32.totalorder %s11213_s23, %s12103_s17  ;;  %s12146_s15 = smov (%p59_p8, %s57_s15), 0 }
 0x16b   : > { %p77_p12 = scmp.ne.s32.totalorder %s12103_s17, %s12104_s28  ;;  %s61_s29 = ssub.s32 %s11221_s25, %s12146_s15 }
 0x16c   : > { %p11663_p11 = por %p72_p3, %p71_p1  ;;  %p465_p6 = scmp.eq.s32.totalorder %s12105_s20, 1 }
 0x16d   : > { %p62_p13 = scmp.eq.s32.totalorder %s61_s29, 0  ;;  %p12107_p0 = scmp.eq.s32.totalorder %s12105_s20, 0 }
 0x16e   : > { %p11678_p4 = por %p465_p6, %p71_p1  ;;  %p11685_p9 = por %p471_p7, %p77_p12 }
 0x16f   : > { %p11674_p2 = por %p12107_p0, %p77_p12  ;;  %s703_s19 = sand.u32 1, %s11213_s23  }
 0x170   : > { %s12109_s4 = scalar_select %p11678_p4, 1, 0 }
 0x171   : > { %s11683_s16 = scalar_select %p62_p13, %s11213_s23, %s64_s0  }
 0x172   : > { %s12110_s22 = scalar_select %p11685_p9, 1, 0 }
 0x173   : > { %s6161_s27 = sshll.u32 %s11221_s25, 8  ;;  %s11692_s24 = sshll.u32 %s703_s19, 4 }
 0x174   : > { %s12111_s28 = sld [smem:[#allocation47_spill]]  ;;  %s707_s2 = scalar_lea.vmem [#allocation5], %s11692_s24 }
 0x175   : > { %s714_s0 = sshll.u32 %s707_s2, 4  ;;  %p11702_p10 = pnand %p10544_p5, %p11663_p11  ;;  %s11706_s0 = int_to_ptr.vmem [resolvable:$true] %s714_s0 }
 0x176   : > { %s12113_s17 = sld [smem:[#allocation48_spill]]  ;;  %s11713_s7 = scalar_lea.sflag [#allocation6], %s703_s19 }
 0x177   : > { %p11021_p1 = pneg %p11702_p10 }
 0x17a   : > { %s11697_s20 = scalar_lea.hbm %s12111_s28, %s6161_s27  ;;  %s11024_s9 = scalar_lea.hbm %s12111_s28, 512 }
 0x17b   : > { %s11019_s8 = scalar_lea.hbm %s11697_s20, 256  ;;  %p11025_p12 = scmp.lt.u32.totalorder %s11697_s20, %s12111_s28 }
 0x17c   : > { %s11711_s6 = scalar_lea.hbm %s12113_s17, %s6161_s27  ;;  %p11020_p8 = scmp.ne.s32.totalorder %s11697_s20, %s11019_s8 }
 0x17d   : > { %p11026_p6 = scmp.lt.u32.totalorder %s11024_s9, %s11019_s8  ;;  %p11028_p0 = scmp.lt.u32.totalorder %s11019_s8, %s11697_s20 }
 0x17e   : > { %p11022_p3 = pnand %p11021_p1, %p11020_p8 }
 0x17f   : > { %p11027_p13 = por %p11026_p6, %p11025_p12 }
 0x180   : > { %p11023_p11 = pneg %p11022_p3 }
 0x181   : > { %p11029_p7 = por %p11028_p0, %p11027_p13 }
 0x183   : > { %p11030_p5 = pnand %p11029_p7, %p11023_p11 }
 0x185   : > { %11033 = shalt.err (!%p11030_p5)
}
 0x186   : > { %s11034_s5 = scalar_lea.vmem %s11706_s0, 256  ;;  %s11243_s19 = smov [#allocation5]  }
 0x187   : > { %p11035_p8 = scmp.ne.s32.totalorder %s11706_s0, %s11034_s5  ;;  %s11039_s27 = sshll.u32 %s11243_s19, 4  ;;  %s11040_s27 = int_to_ptr.vmem [resolvable:$false] %s11039_s27 }
 0x188   : > { %s11041_s10 = scalar_lea.vmem %s11040_s27, 512  ;;  %p11042_p4 = scmp.lt.s32.totalorder %s11706_s0, %s11040_s27 }
 0x189   : > { %p11037_p3 = pnand %p11035_p8, %p11021_p1  ;;  %p11043_p12 = scmp.lt.s32.totalorder %s11041_s10, %s11034_s5 }
 0x18b   : > { %p11038_p9 = pneg %p11037_p3  ;;  %p11044_p6 = por %p11043_p12, %p11042_p4 }
 0x18d   : > { %p11045_p13 = pnand %p11044_p6, %p11038_p9 }
 0x18f   : > { %11048 = shalt.err (!%p11045_p13)
}
 0x190   : > { %10521 = dma.hbm_to_vmem [thread:$0]  (!%p11702_p10), %s11697_s20, 256, %s11706_s0, %s11713_s7, %s12099_s21, %s12099_s21, %s12098_s18  }
 0x191   : > { %s728_s8 = scalar_lea.vmem [#allocation8], %s11692_s24  ;;  %s724_s11 = sand.u32 1, %s11225_s26  }
 0x192   : > { %s735_s9 = sshll.u32 %s728_s8, 4  ;;  %s11748_s3 = scalar_lea.sflag [#allocation9], %s724_s11  ;;  %s11746_s9 = int_to_ptr.vmem [resolvable:$true] %s735_s9 }
 0x193   : > { %s11049_s30 = scalar_lea.hbm %s11711_s6, 256  ;;  %s11054_s19 = scalar_lea.hbm %s12113_s17, 512 }
 0x194   : > { %p11050_p4 = scmp.ne.s32.totalorder %s11711_s6, %s11049_s30  ;;  %p11055_p0 = scmp.lt.u32.totalorder %s11711_s6, %s12113_s17 }
 0x195   : > { %p11056_p7 = scmp.lt.u32.totalorder %s11054_s19, %s11049_s30  ;;  %p11058_p8 = scmp.lt.u32.totalorder %s11049_s30, %s11711_s6 }
 0x196   : > { %p11052_p9 = pnand %p11050_p4, %p11021_p1 }
 0x197   : > { %p11057_p5 = por %p11056_p7, %p11055_p0 }
 0x198   : > { %p11053_p11 = pneg %p11052_p9 }
 0x199   : > { %p11059_p3 = por %p11058_p8, %p11057_p5 }
 0x19b   : > { %p11060_p12 = pnand %p11059_p3, %p11053_p11 }
 0x19d   : > { %11063 = shalt.err (!%p11060_p12)
}
 0x19e   : > { %s11064_s7 = scalar_lea.vmem %s11746_s9, 256  ;;  %s11244_s24 = smov [#allocation8]  }
 0x19f   : > { %p11065_p6 = scmp.ne.s32.totalorder %s11746_s9, %s11064_s7  ;;  %s11069_s20 = sshll.u32 %s11244_s24, 4  ;;  %s11070_s20 = int_to_ptr.vmem [resolvable:$false] %s11069_s20 }
 0x1a0   : > { %s11071_s0 = scalar_lea.vmem %s11070_s20, 512  ;;  %p11072_p9 = scmp.lt.s32.totalorder %s11746_s9, %s11070_s20 }
 0x1a1   : > { %p11067_p13 = pnand %p11065_p6, %p11021_p1  ;;  %p11073_p0 = scmp.lt.s32.totalorder %s11071_s0, %s11064_s7 }
 0x1a3   : > { %p11068_p4 = pneg %p11067_p13  ;;  %p11074_p7 = por %p11073_p0, %p11072_p9 }
 0x1a5   : > { %p11075_p5 = pnand %p11074_p7, %p11068_p4 }
 0x1a7   : > { %11078 = shalt.err (!%p11075_p5)
}
 0x1a8   : > { %10524 = dma.hbm_to_vmem [thread:$0]  (!%p11702_p10), %s11711_s6, 256, %s11746_s9, %s11748_s3, %s12099_s21, %s12099_s21, %s12098_s18  }
 0x1a9   : > { %s12114_s8 = sld [smem:[#allocation46_spill]] }
 0x1af   : > { %p12115_p1 = scmp.ne.s32.totalorder %s12114_s8, 0 }
 0x1b0   : > { %s12116_s11 = sld [smem:[#allocation43_spill]] (!%p12115_p1) }
 0x1b1   : > { %755 = sbr.rel (%p12115_p1) target bundleno = 3313 (0xcf1), region = 80 }
 0x1b6   : > { %s11780_s30 = sand.u32 (!%p12115_p1), 1, %s12116_s11  }
 0x1b7   : > { %s11783_s2 = sshll.u32 (!%p12115_p1), %s11780_s30, 4  ;;  %s758_s29 = scalar_lea.sflag (!%p12115_p1), [#allocation6], %s11780_s30 }
 0x1b8   : > { %s761_s5 = scalar_lea.vmem [#allocation5], %s11783_s2 }
 0x1b9   : > { %11160 = dma.done.wait (%p11674_p2), %s758_s29, 256  }
 0x1ba   : > { %11162 = vsyncadd (%p11674_p2), %s758_s29, 4294967040  ;;  %s12117_s6 = sld [smem:[#allocation45_spill]]  ;;  %s770_s9 = scalar_lea.vmem [#allocation8], %s11783_s2 }
 0x1c0   : > { %s766_s18 = sand.u32 1, %s12117_s6  }
 0x1c1   : > { %s767_s21 = scalar_lea.sflag [#allocation9], %s766_s18 }
 0x1c2   : > { %11164 = dma.done.wait (%p11674_p2), %s767_s21, 256  }
 0x1c3   : > { %11166 = vsyncadd (%p11674_p2), %s767_s21, 4294967040  ;;  %p12118_p10 = scmp.eq.s32.totalorder %s12117_s6, 0 }
 0x1c5   : > { %11168 = dma.done.wait (%p12118_p10), [#allocation9], 2048   ;;  %p12119_p11 = pmov %p12118_p10 }
 0x1c6   : > { %p12120_p8 = pmov %p12118_p10 }
 0x1c7   : > { %11170 = vsyncadd (%p12119_p11), [#allocation9], 4294965248 }
 0x1c8   : > { %11172 = dma.done.wait (%p12120_p8), [#allocation12], 40976   ;;  %p12121_p3 = pmov %p12120_p8 }
 0x1ca   : > { %11174 = vsyncadd (%p12121_p3), [#allocation12], 4294926320  ;;  %p12122_p12 = pmov %p12121_p3 }
 0x1cb   : > { %p12123_p6 = pmov %p12121_p3 }
 0x1cc   : > { %11176 = dma.done.wait (%p12122_p12), [#allocation15], 41024  }
 0x1cd   : > { %11178 = vsyncadd (%p12123_p6), [#allocation15], 4294926272  ;;  %p12124_p2 = pmov %p12121_p3 }
 0x1cf   : > { %11180 = dma.done.wait (%p12124_p2), [#allocation18], 8256   ;;  %p12125_p13 = pmov %p12124_p2 }
 0x1d0   : > { %p12126_p4 = pmov %p12124_p2 }
 0x1d1   : > { %11182 = vsyncadd (%p12125_p13), [#allocation18], 4294959040 }
 0x1d2   : > { %11184 = dma.done.wait (%p12126_p4), [#allocation21], 8256   ;;  %p12127_p9 = pmov %p12124_p2 }
 0x1d3   : > { %p12128_p0 = pmov %p12124_p2 }
 0x1d4   : > { %11186 = vsyncadd (%p12127_p9), [#allocation21], 4294959040 }
 0x1d5   : > { %11188 = dma.done.wait (%p12128_p0), [#allocation24], 2112   ;;  %p12129_p7 = pmov %p12128_p0 }
 0x1d6   : > { %p12130_p5 = pmov %p12128_p0 }
 0x1d7   : > { %11190 = vsyncadd (%p12129_p7), [#allocation24], 4294965184 }
 0x1d8   : > { %11192 = dma.done.wait (%p12130_p5), [#allocation27], 16   ;;  %p12131_p1 = pmov %p12128_p0 }
 0x1d9   : > { %s12132_s1 = sld [smem:[#allocation44_spill]]  ;;  %v11245_v0 = vmov 0   ;;  %v909_v1 = vld [vmem:[#allocation10] sm:$0xff]  ;;  %v910_v2 = vld [vmem:[#allocation10 + $0x8] sm:$0xff]  ;;  %v911_v3 = vld [vmem:[#allocation10 + $0x10] sm:$0xff]  ;;  %s12133_s7 = sld [smem:[#allocation49_spill]] }
 0x1da   : > { %11194 = vsyncadd (%p12131_p1), [#allocation27], 4294967280  ;;  %10626 = vset.pattern.permute.xlu0 %v11245_v0  ;;  %v8763_v4 = vpack.c.bf16 %v910_v2, %v909_v1  ;;  %v912_v5 = vld [vmem:[#allocation10 + $0x18] sm:$0xff]  ;;  %v913_v7 = vld [vmem:[#allocation10 + $0x20] sm:$0xff]  ;;  %s11837_s20 = scalar_lea.vmem [#allocation29], %s11783_s2  ;;  %s5772_s18 = scalar_lea.sflag [#allocation30], %s11780_s30 }
 0x1db   : > { %v8767_v6 = vpack.c.bf16 %v912_v5, %v911_v3  ;;  %v914_v8 = vld [vmem:[#allocation10 + $0x28] sm:$0xff]  ;;  %v915_v10 = vld [vmem:[#allocation10 + $0x30] sm:$0xff]  ;;  %v916_v13 = vld [vmem:[#allocation10 + $0x38] sm:$0xff]  ;;  %s5801_s0 = sshll.u32 %s11837_s20, 4  ;;  %p12135_p8 = scmp.ne.s32.totalorder %s12109_s4, 0  ;;  %s11932_s0 = int_to_ptr.vmem [resolvable:$true] %s5801_s0 }
 0x1dc   : > { %8764 = vmatprep.subr.bf16.mxu0 %v8763_v4  ;;  %v8771_v9 = vpack.c.bf16 %v914_v8, %v913_v7  ;;  %v891_v11 = vld [vmem:[%s761_s5] sm:$0xff]  ;;  %v11834_v12 = vld [vmem:[%s761_s5 + $0x8] sm:$0xff]  ;;  %v8775_v21 = vpack.c.bf16 %v916_v13, %v915_v10  ;;  %v11246_v7 = vmov 0.0   ;;  %s12134_s5 = sld [smem:[#allocation60_spill]]  ;;  %s11079_s21 = scalar_lea.vmem %s11932_s0, 256 }
 0x1dd   : > { %8766 = vmatpush3.bf16.msra.mxu0 %v8763_v4  ;;  %7080 = vmatprep.mubr.f32.mxu0 %v891_v11  ;;  %5764 = vst [vmem:[%s11837_s20] sm:$0xff] %v891_v11  ;;  %5765 = vst [vmem:[%s11837_s20 + $0x8] sm:$0xff] %v11834_v12  ;;  %v1023_v15 = vld [vmem:[#allocation13] sm:$0xff]  ;;  %v1024_v16 = vld [vmem:[#allocation13 + $0x8] sm:$0xff]  ;;  %p11080_p11 = scmp.ne.s32.totalorder %s11932_s0, %s11079_s21 }
 0x1de   : > { %8768 = vmatprep.subr.bf16.mxu0 %v8767_v6  ;;  %v8795_v18 = vpack.c.bf16 %v1024_v16, %v1023_v15  ;;  %v1025_v19 = vld [vmem:[#allocation13 + $0x10] sm:$0xff]  ;;  %v1026_v20 = vld [vmem:[#allocation13 + $0x18] sm:$0xff]  ;;  %v1027_v23 = vld [vmem:[#allocation13 + $0x20] sm:$0xff]  ;;  %900 = vst [vmem:[#allocation4 + $0x8] sm:$0xff] %v11246_v7 }
 0x1df   : > { %p882_p10 = scmp.lt.s32.totalorder %s12132_s1, 1  ;;  %v8799_v22 = vpack.c.bf16 %v1026_v20, %v1025_v19  ;;  %v1028_v24 = vld [vmem:[#allocation13 + $0x28] sm:$0xff]  ;;  %v917_v25 = vld [vmem:[#allocation10 + $0x40] sm:$0xff]  ;;  %v1029_v29 = vld [vmem:[#allocation13 + $0x30] sm:$0xff]  ;;  %901 = vst [vmem:[#allocation4 + $0x20] sm:$0xff] %v11246_v7  ;;  %s6164_s8 = sshll.u32 %s12132_s1, 8 }
 0x1e0   : > { %v918_v26 = vld [vmem:[#allocation10 + $0x48] sm:$0xff]  ;;  %8796 = vmatprep.subr.bf16.mxu1 %v8795_v18  ;;  %v8803_v27 = vpack.c.bf16 %v1028_v24, %v1027_v23  ;;  %v1030_v30 = vld [vmem:[#allocation13 + $0x38] sm:$0xff]  ;;  %v919_v31 = vld [vmem:[#allocation10 + $0x50] sm:$0xff]  ;;  %p11081_p3 = pnand %p11080_p11, %p12135_p8 }
 0x1e1   : > { %s883_s3 = scalar_select %p882_p10, %s12132_s1, 1  ;;  %8770 = vmatpush3.bf16.msra.mxu0 %v8767_v6  ;;  %8798 = vmatpush3.bf16.msra.mxu1 %v8795_v18  ;;  %v8779_v28 = vpack.c.bf16 %v918_v26, %v917_v25  ;;  %v920_v32 = vld [vmem:[#allocation10 + $0x58] sm:$0xff]  ;;  %v8807_v33 = vpack.c.bf16 %v1030_v30, %v1029_v29  ;;  %v1031_v35 = vld [vmem:[#allocation13 + $0x40] sm:$0xff]  ;;  %v1032_v36 = vld [vmem:[#allocation13 + $0x48] sm:$0xff] }
 0x1e2   : > { %8772 = vmatprep.subr.bf16.mxu0 %v8771_v9  ;;  %8800 = vmatprep.subr.bf16.mxu1 %v8799_v22  ;;  %v8783_v34 = vpack.c.bf16 %v920_v32, %v919_v31  ;;  %v921_v37 = vld [vmem:[#allocation10 + $0x60] sm:$0xff]  ;;  %v922_v38 = vld [vmem:[#allocation10 + $0x68] sm:$0xff]  ;;  %v8811_v39 = vpack.c.bf16 %v1032_v36, %v1031_v35  ;;  %v923_v41 = vld [vmem:[#allocation10 + $0x70] sm:$0xff]  ;;  %s11939_s6 = scalar_lea.hbm %s12134_s5, %s6164_s8  ;;  %p11082_p12 = pneg %p11081_p3 }
 0x1e3   : > { %s6163_s19 = sshll.u32 %s883_s3, 4  ;;  %v8787_v40 = vpack.c.bf16 %v922_v38, %v921_v37  ;;  %v924_v42 = vld [vmem:[#allocation10 + $0x78] sm:$0xff]  ;;  %v1121_v44 = vld [vmem:[#allocation16] sm:$0xff]  ;;  %v1122_v45 = vld [vmem:[#allocation16 + $0x8] sm:$0xff]  ;;  %s11247_s3 = smov [#allocation29]  }
 0x1e4   : > { %s886_s24 = scalar_lea.vmem %s12133_s7, %s6163_s19  ;;  %v8791_v43 = vpack.c.bf16 %v924_v42, %v923_v41  ;;  %v8827_v46 = vpack.c.bf16 %v1122_v45, %v1121_v44  ;;  %v1123_v47 = vld [vmem:[#allocation16 + $0x10] sm:$0xff]  ;;  %v1124_v48 = vld [vmem:[#allocation16 + $0x18] sm:$0xff]  ;;  %v1125_v50 = vld [vmem:[#allocation16 + $0x20] sm:$0xff]  ;;  %s11083_s19 = sshll.u32 %s11247_s3, 4  ;;  %s11084_s19 = int_to_ptr.vmem [resolvable:$false] %s11083_s19 }
 0x1e5   : > { %v903_v14 = vld [vmem:[%s886_s24] sm:$0xff]  ;;  %v904_v17 = vld [vmem:[%s886_s24 + $0x8] sm:$0xff]  ;;  %8774 = vmatpush3.bf16.msra.mxu0 %v8771_v9  ;;  %8802 = vmatpush3.bf16.msra.mxu1 %v8799_v22  ;;  %v8831_v49 = vpack.c.bf16 %v1124_v48, %v1123_v47  ;;  %v1129_v56 = vld [vmem:[#allocation16 + $0x40] sm:$0xff]  ;;  %s11085_s27 = scalar_lea.vmem %s11084_s19, 512  ;;  %p11086_p6 = scmp.lt.s32.totalorder %s11932_s0, %s11084_s19 }
 0x1e6   : > { %1009 = vperm.xlu0 %10626, %v903_v14   ;;  %8776 = vmatprep.subr.bf16.mxu0 %v8775_v21  ;;  %v1126_v51 = vld [vmem:[#allocation16 + $0x28] sm:$0xff]  ;;  %v1127_v53 = vld [vmem:[#allocation16 + $0x30] sm:$0xff]  ;;  %v1128_v54 = vld [vmem:[#allocation16 + $0x38] sm:$0xff]  ;;  %p11087_p2 = scmp.lt.s32.totalorder %s11085_s27, %s11079_s21 }
 0x1e7   : > { %8804 = vmatprep.subr.bf16.mxu1 %v8803_v27  ;;  %v8835_v52 = vpack.c.bf16 %v1126_v51, %v1125_v50  ;;  %v8839_v55 = vpack.c.bf16 %v1128_v54, %v1127_v53  ;;  %v1130_v57 = vld [vmem:[#allocation16 + $0x48] sm:$0xff]  ;;  %v1034_v60 = vld [vmem:[#allocation13 + $0x58] sm:$0xff]  ;;  %v1035_v1 = vld [vmem:[#allocation13 + $0x60] sm:$0xff] }
 0x1e8   : > { %v8843_v58 = vpack.c.bf16 %v1130_v57, %v1129_v56  ;;  %v1033_v59 = vld [vmem:[#allocation13 + $0x50] sm:$0xff]  ;;  %v1132_v63 = vld [vmem:[#allocation16 + $0x58] sm:$0xff]  ;;  %v1036_v2 = vld [vmem:[#allocation13 + $0x68] sm:$0xff]  ;;  %p11088_p13 = por %p11087_p2, %p11086_p6 }
 0x1e9   : > { %8778 = vmatpush3.bf16.msra.mxu0 %v8775_v21  ;;  %8806 = vmatpush3.bf16.msra.mxu1 %v8803_v27  ;;  %v1131_v61 = vld [vmem:[#allocation16 + $0x50] sm:$0xff]  ;;  %v8815_v62 = vpack.c.bf16 %v1034_v60, %v1033_v59  ;;  %v1133_v3 = vld [vmem:[#allocation16 + $0x60] sm:$0xff]  ;;  %v8819_v4 = vpack.c.bf16 %v1036_v2, %v1035_v1  ;;  %v1134_v5 = vld [vmem:[#allocation16 + $0x68] sm:$0xff] }
 0x1ea   : > { %1014 = vperm.xlu0 %10626, %v904_v17   ;;  %8780 = vmatprep.subr.bf16.mxu0 %v8779_v28  ;;  %v8847_v0 = vpack.c.bf16 %v1132_v63, %v1131_v61  ;;  %v8851_v6 = vpack.c.bf16 %v1134_v5, %v1133_v3  ;;  %v1037_v8 = vld [vmem:[#allocation13 + $0x70] sm:$0xff]  ;;  %v1038_v9 = vld [vmem:[#allocation13 + $0x78] sm:$0xff]  ;;  %v1222_v14 = vld [vmem:[#allocation13 + $0x80] sm:$0xff]  ;;  %p11089_p4 = pnand %p11088_p13, %p11082_p12 }
 0x1eb   : > { %8808 = vmatprep.subr.bf16.mxu1 %v8807_v33  ;;  %v1135_v10 = vld [vmem:[#allocation16 + $0x70] sm:$0xff]  ;;  %v8823_v11 = vpack.c.bf16 %v1038_v9, %v1037_v8  ;;  %v1223_v15 = vld [vmem:[#allocation13 + $0x88] sm:$0xff]  ;;  %v6128_v21 = vld [vmem:[#allocation11] ss:$0 sm:$0xff] }
 0x1ec   : > { %v1316_v16 = vld [vmem:[#allocation16 + $0x80] sm:$0xff]  ;;  %v8859_v17 = vpack.c.bf16 %v1223_v15, %v1222_v14  ;;  %v1317_v18 = vld [vmem:[#allocation16 + $0x88] sm:$0xff]  ;;  %v1225_v30 = vld [vmem:[#allocation13 + $0x98] sm:$0xff] }
 0x1ed   : > { %8782 = vmatpush3.bf16.msra.mxu0 %v8779_v28  ;;  %8810 = vmatpush3.bf16.msra.mxu1 %v8807_v33  ;;  %v8891_v19 = vpack.c.bf16 %v1317_v18, %v1316_v16  ;;  %v1224_v29 = vld [vmem:[#allocation13 + $0x90] sm:$0xff]  ;;  %v1319_v32 = vld [vmem:[#allocation16 + $0x98] sm:$0xff]  ;;  %v1227_v38 = vld [vmem:[#allocation13 + $0xa8] sm:$0xff] }
 0x1ee   : > { %8784 = vmatprep.subr.bf16.mxu0 %v8783_v34  ;;  %8812 = vmatprep.subr.bf16.mxu1 %v8811_v39  ;;  %v1318_v31 = vld [vmem:[#allocation16 + $0x90] sm:$0xff]  ;;  %v1226_v35 = vld [vmem:[#allocation13 + $0xa0] sm:$0xff]  ;;  %v8863_v36 = vpack.c.bf16 %v1225_v30, %v1224_v29  ;;  %v1231_v51 = vld [vmem:[#allocation13 + $0xc8] sm:$0xff] }
 0x1ef   : > { %v8895_v37 = vpack.c.bf16 %v1319_v32, %v1318_v31  ;;  %v8867_v42 = vpack.c.bf16 %v1227_v38, %v1226_v35  ;;  %v1228_v44 = vld [vmem:[#allocation13 + $0xb0] sm:$0xff]  ;;  %v1229_v45 = vld [vmem:[#allocation13 + $0xb8] sm:$0xff]  ;;  %v1230_v50 = vld [vmem:[#allocation13 + $0xc0] sm:$0xff] }
 0x1f0   : > { %v1323_v47 = vld [vmem:[#allocation16 + $0xb8] sm:$0xff]  ;;  %v8871_v48 = vpack.c.bf16 %v1229_v45, %v1228_v44  ;;  %v1325_v53 = vld [vmem:[#allocation16 + $0xc8] sm:$0xff]  ;;  %v8875_v54 = vpack.c.bf16 %v1231_v51, %v1230_v50  ;;  %v1508_v18 = vld [vmem:[#allocation16 + $0x110] sm:$0xff] }
 0x1f1   : > { %8786 = vmatpush3.bf16.msra.mxu0 %v8783_v34  ;;  %8814 = vmatpush3.bf16.msra.mxu1 %v8811_v39  ;;  %v1320_v39 = vld [vmem:[#allocation16 + $0xa0] sm:$0xff]  ;;  %v1232_v56 = vld [vmem:[#allocation13 + $0xd0] sm:$0xff]  ;;  %v1233_v57 = vld [vmem:[#allocation13 + $0xd8] sm:$0xff] }
 0x1f2   : > { %8788 = vmatprep.subr.bf16.mxu0 %v8787_v40  ;;  %8816 = vmatprep.subr.bf16.mxu1 %v8815_v62  ;;  %v1327_v59 = vld [vmem:[#allocation16 + $0xd8] sm:$0xff]  ;;  %v8879_v60 = vpack.c.bf16 %v1233_v57, %v1232_v56  ;;  %v1235_v63 = vld [vmem:[#allocation13 + $0xe8] sm:$0xff]  ;;  %v1414_v16 = vld [vmem:[#allocation13 + $0x110] sm:$0xff] }
 0x1f3   : > { %v1329_v1 = vld [vmem:[#allocation16 + $0xe8] sm:$0xff]  ;;  %v1237_v5 = vld [vmem:[#allocation13 + $0xf8] sm:$0xff]  ;;  %v1510_v29 = vld [vmem:[#allocation16 + $0x120] sm:$0xff] }
 0x1f4   : > { %v1331_v7 = vld [vmem:[#allocation16 + $0xf8] sm:$0xff]  ;;  %v1511_v30 = vld [vmem:[#allocation16 + $0x128] sm:$0xff]  ;;  %v1512_v35 = vld [vmem:[#allocation16 + $0x130] sm:$0xff] }
 0x1f5   : > { %8790 = vmatpush3.bf16.msra.mxu0 %v8787_v40  ;;  %8818 = vmatpush3.bf16.msra.mxu1 %v8815_v62  ;;  %v1321_v40 = vld [vmem:[#allocation16 + $0xa8] sm:$0xff]  ;;  %v1234_v62 = vld [vmem:[#allocation13 + $0xe0] sm:$0xff]  ;;  %v8963_v32 = vpack.c.bf16 %v1511_v30, %v1510_v29  ;;  %v1423_v45 = vld [vmem:[#allocation13 + $0x158] sm:$0xff] }
 0x1f6   : > { %8792 = vmatprep.subr.bf16.mxu0 %v8791_v43  ;;  %8820 = vmatprep.subr.bf16.mxu1 %v8819_v4  ;;  %v8883_v2 = vpack.c.bf16 %v1235_v63, %v1234_v62  ;;  %v1422_v44 = vld [vmem:[#allocation13 + $0x150] sm:$0xff]  ;;  %v1424_v50 = vld [vmem:[#allocation13 + $0x160] sm:$0xff]  ;;  %v1425_v51 = vld [vmem:[#allocation13 + $0x168] sm:$0xff] }
 0x1f7   : > { %v1426_v56 = vld [vmem:[#allocation13 + $0x170] sm:$0xff]  ;;  %v1427_v57 = vld [vmem:[#allocation13 + $0x178] sm:$0xff]  ;;  %v1602_v62 = vld [vmem:[#allocation13 + $0x180] sm:$0xff] }
 0x1f8   : > { %v1603_v63 = vld [vmem:[#allocation13 + $0x188] sm:$0xff] }
 0x1f9   : > { %8794 = vmatpush3.bf16.msra.mxu0 %v8791_v43  ;;  %8822 = vmatpush3.bf16.msra.mxu1 %v8819_v4  ;;  %v8899_v43 = vpack.c.bf16 %v1321_v40, %v1320_v39  ;;  %v1236_v4 = vld [vmem:[#allocation13 + $0xf0] sm:$0xff]  ;;  %v1420_v39 = vld [vmem:[#allocation13 + $0x140] sm:$0xff]  ;;  %v1421_v40 = vld [vmem:[#allocation13 + $0x148] sm:$0xff] }
 0x1fa   : > { %8828 = vmatprep.subr.bf16.mxu0 %v8827_v46  ;;  %8824 = vmatprep.subr.bf16.mxu1 %v8823_v11  ;;  %v8887_v8 = vpack.c.bf16 %v1237_v5, %v1236_v4  ;;  %v1604_v4 = vld [vmem:[#allocation13 + $0x190] sm:$0xff]  ;;  %v1605_v5 = vld [vmem:[#allocation13 + $0x198] sm:$0xff] }
 0x1fb   : > { %v1705_v29 = vld [vmem:[#allocation16 + $0x1c8] sm:$0xff] }
 0x1fc   : > { %7081 = vmatmul.mubr.f32.vlgmr.msra.gmra.mrb[0].mxu0 %v11834_v12  ;;  %v1136_v12 = vld [vmem:[#allocation16 + $0x78] sm:$0xff] }
 0x1fd   : > { %8830 = vmatpush3.bf16.msra.mxu0 %v8827_v46  ;;  %v8855_v13 = vpack.c.bf16 %v1136_v12, %v1135_v10  ;;  %8826 = vmatpush3.bf16.msra.mxu1 %v8823_v11  ;;  %v1322_v46 = vld [vmem:[#allocation16 + $0xb0] sm:$0xff]  ;;  %v1412_v10 = vld [vmem:[#allocation13 + $0x100] sm:$0xff]  ;;  %v1413_v11 = vld [vmem:[#allocation13 + $0x108] sm:$0xff] }
 0x1fe   : > { %8832 = vmatprep.subr.bf16.mxu0 %v8831_v49  ;;  %8860 = vmatprep.subr.bf16.mxu1 %v8859_v17  ;;  %v1506_v12 = vld [vmem:[#allocation16 + $0x100] sm:$0xff]  ;;  %v8923_v14 = vpack.c.bf16 %v1413_v11, %v1412_v10 }
 0x1ff   : > { %v1607_v10 = vld [vmem:[#allocation13 + $0x1a8] sm:$0xff] }
 0x201   : > { %8834 = vmatpush3.bf16.msra.mxu0 %v8831_v49  ;;  %v8903_v49 = vpack.c.bf16 %v1323_v47, %v1322_v46  ;;  %v1516_v46 = vld [vmem:[#allocation16 + $0x150] sm:$0xff]  ;;  %v1517_v47 = vld [vmem:[#allocation16 + $0x158] sm:$0xff] }
 0x202   : > { %8836 = vmatprep.subr.bf16.mxu0 %v8835_v52 }
 0x205   : > { %8838 = vmatpush3.bf16.msra.mxu0 %v8835_v52  ;;  %v1324_v52 = vld [vmem:[#allocation16 + $0xc0] sm:$0xff] }
 0x206   : > { %8840 = vmatprep.subr.bf16.mxu0 %v8839_v55 }
 0x209   : > { %8842 = vmatpush3.bf16.msra.mxu0 %v8839_v55  ;;  %v8907_v55 = vpack.c.bf16 %v1325_v53, %v1324_v52  ;;  %v1518_v52 = vld [vmem:[#allocation16 + $0x160] sm:$0xff]  ;;  %v1519_v53 = vld [vmem:[#allocation16 + $0x168] sm:$0xff] }
 0x20a   : > { %8844 = vmatprep.subr.bf16.mxu0 %v8843_v58 }
 0x20d   : > { %8846 = vmatpush3.bf16.msra.mxu0 %v8843_v58  ;;  %v1326_v58 = vld [vmem:[#allocation16 + $0xd0] sm:$0xff] }
 0x20e   : > { %8848 = vmatprep.subr.bf16.mxu0 %v8847_v0  ;;  %v8911_v61 = vpack.c.bf16 %v1327_v59, %v1326_v58  ;;  %v1520_v58 = vld [vmem:[#allocation16 + $0x170] sm:$0xff]  ;;  %v1521_v59 = vld [vmem:[#allocation16 + $0x178] sm:$0xff] }
 0x211   : > { %8850 = vmatpush3.bf16.msra.mxu0 %v8847_v0  ;;  %v1328_v0 = vld [vmem:[#allocation16 + $0xe0] sm:$0xff] }
 0x212   : > { %8852 = vmatprep.subr.bf16.mxu0 %v8851_v6  ;;  %v8915_v3 = vpack.c.bf16 %v1329_v1, %v1328_v0  ;;  %v1696_v0 = vld [vmem:[#allocation16 + $0x180] sm:$0xff]  ;;  %v1697_v1 = vld [vmem:[#allocation16 + $0x188] sm:$0xff] }
 0x215   : > { %8854 = vmatpush3.bf16.msra.mxu0 %v8851_v6  ;;  %v1330_v6 = vld [vmem:[#allocation16 + $0xf0] sm:$0xff] }
 0x216   : > { %8856 = vmatprep.subr.bf16.mxu0 %v8855_v13  ;;  %v8919_v9 = vpack.c.bf16 %v1331_v7, %v1330_v6  ;;  %v1698_v6 = vld [vmem:[#allocation16 + $0x190] sm:$0xff]  ;;  %v1699_v7 = vld [vmem:[#allocation16 + $0x198] sm:$0xff] }
 0x217   : > { %v9023_v11 = vpack.c.bf16 %v1699_v7, %v1698_v6  ;;  %v1799_v6 = vld [vmem:[#allocation13 + $0x238] sm:$0xff] }
 0x218   : > { %v1892_v7 = vld [vmem:[#allocation16 + $0x230] sm:$0xff] }
 0x219   : > { %8858 = vmatpush3.bf16.msra.mxu0 %v8855_v13  ;;  %v1507_v13 = vld [vmem:[#allocation16 + $0x108] sm:$0xff] }
 0x21a   : > { %8892 = vmatprep.subr.bf16.mxu0 %v8891_v19  ;;  %v8955_v15 = vpack.c.bf16 %v1507_v13, %v1506_v12  ;;  %v1700_v12 = vld [vmem:[#allocation16 + $0x1a0] sm:$0xff]  ;;  %v1701_v13 = vld [vmem:[#allocation16 + $0x1a8] sm:$0xff] }
 0x265   : > { %v11843_v20 = vpop.permute.xlu0 %1009 }
 0x269   : > { %v11845_v25 = vpop.permute.xlu0 %1014 }
 0x2cf   : > { %v7082_v22 = vpop.f32.mrb[0].mxu0 }
 0x2d0   : > { %v1004_v23 = vadd.f32 %v7082_v22, %v6128_v21  ;;  %v998_v24 = vpop.f32.mrb[1].mxu0 }
 0x2d1   : > { %v999_v26 = vadd.f32 %v6128_v21, %v998_v24  ;;  %v1416_v24 = vld [vmem:[#allocation13 + $0x120] sm:$0xff] }
 0x2d2   : > { %v11848_v27 = vmul.f32 %v11845_v25, %v1004_v23 }
 0x2d3   : > { %v11851_v28 = vmul.f32 %v11843_v20, %v999_v26  ;;  %v1417_v26 = vld [vmem:[#allocation13 + $0x128] sm:$0xff] }
 0x2d4   : > { %1020 = vst [vmem:[#allocation4 + $0x18] sm:$0xff] %v11848_v27  ;;  %v8931_v31 = vpack.c.bf16 %v1417_v26, %v1416_v24  ;;  %v1611_v24 = vld [vmem:[#allocation13 + $0x1c8] sm:$0xff] }
 0x2d5   : > { %1019 = vst [vmem:[#allocation4 + $0x10] sm:$0xff] %v11851_v28  ;;  %v1704_v26 = vld [vmem:[#allocation16 + $0x1c0] sm:$0xff] }
 0x2dc   : > { %v1021_v33 = vld [vmem:[#allocation4 + $0xe] sm:$0xff]  ;;  %v1022_v34 = vld [vmem:[#allocation4 + $0x16] sm:$0xff] }
 0x2dd   : > { %7115 = vmatprep.mubr.f32.mxu1 %v1021_v33  ;;  %7150 = vmatprep.mubr.f32.mxu0 %v1021_v33  ;;  %v1219_v41 = vld [vmem:[#allocation4 + $0xf] sm:$0xff]  ;;  %v1220_v21 = vld [vmem:[#allocation4 + $0x17] sm:$0xff]  ;;  %v1418_v33 = vld [vmem:[#allocation13 + $0x130] sm:$0xff] }
 0x2de   : > { %7116 = vmatmul.mubr.f32.vlgmr.msra.gmra.mrb[0].mxu1 %v1022_v34  ;;  %7151 = vmatmul.mubr.f32.vlgmr.msra.gmra.mrb[2].mxu0 %v1022_v34  ;;  %v1419_v34 = vld [vmem:[#allocation13 + $0x138] sm:$0xff] }
 0x2df   : > { %8862 = vmatpush3.bf16.msra.mxu1 %v8859_v17  ;;  %8894 = vmatpush3.bf16.msra.mxu0 %v8891_v19  ;;  %v1415_v17 = vld [vmem:[#allocation13 + $0x118] sm:$0xff] }
 0x2e0   : > { %7185 = vmatprep.mubr.f32.mxu1 %v1219_v41  ;;  %7220 = vmatprep.mubr.f32.mxu0 %v1219_v41  ;;  %v1509_v19 = vld [vmem:[#allocation16 + $0x118] sm:$0xff]  ;;  %v8927_v22 = vpack.c.bf16 %v1415_v17, %v1414_v16  ;;  %v1514_v41 = vld [vmem:[#allocation16 + $0x140] sm:$0xff]  ;;  %v9027_v16 = vpack.c.bf16 %v1701_v13, %v1700_v12  ;;  %v1608_v17 = vld [vmem:[#allocation13 + $0x1b0] sm:$0xff] }
 0x2e1   : > { %8864 = vmatprep.subr.bf16.mxu1 %v8863_v36  ;;  %8896 = vmatprep.subr.bf16.mxu0 %v8895_v37  ;;  %v8959_v23 = vpack.c.bf16 %v1509_v19, %v1508_v18  ;;  %v1609_v18 = vld [vmem:[#allocation13 + $0x1b8] sm:$0xff]  ;;  %v1801_v12 = vld [vmem:[#allocation13 + $0x248] sm:$0xff] }
 0x2e2   : > { %v1702_v19 = vld [vmem:[#allocation16 + $0x1b0] sm:$0xff]  ;;  %v1894_v13 = vld [vmem:[#allocation16 + $0x240] sm:$0xff] }
 0x2e3   : > { %8866 = vmatpush3.bf16.msra.mxu1 %v8863_v36  ;;  %8898 = vmatpush3.bf16.msra.mxu0 %v8895_v37  ;;  %v1513_v36 = vld [vmem:[#allocation16 + $0x138] sm:$0xff]  ;;  %v8935_v37 = vpack.c.bf16 %v1419_v34, %v1418_v33  ;;  %v1706_v34 = vld [vmem:[#allocation16 + $0x1d0] sm:$0xff] }
 0x2e4   : > { %8868 = vmatprep.subr.bf16.mxu1 %v8867_v42  ;;  %8900 = vmatprep.subr.bf16.mxu0 %v8899_v43  ;;  %v8967_v38 = vpack.c.bf16 %v1513_v36, %v1512_v35  ;;  %v1613_v33 = vld [vmem:[#allocation13 + $0x1d8] sm:$0xff] }
 0x2e5   : > { %v1707_v35 = vld [vmem:[#allocation16 + $0x1d8] sm:$0xff] }
 0x2e7   : > { %8870 = vmatpush3.bf16.msra.mxu1 %v8867_v42  ;;  %8902 = vmatpush3.bf16.msra.mxu0 %v8899_v43  ;;  %v1515_v42 = vld [vmem:[#allocation16 + $0x148] sm:$0xff] }
 0x2e8   : > { %8872 = vmatprep.subr.bf16.mxu1 %v8871_v48  ;;  %8904 = vmatprep.subr.bf16.mxu0 %v8903_v49  ;;  %v8971_v43 = vpack.c.bf16 %v1515_v42, %v1514_v41  ;;  %v1709_v41 = vld [vmem:[#allocation16 + $0x1e8] sm:$0xff] }
 0x2eb   : > { %8874 = vmatpush3.bf16.msra.mxu1 %v8871_v48  ;;  %8906 = vmatpush3.bf16.msra.mxu0 %v8903_v49  ;;  %v8943_v48 = vpack.c.bf16 %v1423_v45, %v1422_v44  ;;  %v8975_v49 = vpack.c.bf16 %v1517_v47, %v1516_v46  ;;  %v1617_v44 = vld [vmem:[#allocation13 + $0x1f8] sm:$0xff] }
 0x2ec   : > { %8876 = vmatprep.subr.bf16.mxu1 %v8875_v54  ;;  %8908 = vmatprep.subr.bf16.mxu0 %v8907_v55  ;;  %v1710_v45 = vld [vmem:[#allocation16 + $0x1f0] sm:$0xff]  ;;  %v1711_v46 = vld [vmem:[#allocation16 + $0x1f8] sm:$0xff] }
 0x2ef   : > { %8878 = vmatpush3.bf16.msra.mxu1 %v8875_v54  ;;  %8910 = vmatpush3.bf16.msra.mxu0 %v8907_v55  ;;  %v8947_v54 = vpack.c.bf16 %v1425_v51, %v1424_v50  ;;  %v8979_v55 = vpack.c.bf16 %v1519_v53, %v1518_v52  ;;  %v1793_v50 = vld [vmem:[#allocation13 + $0x208] sm:$0xff] }
 0x2f0   : > { %8880 = vmatprep.subr.bf16.mxu1 %v8879_v60  ;;  %8912 = vmatprep.subr.bf16.mxu0 %v8911_v61  ;;  %v1886_v51 = vld [vmem:[#allocation16 + $0x200] sm:$0xff]  ;;  %v1887_v52 = vld [vmem:[#allocation16 + $0x208] sm:$0xff] }
 0x2f3   : > { %8882 = vmatpush3.bf16.msra.mxu1 %v8879_v60  ;;  %8914 = vmatpush3.bf16.msra.mxu0 %v8911_v61  ;;  %v8951_v60 = vpack.c.bf16 %v1427_v57, %v1426_v56  ;;  %v8983_v61 = vpack.c.bf16 %v1521_v59, %v1520_v58  ;;  %v1795_v56 = vld [vmem:[#allocation13 + $0x218] sm:$0xff]  ;;  %v1600_v59 = vld [vmem:[#allocation4 + $0x19] sm:$0xff] }
 0x2f4   : > { %8884 = vmatprep.subr.bf16.mxu1 %v8883_v2  ;;  %8916 = vmatprep.subr.bf16.mxu0 %v8915_v3  ;;  %v1888_v57 = vld [vmem:[#allocation16 + $0x210] sm:$0xff]  ;;  %v1889_v58 = vld [vmem:[#allocation16 + $0x218] sm:$0xff] }
 0x2f7   : > { %8886 = vmatpush3.bf16.msra.mxu1 %v8883_v2  ;;  %8918 = vmatpush3.bf16.msra.mxu0 %v8915_v3  ;;  %v8987_v2 = vpack.c.bf16 %v1603_v63, %v1602_v62  ;;  %v9019_v3 = vpack.c.bf16 %v1697_v1, %v1696_v0  ;;  %v1797_v62 = vld [vmem:[#allocation13 + $0x228] sm:$0xff]  ;;  %v9087_v63 = vpack.c.bf16 %v1889_v58, %v1888_v57  ;;  %v2099_v58 = vld [vmem:[#allocation19 + $0x30] sm:$0xff] }
 0x2f8   : > { %8888 = vmatprep.subr.bf16.mxu1 %v8887_v8  ;;  %8920 = vmatprep.subr.bf16.mxu0 %v8919_v9  ;;  %v1890_v0 = vld [vmem:[#allocation16 + $0x220] sm:$0xff]  ;;  %v1891_v1 = vld [vmem:[#allocation16 + $0x228] sm:$0xff] }
 0x2f9   : > { %v2002_v57 = vld [vmem:[#allocation22 + $0x38] sm:$0xff] }
 0x2fb   : > { %8890 = vmatpush3.bf16.msra.mxu1 %v8887_v8  ;;  %8922 = vmatpush3.bf16.msra.mxu0 %v8919_v9  ;;  %v8991_v8 = vpack.c.bf16 %v1605_v5, %v1604_v4  ;;  %v1606_v9 = vld [vmem:[#allocation13 + $0x1a0] sm:$0xff]  ;;  %v9091_v4 = vpack.c.bf16 %v1891_v1, %v1890_v0  ;;  %v1798_v5 = vld [vmem:[#allocation13 + $0x230] sm:$0xff]  ;;  %v2101_v0 = vld [vmem:[#allocation19 + $0x40] sm:$0xff] }
 0x2fc   : > { %8924 = vmatprep.subr.bf16.mxu1 %v8923_v14  ;;  %8956 = vmatprep.subr.bf16.mxu0 %v8955_v15 }
 0x2fe   : > { %7186 = vmatmul.mubr.f32.vlgmr.msra.gmra.mrb[0].mxu1 %v1220_v21  ;;  %7221 = vmatmul.mubr.f32.vlgmr.msra.gmra.mrb[2].mxu0 %v1220_v21  ;;  %v1703_v21 = vld [vmem:[#allocation16 + $0x1b8] sm:$0xff] }
 0x2ff   : > { %8926 = vmatpush3.bf16.msra.mxu1 %v8923_v14  ;;  %7255 = vmatprep.mubr.f32.mxu1 %v11851_v28  ;;  %v1599_v14 = vld [vmem:[#allocation4 + $0x11] sm:$0xff] }
 0x300   : > { %8958 = vmatpush3.bf16.msra.mxu0 %v8955_v15  ;;  %7290 = vmatprep.mubr.f32.mxu0 %v11851_v28  ;;  %v8939_v28 = vpack.c.bf16 %v1421_v40, %v1420_v39  ;;  %v8995_v15 = vpack.c.bf16 %v1607_v10, %v1606_v9  ;;  %v1615_v39 = vld [vmem:[#allocation13 + $0x1e8] sm:$0xff]  ;;  %v9063_v9 = vpack.c.bf16 %v1799_v6, %v1798_v5  ;;  %v2103_v6 = vld [vmem:[#allocation19 + $0x50] sm:$0xff] }
 0x301   : > { %8928 = vmatprep.subr.bf16.mxu1 %v8927_v22  ;;  %8960 = vmatprep.subr.bf16.mxu0 %v8959_v23  ;;  %v1708_v40 = vld [vmem:[#allocation16 + $0x1e0] sm:$0xff] }
 0x302   : > { %v2006_v5 = vld [vmem:[#allocation22 + $0x58] sm:$0xff] }
 0x303   : > { %8930 = vmatpush3.bf16.msra.mxu1 %v8927_v22  ;;  %v8999_v22 = vpack.c.bf16 %v1609_v18, %v1608_v17  ;;  %v1802_v17 = vld [vmem:[#allocation13 + $0x250] sm:$0xff]  ;;  %v1803_v18 = vld [vmem:[#allocation13 + $0x258] sm:$0xff] }
 0x304   : > { %8962 = vmatpush3.bf16.msra.mxu0 %v8959_v23  ;;  %8932 = vmatprep.subr.bf16.mxu1 %v8931_v31  ;;  %v9031_v23 = vpack.c.bf16 %v1703_v21, %v1702_v19  ;;  %v1896_v19 = vld [vmem:[#allocation16 + $0x250] sm:$0xff]  ;;  %v1897_v21 = vld [vmem:[#allocation16 + $0x258] sm:$0xff] }
 0x305   : > { %8964 = vmatprep.subr.bf16.mxu0 %v8963_v32 }
 0x307   : > { %8934 = vmatpush3.bf16.msra.mxu1 %v8931_v31  ;;  %v9035_v31 = vpack.c.bf16 %v1705_v29, %v1704_v26  ;;  %v1898_v26 = vld [vmem:[#allocation16 + $0x260] sm:$0xff]  ;;  %v1899_v29 = vld [vmem:[#allocation16 + $0x268] sm:$0xff] }
 0x308   : > { %8966 = vmatpush3.bf16.msra.mxu0 %v8963_v32  ;;  %8936 = vmatprep.subr.bf16.mxu1 %v8935_v37  ;;  %v1612_v32 = vld [vmem:[#allocation13 + $0x1d0] sm:$0xff] }
 0x309   : > { %8968 = vmatprep.subr.bf16.mxu0 %v8967_v38  ;;  %v9007_v36 = vpack.c.bf16 %v1613_v33, %v1612_v32  ;;  %v1806_v32 = vld [vmem:[#allocation13 + $0x270] sm:$0xff]  ;;  %v1807_v33 = vld [vmem:[#allocation13 + $0x278] sm:$0xff] }
 0x30b   : > { %8938 = vmatpush3.bf16.msra.mxu1 %v8935_v37  ;;  %v9039_v37 = vpack.c.bf16 %v1707_v35, %v1706_v34  ;;  %v1900_v34 = vld [vmem:[#allocation16 + $0x270] sm:$0xff]  ;;  %v1901_v35 = vld [vmem:[#allocation16 + $0x278] sm:$0xff] }
 0x30c   : > { %8970 = vmatpush3.bf16.msra.mxu0 %v8967_v38  ;;  %8940 = vmatprep.subr.bf16.mxu1 %v8939_v28  ;;  %v1614_v38 = vld [vmem:[#allocation13 + $0x1e0] sm:$0xff] }
 0x30d   : > { %8972 = vmatprep.subr.bf16.mxu0 %v8971_v43  ;;  %v9011_v42 = vpack.c.bf16 %v1615_v39, %v1614_v38  ;;  %v1790_v38 = vld [vmem:[#allocation4 + $0x1a] sm:$0xff] }
 0x30e   : > { %v1995_v39 = vld [vmem:[#allocation22] sm:$0xff] }
 0x30f   : > { %8942 = vmatpush3.bf16.msra.mxu1 %v8939_v28  ;;  %v9043_v28 = vpack.c.bf16 %v1709_v41, %v1708_v40  ;;  %v1996_v40 = vld [vmem:[#allocation22 + $0x8] sm:$0xff]  ;;  %v2093_v41 = vld [vmem:[#allocation19] sm:$0xff] }
 0x310   : > { %8974 = vmatpush3.bf16.msra.mxu0 %v8971_v43  ;;  %8944 = vmatprep.subr.bf16.mxu1 %v8943_v48  ;;  %v1616_v43 = vld [vmem:[#allocation13 + $0x1f0] sm:$0xff] }
 0x311   : > { %8976 = vmatprep.subr.bf16.mxu0 %v8975_v49  ;;  %v9015_v47 = vpack.c.bf16 %v1617_v44, %v1616_v43  ;;  %v1997_v44 = vld [vmem:[#allocation22 + $0x10] sm:$0xff] }
 0x313   : > { %8946 = vmatpush3.bf16.msra.mxu1 %v8943_v48  ;;  %v9047_v48 = vpack.c.bf16 %v1711_v46, %v1710_v45  ;;  %v1998_v45 = vld [vmem:[#allocation22 + $0x18] sm:$0xff]  ;;  %v2095_v46 = vld [vmem:[#allocation19 + $0x10] sm:$0xff] }
 0x314   : > { %8978 = vmatpush3.bf16.msra.mxu0 %v8975_v49  ;;  %8948 = vmatprep.subr.bf16.mxu1 %v8947_v54  ;;  %v1792_v49 = vld [vmem:[#allocation13 + $0x200] sm:$0xff] }
 0x315   : > { %8980 = vmatprep.subr.bf16.mxu0 %v8979_v55  ;;  %v9051_v53 = vpack.c.bf16 %v1793_v50, %v1792_v49  ;;  %v1999_v50 = vld [vmem:[#allocation22 + $0x20] sm:$0xff] }
 0x317   : > { %8950 = vmatpush3.bf16.msra.mxu1 %v8947_v54  ;;  %v9083_v54 = vpack.c.bf16 %v1887_v52, %v1886_v51  ;;  %v2000_v51 = vld [vmem:[#allocation22 + $0x28] sm:$0xff]  ;;  %v2097_v52 = vld [vmem:[#allocation19 + $0x20] sm:$0xff] }
 0x318   : > { %8982 = vmatpush3.bf16.msra.mxu0 %v8979_v55  ;;  %8952 = vmatprep.subr.bf16.mxu1 %v8951_v60  ;;  %v1794_v55 = vld [vmem:[#allocation13 + $0x210] sm:$0xff] }
 0x319   : > { %8984 = vmatprep.subr.bf16.mxu0 %v8983_v61 }
 0x31b   : > { %8954 = vmatpush3.bf16.msra.mxu1 %v8951_v60  ;;  %v9055_v60 = vpack.c.bf16 %v1795_v56, %v1794_v55  ;;  %v2001_v56 = vld [vmem:[#allocation22 + $0x30] sm:$0xff] }
 0x31c   : > { %8986 = vmatpush3.bf16.msra.mxu0 %v8983_v61  ;;  %8988 = vmatprep.subr.bf16.mxu1 %v8987_v2  ;;  %v1796_v61 = vld [vmem:[#allocation13 + $0x220] sm:$0xff] }
 0x31d   : > { %9020 = vmatprep.subr.bf16.mxu0 %v9019_v3 }
 0x31e   : > { %7256 = vmatmul.mubr.f32.vlgmr.msra.gmra.mrb[0].mxu1 %v11848_v27 }
 0x31f   : > { %7291 = vmatmul.mubr.f32.vlgmr.msra.gmra.mrb[2].mxu0 %v11848_v27  ;;  %8990 = vmatpush3.bf16.msra.mxu1 %v8987_v2  ;;  %v1610_v27 = vld [vmem:[#allocation13 + $0x1c0] sm:$0xff] }
 0x320   : > { %7325 = vmatprep.mubr.f32.mxu1 %v1599_v14  ;;  %9022 = vmatpush3.bf16.msra.mxu0 %v9019_v3  ;;  %v9003_v30 = vpack.c.bf16 %v1611_v24, %v1610_v27  ;;  %v1789_v2 = vld [vmem:[#allocation4 + $0x12] sm:$0xff]  ;;  %v9059_v3 = vpack.c.bf16 %v1797_v62, %v1796_v61  ;;  %v1805_v24 = vld [vmem:[#allocation13 + $0x268] sm:$0xff] }
 0x321   : > { %7360 = vmatprep.mubr.f32.mxu0 %v1599_v14  ;;  %8992 = vmatprep.subr.bf16.mxu1 %v8991_v8  ;;  %v1895_v14 = vld [vmem:[#allocation16 + $0x248] sm:$0xff]  ;;  %v1804_v27 = vld [vmem:[#allocation13 + $0x260] sm:$0xff] }
 0x322   : > { %9024 = vmatprep.subr.bf16.mxu0 %v9023_v11  ;;  %v2003_v62 = vld [vmem:[#allocation22 + $0x40] sm:$0xff] }
 0x323   : > { %8994 = vmatpush3.bf16.msra.mxu1 %v8991_v8  ;;  %v1893_v8 = vld [vmem:[#allocation16 + $0x238] sm:$0xff] }
 0x324   : > { %9026 = vmatpush3.bf16.msra.mxu0 %v9023_v11  ;;  %8996 = vmatprep.subr.bf16.mxu1 %v8995_v15  ;;  %v9095_v10 = vpack.c.bf16 %v1893_v8, %v1892_v7  ;;  %v1800_v11 = vld [vmem:[#allocation13 + $0x240] sm:$0xff] }
 0x325   : > { %9028 = vmatprep.subr.bf16.mxu0 %v9027_v16  ;;  %v2104_v8 = vld [vmem:[#allocation19 + $0x58] sm:$0xff] }
 0x327   : > { %8998 = vmatpush3.bf16.msra.mxu1 %v8995_v15  ;;  %v9067_v15 = vpack.c.bf16 %v1801_v12, %v1800_v11  ;;  %v9167_v11 = vpack.c.bf16 %v2104_v8, %v2103_v6  ;;  %v2208_v6 = vld [vmem:[#allocation13 + $0x2c0] sm:$0xff] }
 0x328   : > { %9030 = vmatpush3.bf16.msra.mxu0 %v9027_v16  ;;  %9000 = vmatprep.subr.bf16.mxu1 %v8999_v22  ;;  %v9099_v16 = vpack.c.bf16 %v1895_v14, %v1894_v13  ;;  %v2105_v13 = vld [vmem:[#allocation19 + $0x60] sm:$0xff]  ;;  %v2106_v14 = vld [vmem:[#allocation19 + $0x68] sm:$0xff] }
 0x329   : > { %9032 = vmatprep.subr.bf16.mxu0 %v9031_v23  ;;  %v2308_v8 = vld [vmem:[#allocation16 + $0x2c0] sm:$0xff] }
 0x32b   : > { %9002 = vmatpush3.bf16.msra.mxu1 %v8999_v22  ;;  %v9071_v22 = vpack.c.bf16 %v1803_v18, %v1802_v17  ;;  %v2010_v17 = vld [vmem:[#allocation22 + $0x78] sm:$0xff]  ;;  %v2107_v18 = vld [vmem:[#allocation19 + $0x70] sm:$0xff] }
 0x32c   : > { %9034 = vmatpush3.bf16.msra.mxu0 %v9031_v23  ;;  %9004 = vmatprep.subr.bf16.mxu1 %v9003_v30  ;;  %v9103_v23 = vpack.c.bf16 %v1897_v21, %v1896_v19  ;;  %v2108_v19 = vld [vmem:[#allocation19 + $0x78] sm:$0xff] }
 0x32d   : > { %9036 = vmatprep.subr.bf16.mxu0 %v9035_v31 }
 0x32f   : > { %9006 = vmatpush3.bf16.msra.mxu1 %v9003_v30  ;;  %v9075_v30 = vpack.c.bf16 %v1805_v24, %v1804_v27  ;;  %v2201_v27 = vld [vmem:[#allocation13 + $0x288] sm:$0xff] }
 0x330   : > { %9038 = vmatpush3.bf16.msra.mxu0 %v9035_v31  ;;  %9008 = vmatprep.subr.bf16.mxu1 %v9007_v36  ;;  %v9107_v31 = vpack.c.bf16 %v1899_v29, %v1898_v26  ;;  %v2300_v24 = vld [vmem:[#allocation16 + $0x280] sm:$0xff]  ;;  %v2301_v29 = vld [vmem:[#allocation16 + $0x288] sm:$0xff] }
 0x331   : > { %9040 = vmatprep.subr.bf16.mxu0 %v9039_v37 }
 0x333   : > { %9010 = vmatpush3.bf16.msra.mxu1 %v9007_v36  ;;  %v9079_v36 = vpack.c.bf16 %v1807_v33, %v1806_v32 }
 0x334   : > { %9042 = vmatpush3.bf16.msra.mxu0 %v9039_v37  ;;  %9012 = vmatprep.subr.bf16.mxu1 %v9011_v42  ;;  %v9111_v37 = vpack.c.bf16 %v1901_v35, %v1900_v34 }
 0x335   : > { %9044 = vmatprep.subr.bf16.mxu0 %v9043_v28 }
 0x337   : > { %9014 = vmatpush3.bf16.msra.mxu1 %v9011_v42  ;;  %v9115_v42 = vpack.c.bf16 %v1996_v40, %v1995_v39  ;;  %v6129_v40 = vld [vmem:[#allocation14] ss:$0 sm:$0xff] }
 0x338   : > { %9046 = vmatpush3.bf16.msra.mxu0 %v9043_v28  ;;  %9016 = vmatprep.subr.bf16.mxu1 %v9015_v47  ;;  %v2094_v28 = vld [vmem:[#allocation19 + $0x8] sm:$0xff] }
 0x339   : > { %9048 = vmatprep.subr.bf16.mxu0 %v9047_v48  ;;  %v9147_v43 = vpack.c.bf16 %v2094_v28, %v2093_v41 }
 0x33b   : > { %9018 = vmatpush3.bf16.msra.mxu1 %v9015_v47  ;;  %v9119_v47 = vpack.c.bf16 %v1998_v45, %v1997_v44 }
 0x33c   : > { %9050 = vmatpush3.bf16.msra.mxu0 %v9047_v48  ;;  %9052 = vmatprep.subr.bf16.mxu1 %v9051_v53  ;;  %v2096_v48 = vld [vmem:[#allocation19 + $0x18] sm:$0xff] }
 0x33d   : > { %9084 = vmatprep.subr.bf16.mxu0 %v9083_v54  ;;  %v9151_v49 = vpack.c.bf16 %v2096_v48, %v2095_v46  ;;  %v2202_v48 = vld [vmem:[#allocation13 + $0x290] sm:$0xff] }
 0x33e   : > { %7326 = vmatmul.mubr.f32.vlgmr.msra.gmra.mrb[0].mxu1 %v1600_v59 }
 0x33f   : > { %7361 = vmatmul.mubr.f32.vlgmr.msra.gmra.mrb[2].mxu0 %v1600_v59  ;;  %9054 = vmatpush3.bf16.msra.mxu1 %v9051_v53  ;;  %v9123_v53 = vpack.c.bf16 %v2000_v51, %v1999_v50  ;;  %v9127_v59 = vpack.c.bf16 %v2002_v57, %v2001_v56  ;;  %v2203_v50 = vld [vmem:[#allocation13 + $0x298] sm:$0xff] }
 0x340   : > { %7395 = vmatprep.mubr.f32.mxu1 %v1789_v2  ;;  %9086 = vmatpush3.bf16.msra.mxu0 %v9083_v54  ;;  %v2098_v54 = vld [vmem:[#allocation19 + $0x28] sm:$0xff]  ;;  %v9183_v56 = vpack.c.bf16 %v2203_v50, %v2202_v48  ;;  %v2405_v50 = vld [vmem:[#allocation13 + $0x318] sm:$0xff] }
 0x341   : > { %7430 = vmatprep.mubr.f32.mxu0 %v1789_v2  ;;  %9056 = vmatprep.subr.bf16.mxu1 %v9055_v60  ;;  %v9155_v55 = vpack.c.bf16 %v2098_v54, %v2097_v52  ;;  %v2102_v2 = vld [vmem:[#allocation19 + $0x48] sm:$0xff]  ;;  %v2303_v52 = vld [vmem:[#allocation16 + $0x298] sm:$0xff] }
 0x342   : > { %9088 = vmatprep.subr.bf16.mxu0 %v9087_v63  ;;  %v2302_v51 = vld [vmem:[#allocation16 + $0x290] sm:$0xff] }
 0x343   : > { %9058 = vmatpush3.bf16.msra.mxu1 %v9055_v60  ;;  %v2100_v60 = vld [vmem:[#allocation19 + $0x38] sm:$0xff]  ;;  %v9215_v57 = vpack.c.bf16 %v2303_v52, %v2302_v51  ;;  %v2498_v51 = vld [vmem:[#allocation16 + $0x310] sm:$0xff] }
 0x344   : > { %9090 = vmatpush3.bf16.msra.mxu0 %v9087_v63  ;;  %9060 = vmatprep.subr.bf16.mxu1 %v9059_v3  ;;  %v9159_v61 = vpack.c.bf16 %v2100_v60, %v2099_v58  ;;  %v2004_v63 = vld [vmem:[#allocation22 + $0x48] sm:$0xff]  ;;  %v2204_v58 = vld [vmem:[#allocation13 + $0x2a0] sm:$0xff] }
 0x345   : > { %9092 = vmatprep.subr.bf16.mxu0 %v9091_v4  ;;  %v9131_v1 = vpack.c.bf16 %v2004_v63, %v2003_v62  ;;  %v2304_v60 = vld [vmem:[#allocation16 + $0x2a0] sm:$0xff]  ;;  %v2499_v52 = vld [vmem:[#allocation16 + $0x318] sm:$0xff] }
 0x347   : > { %9062 = vmatpush3.bf16.msra.mxu1 %v9059_v3  ;;  %v9163_v3 = vpack.c.bf16 %v2102_v2, %v2101_v0  ;;  %v2206_v0 = vld [vmem:[#allocation13 + $0x2b0] sm:$0xff] }
 0x348   : > { %9094 = vmatpush3.bf16.msra.mxu0 %v9091_v4  ;;  %9064 = vmatprep.subr.bf16.mxu1 %v9063_v9  ;;  %v2005_v4 = vld [vmem:[#allocation22 + $0x50] sm:$0xff]  ;;  %v2306_v2 = vld [vmem:[#allocation16 + $0x2b0] sm:$0xff] }
 0x349   : > { %9096 = vmatprep.subr.bf16.mxu0 %v9095_v10  ;;  %v9135_v7 = vpack.c.bf16 %v2006_v5, %v2005_v4 }
 0x34b   : > { %9066 = vmatpush3.bf16.msra.mxu1 %v9063_v9  ;;  %v2007_v9 = vld [vmem:[#allocation22 + $0x60] sm:$0xff] }
 0x34c   : > { %9098 = vmatpush3.bf16.msra.mxu0 %v9095_v10  ;;  %9068 = vmatprep.subr.bf16.mxu1 %v9067_v15  ;;  %v2008_v10 = vld [vmem:[#allocation22 + $0x68] sm:$0xff] }
 0x34d   : > { %9100 = vmatprep.subr.bf16.mxu0 %v9099_v16  ;;  %v9139_v12 = vpack.c.bf16 %v2008_v10, %v2007_v9  ;;  %v2309_v10 = vld [vmem:[#allocation16 + $0x2c8] sm:$0xff] }
 0x34f   : > { %9070 = vmatpush3.bf16.msra.mxu1 %v9067_v15  ;;  %v2009_v15 = vld [vmem:[#allocation22 + $0x70] sm:$0xff] }
 0x350   : > { %9102 = vmatpush3.bf16.msra.mxu0 %v9099_v16  ;;  %9072 = vmatprep.subr.bf16.mxu1 %v9071_v22  ;;  %v9171_v16 = vpack.c.bf16 %v2106_v14, %v2105_v13  ;;  %v9143_v21 = vpack.c.bf16 %v2010_v17, %v2009_v15  ;;  %v2211_v13 = vld [vmem:[#allocation13 + $0x2d8] sm:$0xff] }
 0x351   : > { %9104 = vmatprep.subr.bf16.mxu0 %v9103_v23  ;;  %v2310_v14 = vld [vmem:[#allocation16 + $0x2d0] sm:$0xff] }
 0x353   : > { %9074 = vmatpush3.bf16.msra.mxu1 %v9071_v22  ;;  %v9175_v22 = vpack.c.bf16 %v2108_v19, %v2107_v18  ;;  %v2212_v18 = vld [vmem:[#allocation13 + $0x2e0] sm:$0xff]  ;;  %v2213_v19 = vld [vmem:[#allocation13 + $0x2e8] sm:$0xff] }
 0x354   : > { %9106 = vmatpush3.bf16.msra.mxu0 %v9103_v23  ;;  %9076 = vmatprep.subr.bf16.mxu1 %v9075_v30  ;;  %v2200_v23 = vld [vmem:[#allocation13 + $0x280] sm:$0xff] }
 0x355   : > { %9108 = vmatprep.subr.bf16.mxu0 %v9107_v31  ;;  %v9179_v26 = vpack.c.bf16 %v2201_v27, %v2200_v23  ;;  %v2313_v23 = vld [vmem:[#allocation16 + $0x2e8] sm:$0xff] }
 0x357   : > { %9078 = vmatpush3.bf16.msra.mxu1 %v9075_v30  ;;  %v9211_v30 = vpack.c.bf16 %v2301_v29, %v2300_v24  ;;  %v2214_v24 = vld [vmem:[#allocation13 + $0x2f0] sm:$0xff] }
 0x358   : > { %9110 = vmatpush3.bf16.msra.mxu0 %v9107_v31  ;;  %9080 = vmatprep.subr.bf16.mxu1 %v9079_v36  ;;  %v6130_v31 = vld [vmem:[#allocation17] ss:$0 sm:$0xff]  ;;  %v2314_v29 = vld [vmem:[#allocation16 + $0x2f0] sm:$0xff] }
 0x359   : > { %9112 = vmatprep.subr.bf16.mxu0 %v9111_v37 }
 0x35b   : > { %9082 = vmatpush3.bf16.msra.mxu1 %v9079_v36 }
 0x35c   : > { %9114 = vmatpush3.bf16.msra.mxu0 %v9111_v37  ;;  %9116 = vmatprep.subr.bf16.mxu1 %v9115_v42 }
 0x35d   : > { %9148 = vmatprep.subr.bf16.mxu0 %v9147_v43 }
 0x35e   : > { %7396 = vmatmul.mubr.f32.vlgmr.msra.gmra.mrb[0].mxu1 %v1790_v38 }
 0x35f   : > { %7431 = vmatmul.mubr.f32.vlgmr.msra.gmra.mrb[2].mxu0 %v1790_v38  ;;  %9118 = vmatpush3.bf16.msra.mxu1 %v9115_v42 }
 0x360   : > { %9150 = vmatpush3.bf16.msra.mxu0 %v9147_v43  ;;  %9120 = vmatprep.subr.bf16.mxu1 %v9119_v47 }
 0x361   : > { %9152 = vmatprep.subr.bf16.mxu0 %v9151_v49 }
 0x363   : > { %9122 = vmatpush3.bf16.msra.mxu1 %v9119_v47 }
 0x364   : > { %9154 = vmatpush3.bf16.msra.mxu0 %v9151_v49  ;;  %9124 = vmatprep.subr.bf16.mxu1 %v9123_v53 }
 0x365   : > { %9156 = vmatprep.subr.bf16.mxu0 %v9155_v55 }
 0x367   : > { %9126 = vmatpush3.bf16.msra.mxu1 %v9123_v53 }
 0x368   : > { %9158 = vmatpush3.bf16.msra.mxu0 %v9155_v55  ;;  %9128 = vmatprep.subr.bf16.mxu1 %v9127_v59 }
 0x369   : > { %9160 = vmatprep.subr.bf16.mxu0 %v9159_v61 }
 0x36b   : > { %9130 = vmatpush3.bf16.msra.mxu1 %v9127_v59  ;;  %v2205_v59 = vld [vmem:[#allocation13 + $0x2a8] sm:$0xff] }
 0x36c   : > { %9162 = vmatpush3.bf16.msra.mxu0 %v9159_v61  ;;  %9132 = vmatprep.subr.bf16.mxu1 %v9131_v1  ;;  %v2305_v61 = vld [vmem:[#allocation16 + $0x2a8] sm:$0xff]  ;;  %v9187_v62 = vpack.c.bf16 %v2205_v59, %v2204_v58  ;;  %v2500_v59 = vld [vmem:[#allocation16 + $0x320] sm:$0xff] }
 0x36d   : > { %9164 = vmatprep.subr.bf16.mxu0 %v9163_v3  ;;  %v9219_v63 = vpack.c.bf16 %v2305_v61, %v2304_v60  ;;  %v2407_v58 = vld [vmem:[#allocation13 + $0x328] sm:$0xff] }
 0x36e   : > { %v2501_v60 = vld [vmem:[#allocation16 + $0x328] sm:$0xff] }
 0x36f   : > { %9134 = vmatpush3.bf16.msra.mxu1 %v9131_v1  ;;  %v2207_v1 = vld [vmem:[#allocation13 + $0x2b8] sm:$0xff] }
 0x370   : > { %9166 = vmatpush3.bf16.msra.mxu0 %v9163_v3  ;;  %9136 = vmatprep.subr.bf16.mxu1 %v9135_v7  ;;  %v2307_v3 = vld [vmem:[#allocation16 + $0x2b8] sm:$0xff]  ;;  %v9191_v4 = vpack.c.bf16 %v2207_v1, %v2206_v0  ;;  %v2408_v0 = vld [vmem:[#allocation13 + $0x330] sm:$0xff] }
 0x371   : > { %9168 = vmatprep.subr.bf16.mxu0 %v9167_v11  ;;  %v9223_v5 = vpack.c.bf16 %v2307_v3, %v2306_v2  ;;  %v2409_v1 = vld [vmem:[#allocation13 + $0x338] sm:$0xff] }
 0x372   : > { %v2502_v2 = vld [vmem:[#allocation16 + $0x330] sm:$0xff]  ;;  %v2503_v3 = vld [vmem:[#allocation16 + $0x338] sm:$0xff] }
 0x373   : > { %9138 = vmatpush3.bf16.msra.mxu1 %v9135_v7  ;;  %v2209_v7 = vld [vmem:[#allocation13 + $0x2c8] sm:$0xff] }
 0x374   : > { %9170 = vmatpush3.bf16.msra.mxu0 %v9167_v11  ;;  %9140 = vmatprep.subr.bf16.mxu1 %v9139_v12  ;;  %v9195_v9 = vpack.c.bf16 %v2209_v7, %v2208_v6  ;;  %v9227_v11 = vpack.c.bf16 %v2309_v10, %v2308_v8  ;;  %v2410_v6 = vld [vmem:[#allocation13 + $0x340] sm:$0xff]  ;;  %v2411_v7 = vld [vmem:[#allocation13 + $0x348] sm:$0xff] }
 0x375   : > { %9172 = vmatprep.subr.bf16.mxu0 %v9171_v16  ;;  %v2504_v8 = vld [vmem:[#allocation16 + $0x340] sm:$0xff]  ;;  %v9259_v10 = vpack.c.bf16 %v2411_v7, %v2410_v6 }
 0x376   : > { %v2604_v7 = vld [vmem:[#allocation13 + $0x3e0] sm:$0xff] }
 0x377   : > { %9142 = vmatpush3.bf16.msra.mxu1 %v9139_v12  ;;  %v2210_v12 = vld [vmem:[#allocation13 + $0x2d0] sm:$0xff] }
 0x378   : > { %9174 = vmatpush3.bf16.msra.mxu0 %v9171_v16  ;;  %9144 = vmatprep.subr.bf16.mxu1 %v9143_v21  ;;  %v9199_v15 = vpack.c.bf16 %v2211_v13, %v2210_v12  ;;  %v2311_v16 = vld [vmem:[#allocation16 + $0x2d8] sm:$0xff]  ;;  %v2412_v12 = vld [vmem:[#allocation13 + $0x350] sm:$0xff] }
 0x379   : > { %9176 = vmatprep.subr.bf16.mxu0 %v9175_v22  ;;  %v9231_v17 = vpack.c.bf16 %v2311_v16, %v2310_v14  ;;  %v2413_v13 = vld [vmem:[#allocation13 + $0x358] sm:$0xff] }
 0x37a   : > { %v2506_v14 = vld [vmem:[#allocation16 + $0x350] sm:$0xff]  ;;  %v9263_v16 = vpack.c.bf16 %v2413_v13, %v2412_v12 }
 0x37b   : > { %9146 = vmatpush3.bf16.msra.mxu1 %v9143_v21  ;;  %v2312_v21 = vld [vmem:[#allocation16 + $0x2e0] sm:$0xff]  ;;  %v2606_v13 = vld [vmem:[#allocation13 + $0x3f0] sm:$0xff] }
 0x37c   : > { %9178 = vmatpush3.bf16.msra.mxu0 %v9175_v22  ;;  %9180 = vmatprep.subr.bf16.mxu1 %v9179_v26  ;;  %v9203_v22 = vpack.c.bf16 %v2213_v19, %v2212_v18  ;;  %v9235_v27 = vpack.c.bf16 %v2313_v23, %v2312_v21  ;;  %v2414_v18 = vld [vmem:[#allocation13 + $0x360] sm:$0xff]  ;;  %v2415_v19 = vld [vmem:[#allocation13 + $0x368] sm:$0xff] }
 0x37d   : > { %9212 = vmatprep.subr.bf16.mxu0 %v9211_v30  ;;  %v2508_v21 = vld [vmem:[#allocation16 + $0x360] sm:$0xff]  ;;  %v9267_v23 = vpack.c.bf16 %v2415_v19, %v2414_v18 }
 0x37e   : > { %v2782_v19 = vld [vmem:[#allocation13 + $0x400] sm:$0xff] }
 0x431   : > { %v7397_v32 = vpop.f32.mrb[0].mxu1 }
 0x432   : > { %v7432_v33 = vpop.f32.mrb[2].mxu0  ;;  %v1874_v34 = vpop.f32.mrb[1].mxu1  ;;  %v10331_v41 = vadd.f32 %v7397_v32, %v6129_v40 }
 0x433   : > { %v10333_v35 = vadd.f32 %v7432_v33, %v6130_v31  ;;  %v1968_v36 = vpop.f32.mrb[3].mxu0  ;;  %v10332_v42 = vadd.f32 %v6129_v40, %v1874_v34  ;;  %v2402_v33 = vld [vmem:[#allocation13 + $0x300] sm:$0xff]  ;;  %v2403_v34 = vld [vmem:[#allocation13 + $0x308] sm:$0xff] }
 0x434   : > { %v10334_v37 = vadd.f32 %v6130_v31, %v1968_v36  ;;  %v2315_v31 = vld [vmem:[#allocation16 + $0x2f8] sm:$0xff]  ;;  %v9243_v36 = vpack.c.bf16 %v2403_v34, %v2402_v33  ;;  %v2593_v34 = vld [vmem:[#allocation13 + $0x388] sm:$0xff] }
 0x435   : > { %v6132_v38 = vmul.f32 -1.442695, %v10333_v35  ;;  %v9239_v32 = vpack.c.bf16 %v2315_v31, %v2314_v29  ;;  %v2496_v35 = vld [vmem:[#allocation16 + $0x300] sm:$0xff]  ;;  %v2510_v29 = vld [vmem:[#allocation16 + $0x370] sm:$0xff] }
 0x436   : > { %v6131_v39 = vmul.f32 -1.442695, %v10334_v37  ;;  %v2497_v37 = vld [vmem:[#allocation16 + $0x308] sm:$0xff]  ;;  %v2592_v33 = vld [vmem:[#allocation13 + $0x380] sm:$0xff] }
 0x437   : > { %10627 = vpow2.f32 %v6132_v38  ;;  %v9275_v38 = vpack.c.bf16 %v2497_v37, %v2496_v35  ;;  %v2686_v35 = vld [vmem:[#allocation16 + $0x380] sm:$0xff]  ;;  %v9307_v37 = vpack.c.bf16 %v2593_v34, %v2592_v33 }
 0x438   : > { %10629 = vpow2.f32 %v6131_v39  ;;  %v6134_v39 = vld [vmem:[#allocation20] ss:$0 sm:$0xff]  ;;  %v2786_v33 = vld [vmem:[#allocation13 + $0x420] sm:$0xff] }
 0x439   : > { %10631 = vtanh.f32 %v10331_v41  ;;  %v2787_v34 = vld [vmem:[#allocation13 + $0x428] sm:$0xff] }
 0x43a   : > { %10633 = vtanh.f32 %v10332_v42 }
 0x441   : > { %v10628_v28 = vpop.eup %10627 }
 0x442   : > { %v10630_v43 = vpop.eup %10629  ;;  %v1988_v44 = vadd.f32 1.0, %v10628_v28 }
 0x443   : > { %v1987_v45 = vadd.f32 1.0, %v10630_v43  ;;  %v10632_v46 = vpop.eup %10631  ;;  %v10675_v43 = vld [vmem:[#allocation4 + $0x18] sm:$0xff] }
 0x444   : > { %10635 = vrcp.f32 %v1988_v44  ;;  %v10634_v47 = vpop.eup %10633 }
 0x445   : > { %10637 = vrcp.f32 %v1987_v45  ;;  %v10676_v45 = vld [vmem:[#allocation4 + $0x10] sm:$0xff] }
 0x44e   : > { %v10636_v49 = vpop.eup %10635 }
 0x44f   : > { %v10638_v53 = vpop.eup %10637  ;;  %v1994_v54 = vmul.f32 %v10636_v49, %v10632_v46  ;;  %v2404_v49 = vld [vmem:[#allocation13 + $0x310] sm:$0xff] }
 0x450   : > { %v1993_v55 = vmul.f32 %v10638_v53, %v10634_v47 }
 0x452   : > { %7465 = vmatprep.mubr.f32.mxu1 %v1993_v55  ;;  %7500 = vmatprep.mubr.f32.mxu0 %v1993_v55  ;;  %v2406_v55 = vld [vmem:[#allocation13 + $0x320] sm:$0xff] }
 0x453   : > { %7466 = vmatmul.mubr.f32.vlgmr.msra.gmra.mrb[2].mxu1 %v1994_v54  ;;  %7501 = vmatmul.mubr.f32.vlgmr.msra.gmra.mrb[4].mxu0 %v1994_v54 }
 0x454   : > { %9182 = vmatpush3.bf16.msra.mxu1 %v9179_v26  ;;  %9214 = vmatpush3.bf16.msra.mxu0 %v9211_v30  ;;  %v2215_v26 = vld [vmem:[#allocation13 + $0x2f8] sm:$0xff] }
 0x455   : > { %9184 = vmatprep.subr.bf16.mxu1 %v9183_v56  ;;  %9216 = vmatprep.subr.bf16.mxu0 %v9215_v57  ;;  %v9207_v30 = vpack.c.bf16 %v2215_v26, %v2214_v24  ;;  %v2416_v24 = vld [vmem:[#allocation13 + $0x370] sm:$0xff]  ;;  %v2417_v26 = vld [vmem:[#allocation13 + $0x378] sm:$0xff] }
 0x456   : > { %v9271_v31 = vpack.c.bf16 %v2417_v26, %v2416_v24  ;;  %v2784_v26 = vld [vmem:[#allocation13 + $0x410] sm:$0xff] }
 0x458   : > { %9186 = vmatpush3.bf16.msra.mxu1 %v9183_v56  ;;  %9218 = vmatpush3.bf16.msra.mxu0 %v9215_v57  ;;  %v9247_v56 = vpack.c.bf16 %v2405_v50, %v2404_v49  ;;  %v9279_v57 = vpack.c.bf16 %v2499_v52, %v2498_v51  ;;  %v2690_v49 = vld [vmem:[#allocation16 + $0x3a0] sm:$0xff]  ;;  %v2691_v50 = vld [vmem:[#allocation16 + $0x3a8] sm:$0xff] }
 0x459   : > { %9188 = vmatprep.subr.bf16.mxu1 %v9187_v62  ;;  %9220 = vmatprep.subr.bf16.mxu0 %v9219_v63  ;;  %v9347_v52 = vpack.c.bf16 %v2691_v50, %v2690_v49  ;;  %v2884_v49 = vld [vmem:[#allocation16 + $0x440] sm:$0xff]  ;;  %v2885_v50 = vld [vmem:[#allocation16 + $0x448] sm:$0xff] }
 0x45c   : > { %9190 = vmatpush3.bf16.msra.mxu1 %v9187_v62  ;;  %9222 = vmatpush3.bf16.msra.mxu0 %v9219_v63  ;;  %v9251_v62 = vpack.c.bf16 %v2407_v58, %v2406_v55  ;;  %v9283_v63 = vpack.c.bf16 %v2501_v60, %v2500_v59  ;;  %v2599_v55 = vld [vmem:[#allocation13 + $0x3b8] sm:$0xff]  ;;  %v2600_v60 = vld [vmem:[#allocation13 + $0x3c0] sm:$0xff] }
 0x45d   : > { %9192 = vmatprep.subr.bf16.mxu1 %v9191_v4  ;;  %9224 = vmatprep.subr.bf16.mxu0 %v9223_v5 }
 0x460   : > { %9194 = vmatpush3.bf16.msra.mxu1 %v9191_v4  ;;  %9226 = vmatpush3.bf16.msra.mxu0 %v9223_v5  ;;  %v9255_v4 = vpack.c.bf16 %v2409_v1, %v2408_v0  ;;  %v9287_v5 = vpack.c.bf16 %v2503_v3, %v2502_v2  ;;  %v2602_v1 = vld [vmem:[#allocation13 + $0x3d0] sm:$0xff]  ;;  %v2603_v2 = vld [vmem:[#allocation13 + $0x3d8] sm:$0xff] }
 0x461   : > { %9196 = vmatprep.subr.bf16.mxu1 %v9195_v9  ;;  %9228 = vmatprep.subr.bf16.mxu0 %v9227_v11  ;;  %v2696_v3 = vld [vmem:[#allocation16 + $0x3d0] sm:$0xff] }
 0x464   : > { %9198 = vmatpush3.bf16.msra.mxu1 %v9195_v9  ;;  %9230 = vmatpush3.bf16.msra.mxu0 %v9227_v11  ;;  %v2505_v9 = vld [vmem:[#allocation16 + $0x348] sm:$0xff] }
 0x465   : > { %9200 = vmatprep.subr.bf16.mxu1 %v9199_v15  ;;  %9232 = vmatprep.subr.bf16.mxu0 %v9231_v17  ;;  %v9291_v11 = vpack.c.bf16 %v2505_v9, %v2504_v8  ;;  %v2605_v8 = vld [vmem:[#allocation13 + $0x3e8] sm:$0xff] }
 0x466   : > { %v2698_v9 = vld [vmem:[#allocation16 + $0x3e0] sm:$0xff] }
 0x468   : > { %9202 = vmatpush3.bf16.msra.mxu1 %v9199_v15  ;;  %9234 = vmatpush3.bf16.msra.mxu0 %v9231_v17  ;;  %v2507_v15 = vld [vmem:[#allocation16 + $0x358] sm:$0xff] }
 0x469   : > { %9204 = vmatprep.subr.bf16.mxu1 %v9203_v22  ;;  %9236 = vmatprep.subr.bf16.mxu0 %v9235_v27  ;;  %v9295_v17 = vpack.c.bf16 %v2507_v15, %v2506_v14  ;;  %v2607_v14 = vld [vmem:[#allocation13 + $0x3f8] sm:$0xff] }
 0x46a   : > { %v2700_v15 = vld [vmem:[#allocation16 + $0x3f0] sm:$0xff] }
 0x46c   : > { %9206 = vmatpush3.bf16.msra.mxu1 %v9203_v22  ;;  %9238 = vmatpush3.bf16.msra.mxu0 %v9235_v27  ;;  %v2509_v22 = vld [vmem:[#allocation16 + $0x368] sm:$0xff] }
 0x46d   : > { %9208 = vmatprep.subr.bf16.mxu1 %v9207_v30  ;;  %9240 = vmatprep.subr.bf16.mxu0 %v9239_v32  ;;  %v9299_v27 = vpack.c.bf16 %v2509_v22, %v2508_v21  ;;  %v2783_v21 = vld [vmem:[#allocation13 + $0x408] sm:$0xff] }
 0x46e   : > { %v2876_v22 = vld [vmem:[#allocation16 + $0x400] sm:$0xff] }
 0x470   : > { %9210 = vmatpush3.bf16.msra.mxu1 %v9207_v30  ;;  %9242 = vmatpush3.bf16.msra.mxu0 %v9239_v32  ;;  %v2511_v30 = vld [vmem:[#allocation16 + $0x378] sm:$0xff] }
 0x471   : > { %9244 = vmatprep.subr.bf16.mxu1 %v9243_v36  ;;  %9276 = vmatprep.subr.bf16.mxu0 %v9275_v38  ;;  %v9303_v32 = vpack.c.bf16 %v2511_v30, %v2510_v29  ;;  %v2785_v29 = vld [vmem:[#allocation13 + $0x418] sm:$0xff] }
 0x472   : > { %v2878_v30 = vld [vmem:[#allocation16 + $0x410] sm:$0xff] }
 0x526   : > { %v7502_v40 = vpop.f32.mrb[4].mxu0 }
 0x527   : > { %v2188_v41 = vadd.f32 %v7502_v40, %v6134_v39  ;;  %v2182_v42 = vpop.f32.mrb[5].mxu0  ;;  %v2595_v40 = vld [vmem:[#allocation13 + $0x398] sm:$0xff] }
 0x528   : > { %v2183_v28 = vadd.f32 %v6134_v39, %v2182_v42  ;;  %v2594_v39 = vld [vmem:[#allocation13 + $0x390] sm:$0xff]  ;;  %v2689_v42 = vld [vmem:[#allocation16 + $0x398] sm:$0xff] }
 0x529   : > { %v2192_v44 = vadd.f32 %v10675_v43, %v2188_v41  ;;  %v2688_v41 = vld [vmem:[#allocation16 + $0x390] sm:$0xff]  ;;  %v9311_v43 = vpack.c.bf16 %v2595_v40, %v2594_v39  ;;  %v9379_v39 = vpack.c.bf16 %v2787_v34, %v2786_v33 }
 0x52a   : > { %v2191_v46 = vadd.f32 %v10676_v45, %v2183_v28  ;;  %v2596_v45 = vld [vmem:[#allocation13 + $0x3a0] sm:$0xff] }
 0x52b   : > { %v11860_v47 = vmul.f32 %v2192_v44, %v11845_v25  ;;  %v9343_v44 = vpack.c.bf16 %v2689_v42, %v2688_v41  ;;  %v2788_v41 = vld [vmem:[#allocation13 + $0x430] sm:$0xff]  ;;  %v2789_v42 = vld [vmem:[#allocation13 + $0x438] sm:$0xff] }
 0x52c   : > { %v11863_v48 = vmul.f32 %v2191_v46, %v11843_v20  ;;  %v2597_v46 = vld [vmem:[#allocation13 + $0x3a8] sm:$0xff] }
 0x52d   : > { %2196 = vst [vmem:[#allocation4 + $0x18] sm:$0xff] %v11860_v47  ;;  %v9315_v51 = vpack.c.bf16 %v2597_v46, %v2596_v45  ;;  %v2791_v46 = vld [vmem:[#allocation13 + $0x448] sm:$0xff] }
 0x52e   : > { %2195 = vst [vmem:[#allocation4 + $0x10] sm:$0xff] %v11863_v48 }
 0x535   : > { %v2197_v53 = vld [vmem:[#allocation4 + $0xc] sm:$0xff]  ;;  %v11867_v54 = vld [vmem:[#allocation4 + $0x14] sm:$0xff] }
 0x536   : > { %7535 = vmatprep.mubr.f32.mxu1 %v2197_v53  ;;  %7570 = vmatprep.mubr.f32.mxu0 %v2197_v53  ;;  %v2399_v61 = vld [vmem:[#allocation4 + $0xe] sm:$0xff]  ;;  %v2400_v28 = vld [vmem:[#allocation4 + $0x16] sm:$0xff]  ;;  %v2598_v53 = vld [vmem:[#allocation13 + $0x3b0] sm:$0xff] }
 0x537   : > { %7536 = vmatmul.mubr.f32.vlgmr.msra.gmra.mrb[4].mxu1 %v11867_v54  ;;  %7571 = vmatmul.mubr.f32.vlgmr.msra.gmra.mrb[6].mxu0 %v11867_v54  ;;  %v9319_v58 = vpack.c.bf16 %v2599_v55, %v2598_v53  ;;  %v2792_v53 = vld [vmem:[#allocation13 + $0x450] sm:$0xff]  ;;  %v2793_v55 = vld [vmem:[#allocation13 + $0x458] sm:$0xff] }
 0x538   : > { %9246 = vmatpush3.bf16.msra.mxu1 %v9243_v36  ;;  %9278 = vmatpush3.bf16.msra.mxu0 %v9275_v38  ;;  %v2687_v36 = vld [vmem:[#allocation16 + $0x388] sm:$0xff] }
 0x539   : > { %7605 = vmatprep.mubr.f32.mxu1 %v2399_v61  ;;  %7640 = vmatprep.mubr.f32.mxu0 %v2399_v61  ;;  %v9339_v38 = vpack.c.bf16 %v2687_v36, %v2686_v35  ;;  %v2601_v61 = vld [vmem:[#allocation13 + $0x3c8] sm:$0xff] }
 0x53a   : > { %9248 = vmatprep.subr.bf16.mxu1 %v9247_v56  ;;  %9280 = vmatprep.subr.bf16.mxu0 %v9279_v57  ;;  %v2880_v36 = vld [vmem:[#allocation16 + $0x420] sm:$0xff] }
 0x53c   : > { %9250 = vmatpush3.bf16.msra.mxu1 %v9247_v56  ;;  %9282 = vmatpush3.bf16.msra.mxu0 %v9279_v57  ;;  %v2692_v56 = vld [vmem:[#allocation16 + $0x3b0] sm:$0xff]  ;;  %v2693_v57 = vld [vmem:[#allocation16 + $0x3b8] sm:$0xff] }
 0x53d   : > { %9252 = vmatprep.subr.bf16.mxu1 %v9251_v62  ;;  %9284 = vmatprep.subr.bf16.mxu0 %v9283_v63  ;;  %v9351_v59 = vpack.c.bf16 %v2693_v57, %v2692_v56  ;;  %v2886_v56 = vld [vmem:[#allocation16 + $0x450] sm:$0xff]  ;;  %v2887_v57 = vld [vmem:[#allocation16 + $0x458] sm:$0xff] }
 0x540   : > { %9254 = vmatpush3.bf16.msra.mxu1 %v9251_v62  ;;  %9286 = vmatpush3.bf16.msra.mxu0 %v9283_v63  ;;  %v2694_v62 = vld [vmem:[#allocation16 + $0x3c0] sm:$0xff]  ;;  %v2695_v63 = vld [vmem:[#allocation16 + $0x3c8] sm:$0xff] }
 0x541   : > { %9256 = vmatprep.subr.bf16.mxu1 %v9255_v4  ;;  %9288 = vmatprep.subr.bf16.mxu0 %v9287_v5  ;;  %v9355_v0 = vpack.c.bf16 %v2695_v63, %v2694_v62  ;;  %v2888_v62 = vld [vmem:[#allocation16 + $0x460] sm:$0xff]  ;;  %v2889_v63 = vld [vmem:[#allocation16 + $0x468] sm:$0xff] }
 0x544   : > { %9258 = vmatpush3.bf16.msra.mxu1 %v9255_v4  ;;  %9290 = vmatpush3.bf16.msra.mxu0 %v9287_v5  ;;  %v2697_v4 = vld [vmem:[#allocation16 + $0x3d8] sm:$0xff]  ;;  %v9327_v5 = vpack.c.bf16 %v2603_v2, %v2602_v1  ;;  %v2796_v1 = vld [vmem:[#allocation13 + $0x470] sm:$0xff] }
 0x545   : > { %9260 = vmatprep.subr.bf16.mxu1 %v9259_v10  ;;  %9292 = vmatprep.subr.bf16.mxu0 %v9291_v11  ;;  %v9359_v6 = vpack.c.bf16 %v2697_v4, %v2696_v3  ;;  %v2797_v2 = vld [vmem:[#allocation13 + $0x478] sm:$0xff] }
 0x546   : > { %v2890_v3 = vld [vmem:[#allocation16 + $0x470] sm:$0xff]  ;;  %v2891_v4 = vld [vmem:[#allocation16 + $0x478] sm:$0xff] }
 0x548   : > { %9262 = vmatpush3.bf16.msra.mxu1 %v9259_v10  ;;  %9294 = vmatpush3.bf16.msra.mxu0 %v9291_v11  ;;  %v2699_v10 = vld [vmem:[#allocation16 + $0x3e8] sm:$0xff]  ;;  %v9331_v11 = vpack.c.bf16 %v2605_v8, %v2604_v7  ;;  %v2972_v7 = vld [vmem:[#allocation13 + $0x480] sm:$0xff] }
 0x549   : > { %9264 = vmatprep.subr.bf16.mxu1 %v9263_v16  ;;  %9296 = vmatprep.subr.bf16.mxu0 %v9295_v17  ;;  %v9363_v12 = vpack.c.bf16 %v2699_v10, %v2698_v9  ;;  %v2973_v8 = vld [vmem:[#allocation13 + $0x488] sm:$0xff] }
 0x54a   : > { %v3066_v9 = vld [vmem:[#allocation16 + $0x480] sm:$0xff]  ;;  %v3067_v10 = vld [vmem:[#allocation16 + $0x488] sm:$0xff] }
 0x54c   : > { %9266 = vmatpush3.bf16.msra.mxu1 %v9263_v16  ;;  %9298 = vmatpush3.bf16.msra.mxu0 %v9295_v17  ;;  %v2701_v16 = vld [vmem:[#allocation16 + $0x3f8] sm:$0xff]  ;;  %v9335_v17 = vpack.c.bf16 %v2607_v14, %v2606_v13  ;;  %v2974_v13 = vld [vmem:[#allocation13 + $0x490] sm:$0xff] }
 0x54d   : > { %9268 = vmatprep.subr.bf16.mxu1 %v9267_v23  ;;  %9300 = vmatprep.subr.bf16.mxu0 %v9299_v27  ;;  %v9367_v18 = vpack.c.bf16 %v2701_v16, %v2700_v15  ;;  %v2975_v14 = vld [vmem:[#allocation13 + $0x498] sm:$0xff] }
 0x54e   : > { %v3068_v15 = vld [vmem:[#allocation16 + $0x490] sm:$0xff]  ;;  %v3069_v16 = vld [vmem:[#allocation16 + $0x498] sm:$0xff] }
 0x550   : > { %9270 = vmatpush3.bf16.msra.mxu1 %v9267_v23  ;;  %9302 = vmatpush3.bf16.msra.mxu0 %v9299_v27  ;;  %v2877_v23 = vld [vmem:[#allocation16 + $0x408] sm:$0xff]  ;;  %v9371_v27 = vpack.c.bf16 %v2783_v21, %v2782_v19  ;;  %v2976_v19 = vld [vmem:[#allocation13 + $0x4a0] sm:$0xff] }
 0x551   : > { %9272 = vmatprep.subr.bf16.mxu1 %v9271_v31  ;;  %9304 = vmatprep.subr.bf16.mxu0 %v9303_v32  ;;  %v9403_v24 = vpack.c.bf16 %v2877_v23, %v2876_v22  ;;  %v2977_v21 = vld [vmem:[#allocation13 + $0x4a8] sm:$0xff]  ;;  %v9471_v22 = vpack.c.bf16 %v3069_v16, %v3068_v15  ;;  %v3284_v15 = vld [vmem:[#allocation19 + $0xb0] sm:$0xff] }
 0x552   : > { %v3070_v23 = vld [vmem:[#allocation16 + $0x4a0] sm:$0xff] }
 0x554   : > { %9274 = vmatpush3.bf16.msra.mxu1 %v9271_v31  ;;  %9306 = vmatpush3.bf16.msra.mxu0 %v9303_v32  ;;  %v2879_v31 = vld [vmem:[#allocation16 + $0x418] sm:$0xff]  ;;  %v9375_v32 = vpack.c.bf16 %v2785_v29, %v2784_v26  ;;  %v2978_v29 = vld [vmem:[#allocation13 + $0x4b0] sm:$0xff] }
 0x555   : > { %9308 = vmatprep.subr.bf16.mxu1 %v9307_v37  ;;  %9340 = vmatprep.subr.bf16.mxu0 %v9339_v38  ;;  %v9407_v35 = vpack.c.bf16 %v2879_v31, %v2878_v30  ;;  %v2979_v30 = vld [vmem:[#allocation13 + $0x4b8] sm:$0xff] }
 0x556   : > { %v3072_v31 = vld [vmem:[#allocation16 + $0x4b0] sm:$0xff]  ;;  %v9447_v33 = vpack.c.bf16 %v2979_v30, %v2978_v29  ;;  %v3187_v29 = vld [vmem:[#allocation22 + $0xd8] sm:$0xff] }
 0x557   : > { %7606 = vmatmul.mubr.f32.vlgmr.msra.gmra.mrb[4].mxu1 %v2400_v28  ;;  %7641 = vmatmul.mubr.f32.vlgmr.msra.gmra.mrb[6].mxu0 %v2400_v28  ;;  %v2882_v28 = vld [vmem:[#allocation16 + $0x430] sm:$0xff] }
 0x558   : > { %9310 = vmatpush3.bf16.msra.mxu1 %v9307_v37  ;;  %7675 = vmatprep.mubr.f32.mxu1 %v11863_v48  ;;  %v2881_v37 = vld [vmem:[#allocation16 + $0x428] sm:$0xff]  ;;  %v3288_v30 = vld [vmem:[#allocation19 + $0xd0] sm:$0xff] }
 0x559   : > { %9342 = vmatpush3.bf16.msra.mxu0 %v9339_v38  ;;  %7710 = vmatprep.mubr.f32.mxu0 %v11863_v48  ;;  %v9323_v48 = vpack.c.bf16 %v2601_v61, %v2600_v60  ;;  %v2779_v38 = vld [vmem:[#allocation4 + $0x12] sm:$0xff]  ;;  %v9411_v40 = vpack.c.bf16 %v2881_v37, %v2880_v36  ;;  %v2795_v61 = vld [vmem:[#allocation13 + $0x468] sm:$0xff] }
 0x55a   : > { %9312 = vmatprep.subr.bf16.mxu1 %v9311_v43  ;;  %9344 = vmatprep.subr.bf16.mxu0 %v9343_v44  ;;  %v2794_v60 = vld [vmem:[#allocation13 + $0x460] sm:$0xff]  ;;  %v2981_v36 = vld [vmem:[#allocation13 + $0x4c8] sm:$0xff] }
 0x55b   : > { %v3074_v37 = vld [vmem:[#allocation16 + $0x4c0] sm:$0xff] }
 0x55c   : > { %9314 = vmatpush3.bf16.msra.mxu1 %v9311_v43  ;;  %v2883_v43 = vld [vmem:[#allocation16 + $0x438] sm:$0xff] }
 0x55d   : > { %9346 = vmatpush3.bf16.msra.mxu0 %v9343_v44  ;;  %9316 = vmatprep.subr.bf16.mxu1 %v9315_v51  ;;  %v9383_v44 = vpack.c.bf16 %v2789_v42, %v2788_v41  ;;  %v9415_v45 = vpack.c.bf16 %v2883_v43, %v2882_v28  ;;  %v2983_v41 = vld [vmem:[#allocation13 + $0x4d8] sm:$0xff] }
 0x55e   : > { %9348 = vmatprep.subr.bf16.mxu0 %v9347_v52  ;;  %v3076_v42 = vld [vmem:[#allocation16 + $0x4d0] sm:$0xff]  ;;  %v3077_v28 = vld [vmem:[#allocation16 + $0x4d8] sm:$0xff] }
 0x560   : > { %9318 = vmatpush3.bf16.msra.mxu1 %v9315_v51 }
 0x561   : > { %9350 = vmatpush3.bf16.msra.mxu0 %v9347_v52  ;;  %9320 = vmatprep.subr.bf16.mxu1 %v9319_v58  ;;  %v9419_v52 = vpack.c.bf16 %v2885_v50, %v2884_v49  ;;  %v3079_v49 = vld [vmem:[#allocation16 + $0x4e8] sm:$0xff] }
 0x562   : > { %9352 = vmatprep.subr.bf16.mxu0 %v9351_v59 }
 0x564   : > { %9322 = vmatpush3.bf16.msra.mxu1 %v9319_v58  ;;  %v9391_v58 = vpack.c.bf16 %v2793_v55, %v2792_v53  ;;  %v2987_v53 = vld [vmem:[#allocation13 + $0x4f8] sm:$0xff] }
 0x565   : > { %9354 = vmatpush3.bf16.msra.mxu0 %v9351_v59  ;;  %9324 = vmatprep.subr.bf16.mxu1 %v9323_v48  ;;  %v9423_v59 = vpack.c.bf16 %v2887_v57, %v2886_v56  ;;  %v3080_v55 = vld [vmem:[#allocation16 + $0x4f0] sm:$0xff]  ;;  %v3081_v56 = vld [vmem:[#allocation16 + $0x4f8] sm:$0xff] }
 0x566   : > { %9356 = vmatprep.subr.bf16.mxu0 %v9355_v0 }
 0x568   : > { %9326 = vmatpush3.bf16.msra.mxu1 %v9323_v48  ;;  %v9395_v48 = vpack.c.bf16 %v2795_v61, %v2794_v60  ;;  %v3176_v60 = vld [vmem:[#allocation22 + $0x80] sm:$0xff]  ;;  %v3177_v61 = vld [vmem:[#allocation22 + $0x88] sm:$0xff] }
 0x569   : > { %9358 = vmatpush3.bf16.msra.mxu0 %v9355_v0  ;;  %9328 = vmatprep.subr.bf16.mxu1 %v9327_v5  ;;  %v9427_v0 = vpack.c.bf16 %v2889_v63, %v2888_v62  ;;  %v3278_v62 = vld [vmem:[#allocation19 + $0x80] sm:$0xff]  ;;  %v9499_v63 = vpack.c.bf16 %v3177_v61, %v3176_v60  ;;  %v6135_v61 = vld [vmem:[#allocation14 + $0x1] ss:$0 sm:$0xff] }
 0x56a   : > { %9360 = vmatprep.subr.bf16.mxu0 %v9359_v6 }
 0x56c   : > { %9330 = vmatpush3.bf16.msra.mxu1 %v9327_v5  ;;  %v9399_v5 = vpack.c.bf16 %v2797_v2, %v2796_v1  ;;  %v3178_v1 = vld [vmem:[#allocation22 + $0x90] sm:$0xff]  ;;  %v3179_v2 = vld [vmem:[#allocation22 + $0x98] sm:$0xff] }
 0x56d   : > { %9362 = vmatpush3.bf16.msra.mxu0 %v9359_v6  ;;  %9332 = vmatprep.subr.bf16.mxu1 %v9331_v11  ;;  %v9431_v6 = vpack.c.bf16 %v2891_v4, %v2890_v3  ;;  %v3280_v3 = vld [vmem:[#allocation19 + $0x90] sm:$0xff]  ;;  %v9503_v4 = vpack.c.bf16 %v3179_v2, %v3178_v1 }
 0x56e   : > { %9364 = vmatprep.subr.bf16.mxu0 %v9363_v12 }
 0x570   : > { %9334 = vmatpush3.bf16.msra.mxu1 %v9331_v11  ;;  %v9435_v11 = vpack.c.bf16 %v2973_v8, %v2972_v7  ;;  %v3180_v7 = vld [vmem:[#allocation22 + $0xa0] sm:$0xff]  ;;  %v3181_v8 = vld [vmem:[#allocation22 + $0xa8] sm:$0xff] }
 0x571   : > { %9366 = vmatpush3.bf16.msra.mxu0 %v9363_v12  ;;  %9336 = vmatprep.subr.bf16.mxu1 %v9335_v17  ;;  %v9467_v12 = vpack.c.bf16 %v3067_v10, %v3066_v9  ;;  %v3282_v9 = vld [vmem:[#allocation19 + $0xa0] sm:$0xff]  ;;  %v9507_v10 = vpack.c.bf16 %v3181_v8, %v3180_v7  ;;  %v3389_v7 = vld [vmem:[#allocation13 + $0x518] sm:$0xff] }
 0x572   : > { %9368 = vmatprep.subr.bf16.mxu0 %v9367_v18  ;;  %v3488_v8 = vld [vmem:[#allocation16 + $0x510] sm:$0xff] }
 0x574   : > { %9338 = vmatpush3.bf16.msra.mxu1 %v9335_v17  ;;  %v2780_v17 = vld [vmem:[#allocation4 + $0x1a] sm:$0xff] }
 0x575   : > { %9370 = vmatpush3.bf16.msra.mxu0 %v9367_v18  ;;  %9372 = vmatprep.subr.bf16.mxu1 %v9371_v27  ;;  %v9439_v18 = vpack.c.bf16 %v2975_v14, %v2974_v13  ;;  %v3182_v13 = vld [vmem:[#allocation22 + $0xb0] sm:$0xff]  ;;  %v3183_v14 = vld [vmem:[#allocation22 + $0xb8] sm:$0xff] }
 0x576   : > { %9404 = vmatprep.subr.bf16.mxu0 %v9403_v24  ;;  %v9511_v16 = vpack.c.bf16 %v3183_v14, %v3182_v13 }
 0x577   : > { %7676 = vmatmul.mubr.f32.vlgmr.msra.gmra.mrb[4].mxu1 %v11860_v47 }
 0x578   : > { %7711 = vmatmul.mubr.f32.vlgmr.msra.gmra.mrb[6].mxu0 %v11860_v47  ;;  %9374 = vmatpush3.bf16.msra.mxu1 %v9371_v27  ;;  %v2790_v47 = vld [vmem:[#allocation13 + $0x440] sm:$0xff]  ;;  %v3071_v27 = vld [vmem:[#allocation16 + $0x4a8] sm:$0xff] }
 0x579   : > { %7745 = vmatprep.mubr.f32.mxu1 %v2779_v38  ;;  %9406 = vmatpush3.bf16.msra.mxu0 %v9403_v24  ;;  %v9387_v51 = vpack.c.bf16 %v2791_v46, %v2790_v47  ;;  %v9443_v24 = vpack.c.bf16 %v2977_v21, %v2976_v19  ;;  %v9475_v26 = vpack.c.bf16 %v3071_v27, %v3070_v23  ;;  %v2985_v47 = vld [vmem:[#allocation13 + $0x4e8] sm:$0xff]  ;;  %v3185_v21 = vld [vmem:[#allocation22 + $0xc8] sm:$0xff] }
 0x57a   : > { %7780 = vmatprep.mubr.f32.mxu0 %v2779_v38  ;;  %9376 = vmatprep.subr.bf16.mxu1 %v9375_v32  ;;  %v3075_v38 = vld [vmem:[#allocation16 + $0x4c8] sm:$0xff]  ;;  %v3078_v46 = vld [vmem:[#allocation16 + $0x4e0] sm:$0xff] }
 0x57b   : > { %9408 = vmatprep.subr.bf16.mxu0 %v9407_v35  ;;  %v3184_v19 = vld [vmem:[#allocation22 + $0xc0] sm:$0xff] }
 0x57c   : > { %9378 = vmatpush3.bf16.msra.mxu1 %v9375_v32  ;;  %v3073_v32 = vld [vmem:[#allocation16 + $0x4b8] sm:$0xff]  ;;  %v9515_v23 = vpack.c.bf16 %v3185_v21, %v3184_v19  ;;  %v3287_v27 = vld [vmem:[#allocation19 + $0xc8] sm:$0xff] }
 0x57d   : > { %9410 = vmatpush3.bf16.msra.mxu0 %v9407_v35  ;;  %9380 = vmatprep.subr.bf16.mxu1 %v9379_v39  ;;  %v9479_v34 = vpack.c.bf16 %v3073_v32, %v3072_v31  ;;  %v2980_v35 = vld [vmem:[#allocation13 + $0x4c0] sm:$0xff] }
 0x57e   : > { %9412 = vmatprep.subr.bf16.mxu0 %v9411_v40  ;;  %v3289_v32 = vld [vmem:[#allocation19 + $0xd8] sm:$0xff] }
 0x580   : > { %9382 = vmatpush3.bf16.msra.mxu1 %v9379_v39  ;;  %v9483_v39 = vpack.c.bf16 %v3075_v38, %v3074_v37  ;;  %v3290_v37 = vld [vmem:[#allocation19 + $0xe0] sm:$0xff]  ;;  %v3291_v38 = vld [vmem:[#allocation19 + $0xe8] sm:$0xff] }
 0x581   : > { %9414 = vmatpush3.bf16.msra.mxu0 %v9411_v40  ;;  %9384 = vmatprep.subr.bf16.mxu1 %v9383_v44  ;;  %v2982_v40 = vld [vmem:[#allocation13 + $0x4d0] sm:$0xff] }
 0x582   : > { %9416 = vmatprep.subr.bf16.mxu0 %v9415_v45  ;;  %v9455_v43 = vpack.c.bf16 %v2983_v41, %v2982_v40  ;;  %v3191_v40 = vld [vmem:[#allocation22 + $0xf8] sm:$0xff]  ;;  %v3292_v41 = vld [vmem:[#allocation19 + $0xf0] sm:$0xff] }
 0x584   : > { %9386 = vmatpush3.bf16.msra.mxu1 %v9383_v44  ;;  %v9487_v44 = vpack.c.bf16 %v3077_v28, %v3076_v42  ;;  %v3293_v42 = vld [vmem:[#allocation19 + $0xf8] sm:$0xff] }
 0x585   : > { %9418 = vmatpush3.bf16.msra.mxu0 %v9415_v45  ;;  %9388 = vmatprep.subr.bf16.mxu1 %v9387_v51  ;;  %v2984_v45 = vld [vmem:[#allocation13 + $0x4e0] sm:$0xff] }
 0x586   : > { %9420 = vmatprep.subr.bf16.mxu0 %v9419_v52  ;;  %v9459_v50 = vpack.c.bf16 %v2985_v47, %v2984_v45  ;;  %v3387_v45 = vld [vmem:[#allocation13 + $0x508] sm:$0xff] }
 0x587   : > { %v3486_v47 = vld [vmem:[#allocation16 + $0x500] sm:$0xff] }
 0x588   : > { %9390 = vmatpush3.bf16.msra.mxu1 %v9387_v51  ;;  %v9491_v51 = vpack.c.bf16 %v3079_v49, %v3078_v46  ;;  %v3487_v49 = vld [vmem:[#allocation16 + $0x508] sm:$0xff] }
 0x589   : > { %9422 = vmatpush3.bf16.msra.mxu0 %v9419_v52  ;;  %9392 = vmatprep.subr.bf16.mxu1 %v9391_v58  ;;  %v2986_v52 = vld [vmem:[#allocation13 + $0x4f0] sm:$0xff] }
 0x58a   : > { %9424 = vmatprep.subr.bf16.mxu0 %v9423_v59  ;;  %v9463_v57 = vpack.c.bf16 %v2987_v53, %v2986_v52 }
 0x58c   : > { %9394 = vmatpush3.bf16.msra.mxu1 %v9391_v58  ;;  %v9495_v58 = vpack.c.bf16 %v3081_v56, %v3080_v55 }
 0x58d   : > { %9426 = vmatpush3.bf16.msra.mxu0 %v9423_v59  ;;  %9396 = vmatprep.subr.bf16.mxu1 %v9395_v48  ;;  %v2970_v59 = vld [vmem:[#allocation4 + $0x1c] sm:$0xff] }
 0x58e   : > { %9428 = vmatprep.subr.bf16.mxu0 %v9427_v0 }
 0x590   : > { %9398 = vmatpush3.bf16.msra.mxu1 %v9395_v48  ;;  %v3279_v48 = vld [vmem:[#allocation19 + $0x88] sm:$0xff] }
 0x591   : > { %9430 = vmatpush3.bf16.msra.mxu0 %v9427_v0  ;;  %9400 = vmatprep.subr.bf16.mxu1 %v9399_v5  ;;  %v9531_v0 = vpack.c.bf16 %v3279_v48, %v3278_v62 }
 0x592   : > { %9432 = vmatprep.subr.bf16.mxu0 %v9431_v6 }
 0x594   : > { %9402 = vmatpush3.bf16.msra.mxu1 %v9399_v5  ;;  %v3281_v5 = vld [vmem:[#allocation19 + $0x98] sm:$0xff] }
 0x595   : > { %9434 = vmatpush3.bf16.msra.mxu0 %v9431_v6  ;;  %9436 = vmatprep.subr.bf16.mxu1 %v9435_v11  ;;  %v9535_v6 = vpack.c.bf16 %v3281_v5, %v3280_v3  ;;  %v3388_v5 = vld [vmem:[#allocation13 + $0x510] sm:$0xff] }
 0x596   : > { %9468 = vmatprep.subr.bf16.mxu0 %v9467_v12  ;;  %v9567_v13 = vpack.c.bf16 %v3389_v7, %v3388_v5  ;;  %v3684_v5 = vld [vmem:[#allocation16 + $0x590] sm:$0xff]  ;;  %v10679_v7 = vld [vmem:[#allocation4 + $0x10] sm:$0xff] }
 0x597   : > { %7746 = vmatmul.mubr.f32.vlgmr.msra.gmra.mrb[4].mxu1 %v2780_v17 }
 0x598   : > { %7781 = vmatmul.mubr.f32.vlgmr.msra.gmra.mrb[6].mxu0 %v2780_v17  ;;  %9438 = vmatpush3.bf16.msra.mxu1 %v9435_v11  ;;  %v3283_v11 = vld [vmem:[#allocation19 + $0xa8] sm:$0xff]  ;;  %v3285_v17 = vld [vmem:[#allocation19 + $0xb8] sm:$0xff] }
 0x599   : > { %7815 = vmatprep.mubr.f32.mxu1 %v11867_v54  ;;  %9470 = vmatpush3.bf16.msra.mxu0 %v9467_v12  ;;  %v9539_v12 = vpack.c.bf16 %v3283_v11, %v3282_v9  ;;  %v3489_v9 = vld [vmem:[#allocation16 + $0x518] sm:$0xff] }
 0x59a   : > { %7850 = vmatprep.mubr.f32.mxu0 %v11867_v54  ;;  %9440 = vmatprep.subr.bf16.mxu1 %v9439_v18  ;;  %v9451_v54 = vpack.c.bf16 %v2981_v36, %v2980_v35  ;;  %v9551_v35 = vpack.c.bf16 %v3289_v32, %v3288_v30  ;;  %v9599_v14 = vpack.c.bf16 %v3489_v9, %v3488_v8  ;;  %v3395_v32 = vld [vmem:[#allocation13 + $0x548] sm:$0xff] }
 0x59b   : > { %9472 = vmatprep.subr.bf16.mxu0 %v9471_v22 }
 0x59c   : > { %9442 = vmatpush3.bf16.msra.mxu1 %v9439_v18  ;;  %v9543_v18 = vpack.c.bf16 %v3285_v17, %v3284_v15  ;;  %v3390_v15 = vld [vmem:[#allocation13 + $0x520] sm:$0xff] }
 0x59d   : > { %9474 = vmatpush3.bf16.msra.mxu0 %v9471_v22  ;;  %9444 = vmatprep.subr.bf16.mxu1 %v9443_v24  ;;  %v3286_v22 = vld [vmem:[#allocation19 + $0xc0] sm:$0xff] }
 0x59e   : > { %9476 = vmatprep.subr.bf16.mxu0 %v9475_v26  ;;  %v3490_v17 = vld [vmem:[#allocation16 + $0x520] sm:$0xff] }
 0x5a0   : > { %9446 = vmatpush3.bf16.msra.mxu1 %v9443_v24  ;;  %v9547_v24 = vpack.c.bf16 %v3287_v27, %v3286_v22  ;;  %v3392_v22 = vld [vmem:[#allocation13 + $0x530] sm:$0xff] }
 0x5a1   : > { %9478 = vmatpush3.bf16.msra.mxu0 %v9475_v26  ;;  %9448 = vmatprep.subr.bf16.mxu1 %v9447_v33  ;;  %v3186_v26 = vld [vmem:[#allocation22 + $0xd0] sm:$0xff]  ;;  %v3492_v27 = vld [vmem:[#allocation16 + $0x530] sm:$0xff] }
 0x5a2   : > { %9480 = vmatprep.subr.bf16.mxu0 %v9479_v34  ;;  %v9519_v31 = vpack.c.bf16 %v3187_v29, %v3186_v26  ;;  %v11877_v26 = vld [vmem:[#allocation4 + $0x8] sm:$0xff] }
 0x5a4   : > { %9450 = vmatpush3.bf16.msra.mxu1 %v9447_v33  ;;  %v3188_v33 = vld [vmem:[#allocation22 + $0xe0] sm:$0xff] }
 0x5a5   : > { %9482 = vmatpush3.bf16.msra.mxu0 %v9479_v34  ;;  %9452 = vmatprep.subr.bf16.mxu1 %v9451_v54  ;;  %v3189_v34 = vld [vmem:[#allocation22 + $0xe8] sm:$0xff] }
 0x5a6   : > { %9484 = vmatprep.subr.bf16.mxu0 %v9483_v39  ;;  %v9523_v36 = vpack.c.bf16 %v3189_v34, %v3188_v33  ;;  %v3494_v33 = vld [vmem:[#allocation16 + $0x540] sm:$0xff]  ;;  %v3495_v34 = vld [vmem:[#allocation16 + $0x548] sm:$0xff] }
 0x5a8   : > { %9454 = vmatpush3.bf16.msra.mxu1 %v9451_v54  ;;  %v3190_v54 = vld [vmem:[#allocation22 + $0xf0] sm:$0xff] }
 0x5a9   : > { %9486 = vmatpush3.bf16.msra.mxu0 %v9483_v39  ;;  %9456 = vmatprep.subr.bf16.mxu1 %v9455_v43  ;;  %v9555_v39 = vpack.c.bf16 %v3291_v38, %v3290_v37  ;;  %v9527_v28 = vpack.c.bf16 %v3191_v40, %v3190_v54  ;;  %v3396_v37 = vld [vmem:[#allocation13 + $0x550] sm:$0xff]  ;;  %v3397_v38 = vld [vmem:[#allocation13 + $0x558] sm:$0xff] }
 0x5aa   : > { %9488 = vmatprep.subr.bf16.mxu0 %v9487_v44  ;;  %v3496_v54 = vld [vmem:[#allocation16 + $0x550] sm:$0xff]  ;;  %v3497_v40 = vld [vmem:[#allocation16 + $0x558] sm:$0xff] }
 0x5ac   : > { %9458 = vmatpush3.bf16.msra.mxu1 %v9455_v43  ;;  %v9559_v43 = vpack.c.bf16 %v3293_v42, %v3292_v41  ;;  %v9615_v41 = vpack.c.bf16 %v3497_v40, %v3496_v54  ;;  %v3398_v42 = vld [vmem:[#allocation13 + $0x560] sm:$0xff] }
 0x5ad   : > { %9490 = vmatpush3.bf16.msra.mxu0 %v9487_v44  ;;  %9460 = vmatprep.subr.bf16.mxu1 %v9459_v50  ;;  %v3386_v44 = vld [vmem:[#allocation13 + $0x500] sm:$0xff] }
 0x5ae   : > { %9492 = vmatprep.subr.bf16.mxu0 %v9491_v51  ;;  %v9563_v46 = vpack.c.bf16 %v3387_v45, %v3386_v44  ;;  %v3499_v45 = vld [vmem:[#allocation16 + $0x568] sm:$0xff]  ;;  %v3693_v54 = vld [vmem:[#allocation16 + $0x5d8] sm:$0xff] }
 0x5b0   : > { %9462 = vmatpush3.bf16.msra.mxu1 %v9459_v50  ;;  %v9595_v50 = vpack.c.bf16 %v3487_v49, %v3486_v47  ;;  %v3401_v49 = vld [vmem:[#allocation13 + $0x578] sm:$0xff] }
 0x5b1   : > { %9494 = vmatpush3.bf16.msra.mxu0 %v9491_v51  ;;  %9464 = vmatprep.subr.bf16.mxu1 %v9463_v57  ;;  %v6136_v51 = vld [vmem:[#allocation17 + $0x1] ss:$0 sm:$0xff] }
 0x5b2   : > { %9496 = vmatprep.subr.bf16.mxu0 %v9495_v58 }
 0x5b4   : > { %9466 = vmatpush3.bf16.msra.mxu1 %v9463_v57 }
 0x5b5   : > { %9498 = vmatpush3.bf16.msra.mxu0 %v9495_v58  ;;  %9500 = vmatprep.subr.bf16.mxu1 %v9499_v63 }
 0x5b6   : > { %9532 = vmatprep.subr.bf16.mxu0 %v9531_v0 }
 0x5b7   : > { %7816 = vmatmul.mubr.f32.vlgmr.msra.gmra.mrb[4].mxu1 %v2970_v59 }
 0x5b8   : > { %7851 = vmatmul.mubr.f32.vlgmr.msra.gmra.mrb[6].mxu0 %v2970_v59  ;;  %9502 = vmatpush3.bf16.msra.mxu1 %v9499_v63 }
 0x5b9   : > { %9534 = vmatpush3.bf16.msra.mxu0 %v9531_v0  ;;  %9504 = vmatprep.subr.bf16.mxu1 %v9503_v4 }
 0x5ba   : > { %9536 = vmatprep.subr.bf16.mxu0 %v9535_v6 }
 0x5bc   : > { %9506 = vmatpush3.bf16.msra.mxu1 %v9503_v4 }
 0x5bd   : > { %9538 = vmatpush3.bf16.msra.mxu0 %v9535_v6  ;;  %9508 = vmatprep.subr.bf16.mxu1 %v9507_v10 }
 0x5be   : > { %9540 = vmatprep.subr.bf16.mxu0 %v9539_v12 }
 0x5c0   : > { %9510 = vmatpush3.bf16.msra.mxu1 %v9507_v10 }
 0x5c1   : > { %9542 = vmatpush3.bf16.msra.mxu0 %v9539_v12  ;;  %9512 = vmatprep.subr.bf16.mxu1 %v9511_v16 }
 0x5c2   : > { %9544 = vmatprep.subr.bf16.mxu0 %v9543_v18 }
 0x5c4   : > { %9514 = vmatpush3.bf16.msra.mxu1 %v9511_v16  ;;  %v3391_v16 = vld [vmem:[#allocation13 + $0x528] sm:$0xff] }
 0x5c5   : > { %9546 = vmatpush3.bf16.msra.mxu0 %v9543_v18  ;;  %9516 = vmatprep.subr.bf16.mxu1 %v9515_v23  ;;  %v3491_v18 = vld [vmem:[#allocation16 + $0x528] sm:$0xff]  ;;  %v9571_v19 = vpack.c.bf16 %v3391_v16, %v3390_v15  ;;  %v3686_v15 = vld [vmem:[#allocation16 + $0x5a0] sm:$0xff] }
 0x5c6   : > { %9548 = vmatprep.subr.bf16.mxu0 %v9547_v24  ;;  %v9603_v21 = vpack.c.bf16 %v3491_v18, %v3490_v17  ;;  %v3687_v16 = vld [vmem:[#allocation16 + $0x5a8] sm:$0xff] }
 0x5c7   : > { %v9667_v18 = vpack.c.bf16 %v3687_v16, %v3686_v15  ;;  %v3786_v16 = vld [vmem:[#allocation13 + $0x640] sm:$0xff] }
 0x5c8   : > { %9518 = vmatpush3.bf16.msra.mxu1 %v9515_v23  ;;  %v3393_v23 = vld [vmem:[#allocation13 + $0x538] sm:$0xff] }
 0x5c9   : > { %9550 = vmatpush3.bf16.msra.mxu0 %v9547_v24  ;;  %9520 = vmatprep.subr.bf16.mxu1 %v9519_v31  ;;  %v3493_v24 = vld [vmem:[#allocation16 + $0x538] sm:$0xff]  ;;  %v9575_v29 = vpack.c.bf16 %v3393_v23, %v3392_v22  ;;  %v3688_v22 = vld [vmem:[#allocation16 + $0x5b0] sm:$0xff] }
 0x5ca   : > { %9552 = vmatprep.subr.bf16.mxu0 %v9551_v35  ;;  %v9607_v30 = vpack.c.bf16 %v3493_v24, %v3492_v27  ;;  %v3689_v23 = vld [vmem:[#allocation16 + $0x5b8] sm:$0xff] }
 0x5cb   : > { %v9671_v24 = vpack.c.bf16 %v3689_v23, %v3688_v22  ;;  %v3788_v22 = vld [vmem:[#allocation13 + $0x650] sm:$0xff]  ;;  %v3789_v23 = vld [vmem:[#allocation13 + $0x658] sm:$0xff] }
 0x5cc   : > { %9522 = vmatpush3.bf16.msra.mxu1 %v9519_v31  ;;  %v3394_v31 = vld [vmem:[#allocation13 + $0x540] sm:$0xff] }
 0x5cd   : > { %9554 = vmatpush3.bf16.msra.mxu0 %v9551_v35  ;;  %9524 = vmatprep.subr.bf16.mxu1 %v9523_v36  ;;  %v9579_v35 = vpack.c.bf16 %v3395_v32, %v3394_v31  ;;  %v3690_v32 = vld [vmem:[#allocation16 + $0x5c0] sm:$0xff] }
 0x5ce   : > { %9556 = vmatprep.subr.bf16.mxu0 %v9555_v39 }
 0x5d0   : > { %9526 = vmatpush3.bf16.msra.mxu1 %v9523_v36  ;;  %v9611_v36 = vpack.c.bf16 %v3495_v34, %v3494_v33  ;;  %v3691_v33 = vld [vmem:[#allocation16 + $0x5c8] sm:$0xff] }
 0x5d1   : > { %9558 = vmatpush3.bf16.msra.mxu0 %v9555_v39  ;;  %9528 = vmatprep.subr.bf16.mxu1 %v9527_v28  ;;  %v9583_v39 = vpack.c.bf16 %v3397_v38, %v3396_v37  ;;  %v3599_v37 = vld [vmem:[#allocation13 + $0x5d8] sm:$0xff] }
 0x5d2   : > { %9560 = vmatprep.subr.bf16.mxu0 %v9559_v43  ;;  %v3692_v38 = vld [vmem:[#allocation16 + $0x5d0] sm:$0xff] }
 0x5d3   : > { %v9679_v40 = vpack.c.bf16 %v3693_v54, %v3692_v38  ;;  %v3793_v38 = vld [vmem:[#allocation13 + $0x678] sm:$0xff] }
 0x5d4   : > { %9530 = vmatpush3.bf16.msra.mxu1 %v9527_v28  ;;  %v3399_v28 = vld [vmem:[#allocation13 + $0x568] sm:$0xff]  ;;  %v3886_v54 = vld [vmem:[#allocation16 + $0x670] sm:$0xff] }
 0x5d5   : > { %9562 = vmatpush3.bf16.msra.mxu0 %v9559_v43  ;;  %9564 = vmatprep.subr.bf16.mxu1 %v9563_v46  ;;  %v3498_v43 = vld [vmem:[#allocation16 + $0x560] sm:$0xff]  ;;  %v9587_v44 = vpack.c.bf16 %v3399_v28, %v3398_v42 }
 0x5d6   : > { %9596 = vmatprep.subr.bf16.mxu0 %v9595_v50  ;;  %v9619_v47 = vpack.c.bf16 %v3499_v45, %v3498_v43  ;;  %v3601_v42 = vld [vmem:[#allocation13 + $0x5e8] sm:$0xff] }
 0x5d7   : > { %v3694_v28 = vld [vmem:[#allocation16 + $0x5e0] sm:$0xff]  ;;  %v3695_v43 = vld [vmem:[#allocation16 + $0x5e8] sm:$0xff] }
 0x5d8   : > { %v9683_v45 = vpack.c.bf16 %v3695_v43, %v3694_v28  ;;  %v3969_v28 = vld [vmem:[#allocation13 + $0x688] sm:$0xff] }
 0x5d9   : > { %v4062_v43 = vld [vmem:[#allocation16 + $0x680] sm:$0xff] }
 0x68a   : > { %v7817_v52 = vpop.f32.mrb[4].mxu1 }
 0x68b   : > { %v7852_v53 = vpop.f32.mrb[6].mxu0  ;;  %v3054_v55 = vpop.f32.mrb[5].mxu1  ;;  %v10343_v62 = vadd.f32 %v7817_v52, %v6135_v61  ;;  %v3501_v52 = vld [vmem:[#allocation16 + $0x578] sm:$0xff] }
 0x68c   : > { %v10345_v56 = vadd.f32 %v7852_v53, %v6136_v51  ;;  %v3148_v57 = vpop.f32.mrb[7].mxu0  ;;  %v10344_v63 = vadd.f32 %v6135_v61, %v3054_v55  ;;  %v3588_v55 = vld [vmem:[#allocation13 + $0x580] sm:$0xff]  ;;  %v6140_v61 = vld [vmem:[#allocation20 + $0x1] ss:$0 sm:$0xff] }
 0x68d   : > { %v10346_v58 = vadd.f32 %v6136_v51, %v3148_v57  ;;  %v3682_v57 = vld [vmem:[#allocation16 + $0x580] sm:$0xff] }
 0x68e   : > { %v6138_v59 = vmul.f32 -1.442695, %v10345_v56  ;;  %v3589_v56 = vld [vmem:[#allocation13 + $0x588] sm:$0xff] }
 0x68f   : > { %v6137_v60 = vmul.f32 -1.442695, %v10346_v58  ;;  %v9627_v58 = vpack.c.bf16 %v3589_v56, %v3588_v55  ;;  %v3779_v55 = vld [vmem:[#allocation13 + $0x608] sm:$0xff] }
 0x690   : > { %10639 = vpow2.f32 %v6138_v59  ;;  %v3683_v59 = vld [vmem:[#allocation16 + $0x588] sm:$0xff]  ;;  %v3872_v56 = vld [vmem:[#allocation16 + $0x600] sm:$0xff] }
 0x691   : > { %10641 = vpow2.f32 %v6137_v60  ;;  %v9659_v60 = vpack.c.bf16 %v3683_v59, %v3682_v57  ;;  %v3873_v57 = vld [vmem:[#allocation16 + $0x608] sm:$0xff] }
 0x692   : > { %10643 = vtanh.f32 %v10343_v62  ;;  %v9723_v59 = vpack.c.bf16 %v3873_v57, %v3872_v56  ;;  %v4066_v57 = vld [vmem:[#allocation16 + $0x6a0] sm:$0xff] }
 0x693   : > { %10645 = vtanh.f32 %v10344_v63 }
 0x69a   : > { %v10640_v48 = vpop.eup %10639 }
 0x69b   : > { %v10642_v0 = vpop.eup %10641  ;;  %v3168_v1 = vadd.f32 1.0, %v10640_v48 }
 0x69c   : > { %v3167_v2 = vadd.f32 1.0, %v10642_v0  ;;  %v10644_v3 = vpop.eup %10643 }
 0x69d   : > { %10647 = vrcp.f32 %v3168_v1  ;;  %v10646_v4 = vpop.eup %10645  ;;  %v3590_v1 = vld [vmem:[#allocation13 + $0x590] sm:$0xff] }
 0x69e   : > { %10649 = vrcp.f32 %v3167_v2  ;;  %v10678_v2 = vld [vmem:[#allocation4 + $0x18] sm:$0xff] }
 0x6a7   : > { %v10648_v6 = vpop.eup %10647 }
 0x6a8   : > { %v10650_v10 = vpop.eup %10649  ;;  %v3174_v11 = vmul.f32 %v10648_v6, %v10644_v3  ;;  %v3685_v6 = vld [vmem:[#allocation16 + $0x598] sm:$0xff] }
 0x6a9   : > { %v3173_v12 = vmul.f32 %v10650_v10, %v10646_v4  ;;  %v3591_v4 = vld [vmem:[#allocation13 + $0x598] sm:$0xff] }
 0x6ab   : > { %7885 = vmatprep.mubr.f32.mxu1 %v3173_v12  ;;  %7920 = vmatprep.mubr.f32.mxu0 %v3173_v12  ;;  %v9663_v12 = vpack.c.bf16 %v3685_v6, %v3684_v5  ;;  %v3877_v5 = vld [vmem:[#allocation16 + $0x628] sm:$0xff] }
 0x6ac   : > { %7886 = vmatmul.mubr.f32.vlgmr.msra.gmra.mrb[2].mxu1 %v3174_v11  ;;  %7921 = vmatmul.mubr.f32.vlgmr.msra.gmra.mrb[8].mxu0 %v3174_v11  ;;  %v9631_v11 = vpack.c.bf16 %v3591_v4, %v3590_v1  ;;  %v3876_v4 = vld [vmem:[#allocation16 + $0x620] sm:$0xff] }
 0x6ad   : > { %9566 = vmatpush3.bf16.msra.mxu1 %v9563_v46  ;;  %9598 = vmatpush3.bf16.msra.mxu0 %v9595_v50  ;;  %v3400_v46 = vld [vmem:[#allocation13 + $0x570] sm:$0xff] }
 0x6ae   : > { %9568 = vmatprep.subr.bf16.mxu1 %v9567_v13  ;;  %9600 = vmatprep.subr.bf16.mxu0 %v9599_v14  ;;  %v3500_v50 = vld [vmem:[#allocation16 + $0x570] sm:$0xff]  ;;  %v9591_v51 = vpack.c.bf16 %v3401_v49, %v3400_v46 }
 0x6af   : > { %7955 = vmatprep.mubr.f32.mxu1 %v11877_v26  ;;  %7990 = vmatprep.mubr.f32.mxu0 %v11877_v26  ;;  %v9623_v53 = vpack.c.bf16 %v3501_v52, %v3500_v50  ;;  %v3603_v46 = vld [vmem:[#allocation13 + $0x5f8] sm:$0xff] }
 0x6b0   : > { %v3696_v49 = vld [vmem:[#allocation16 + $0x5f0] sm:$0xff]  ;;  %v3697_v50 = vld [vmem:[#allocation16 + $0x5f8] sm:$0xff] }
 0x6b1   : > { %9570 = vmatpush3.bf16.msra.mxu1 %v9567_v13  ;;  %9602 = vmatpush3.bf16.msra.mxu0 %v9599_v14  ;;  %v3592_v13 = vld [vmem:[#allocation13 + $0x5a0] sm:$0xff]  ;;  %v3593_v14 = vld [vmem:[#allocation13 + $0x5a8] sm:$0xff]  ;;  %v9687_v52 = vpack.c.bf16 %v3697_v50, %v3696_v49  ;;  %v3971_v49 = vld [vmem:[#allocation13 + $0x698] sm:$0xff] }
 0x6b2   : > { %9572 = vmatprep.subr.bf16.mxu1 %v9571_v19  ;;  %9604 = vmatprep.subr.bf16.mxu0 %v9603_v21  ;;  %v9635_v17 = vpack.c.bf16 %v3593_v14, %v3592_v13  ;;  %v3879_v13 = vld [vmem:[#allocation16 + $0x638] sm:$0xff]  ;;  %v4064_v50 = vld [vmem:[#allocation16 + $0x690] sm:$0xff] }
 0x6b5   : > { %9574 = vmatpush3.bf16.msra.mxu1 %v9571_v19  ;;  %9606 = vmatpush3.bf16.msra.mxu0 %v9603_v21  ;;  %v3594_v19 = vld [vmem:[#allocation13 + $0x5b0] sm:$0xff]  ;;  %v3595_v21 = vld [vmem:[#allocation13 + $0x5b8] sm:$0xff] }
 0x6b6   : > { %9576 = vmatprep.subr.bf16.mxu1 %v9575_v29  ;;  %9608 = vmatprep.subr.bf16.mxu0 %v9607_v30  ;;  %v9639_v27 = vpack.c.bf16 %v3595_v21, %v3594_v19  ;;  %v3881_v19 = vld [vmem:[#allocation16 + $0x648] sm:$0xff] }
 0x6b9   : > { %9578 = vmatpush3.bf16.msra.mxu1 %v9575_v29  ;;  %9610 = vmatpush3.bf16.msra.mxu0 %v9607_v30  ;;  %v3596_v29 = vld [vmem:[#allocation13 + $0x5c0] sm:$0xff]  ;;  %v3597_v30 = vld [vmem:[#allocation13 + $0x5c8] sm:$0xff] }
 0x6ba   : > { %9580 = vmatprep.subr.bf16.mxu1 %v9579_v35  ;;  %9612 = vmatprep.subr.bf16.mxu0 %v9611_v36  ;;  %v9643_v34 = vpack.c.bf16 %v3597_v30, %v3596_v29  ;;  %v9711_v29 = vpack.c.bf16 %v3789_v23, %v3788_v22  ;;  %v3982_v22 = vld [vmem:[#allocation13 + $0x6f0] sm:$0xff]  ;;  %v3983_v23 = vld [vmem:[#allocation13 + $0x6f8] sm:$0xff] }
 0x6bd   : > { %9582 = vmatpush3.bf16.msra.mxu1 %v9579_v35  ;;  %9614 = vmatpush3.bf16.msra.mxu0 %v9611_v36  ;;  %v9675_v35 = vpack.c.bf16 %v3691_v33, %v3690_v32  ;;  %v3598_v36 = vld [vmem:[#allocation13 + $0x5d0] sm:$0xff]  ;;  %v3791_v32 = vld [vmem:[#allocation13 + $0x668] sm:$0xff] }
 0x6be   : > { %9584 = vmatprep.subr.bf16.mxu1 %v9583_v39  ;;  %9616 = vmatprep.subr.bf16.mxu0 %v9615_v41  ;;  %v3884_v33 = vld [vmem:[#allocation16 + $0x660] sm:$0xff] }
 0x6c1   : > { %9586 = vmatpush3.bf16.msra.mxu1 %v9583_v39  ;;  %9618 = vmatpush3.bf16.msra.mxu0 %v9615_v41  ;;  %v9647_v39 = vpack.c.bf16 %v3599_v37, %v3598_v36  ;;  %v3600_v41 = vld [vmem:[#allocation13 + $0x5e0] sm:$0xff]  ;;  %v3792_v37 = vld [vmem:[#allocation13 + $0x670] sm:$0xff] }
 0x6c2   : > { %9588 = vmatprep.subr.bf16.mxu1 %v9587_v44  ;;  %9620 = vmatprep.subr.bf16.mxu0 %v9619_v47 }
 0x6c5   : > { %9590 = vmatpush3.bf16.msra.mxu1 %v9587_v44  ;;  %9622 = vmatpush3.bf16.msra.mxu0 %v9619_v47  ;;  %v9651_v44 = vpack.c.bf16 %v3601_v42, %v3600_v41  ;;  %v3602_v47 = vld [vmem:[#allocation13 + $0x5f0] sm:$0xff]  ;;  %v3968_v42 = vld [vmem:[#allocation13 + $0x680] sm:$0xff] }
 0x6c6   : > { %9592 = vmatprep.subr.bf16.mxu1 %v9591_v51  ;;  %9624 = vmatprep.subr.bf16.mxu0 %v9623_v53 }
 0x6c9   : > { %9594 = vmatpush3.bf16.msra.mxu1 %v9591_v51  ;;  %9626 = vmatpush3.bf16.msra.mxu0 %v9623_v53  ;;  %v9655_v51 = vpack.c.bf16 %v3603_v46, %v3602_v47  ;;  %v3778_v53 = vld [vmem:[#allocation13 + $0x600] sm:$0xff]  ;;  %v3970_v46 = vld [vmem:[#allocation13 + $0x690] sm:$0xff] }
 0x6ca   : > { %9628 = vmatprep.subr.bf16.mxu1 %v9627_v58  ;;  %9660 = vmatprep.subr.bf16.mxu0 %v9659_v60 }
 0x77f   : > { %v7922_v62 = vpop.f32.mrb[8].mxu0 }
 0x780   : > { %v3374_v63 = vadd.f32 %v7922_v62, %v6140_v61  ;;  %v3368_v48 = vpop.f32.mrb[9].mxu0  ;;  %v3874_v62 = vld [vmem:[#allocation16 + $0x610] sm:$0xff] }
 0x781   : > { %v3369_v0 = vadd.f32 %v6140_v61, %v3368_v48  ;;  %v3781_v61 = vld [vmem:[#allocation13 + $0x618] sm:$0xff] }
 0x782   : > { %v3378_v3 = vadd.f32 %v10678_v2, %v3374_v63  ;;  %v3875_v63 = vld [vmem:[#allocation16 + $0x618] sm:$0xff] }
 0x783   : > { %v3377_v8 = vadd.f32 %v10679_v7, %v3369_v0  ;;  %v9727_v1 = vpack.c.bf16 %v3875_v63, %v3874_v62  ;;  %v3782_v2 = vld [vmem:[#allocation13 + $0x620] sm:$0xff]  ;;  %v9731_v7 = vpack.c.bf16 %v3877_v5, %v3876_v4  ;;  %v3975_v62 = vld [vmem:[#allocation13 + $0x6b8] sm:$0xff]  ;;  %v3977_v4 = vld [vmem:[#allocation13 + $0x6c8] sm:$0xff] }
 0x784   : > { %v11882_v9 = vmul.f32 %v3378_v3, %v11845_v25  ;;  %v3783_v3 = vld [vmem:[#allocation13 + $0x628] sm:$0xff]  ;;  %v4068_v63 = vld [vmem:[#allocation16 + $0x6b0] sm:$0xff] }
 0x785   : > { %v11885_v10 = vmul.f32 %v3377_v8, %v11843_v20  ;;  %v9699_v6 = vpack.c.bf16 %v3783_v3, %v3782_v2  ;;  %v3784_v8 = vld [vmem:[#allocation13 + $0x630] sm:$0xff]  ;;  %v3976_v3 = vld [vmem:[#allocation13 + $0x6c0] sm:$0xff] }
 0x786   : > { %3382 = vst [vmem:[#allocation4 + $0x18] sm:$0xff] %v11882_v9  ;;  %v4070_v5 = vld [vmem:[#allocation16 + $0x6c0] sm:$0xff] }
 0x787   : > { %3381 = vst [vmem:[#allocation4 + $0x10] sm:$0xff] %v11885_v10  ;;  %7956 = vmatmul.mubr.f32.vlgmr.msra.gmra.mrb[6].mxu1 %v11885_v10  ;;  %7991 = vmatmul.mubr.f32.vlgmr.msra.gmra.mrb[10].mxu0 %v11885_v10 }
 0x788   : > { %9630 = vmatpush3.bf16.msra.mxu1 %v9627_v58  ;;  %9662 = vmatpush3.bf16.msra.mxu0 %v9659_v60  ;;  %v9691_v58 = vpack.c.bf16 %v3779_v55, %v3778_v53  ;;  %v3780_v60 = vld [vmem:[#allocation13 + $0x610] sm:$0xff]  ;;  %v3972_v53 = vld [vmem:[#allocation13 + $0x6a0] sm:$0xff]  ;;  %v3973_v55 = vld [vmem:[#allocation13 + $0x6a8] sm:$0xff] }
 0x789   : > { %9632 = vmatprep.subr.bf16.mxu1 %v9631_v11  ;;  %9664 = vmatprep.subr.bf16.mxu0 %v9663_v12  ;;  %v9695_v0 = vpack.c.bf16 %v3781_v61, %v3780_v60  ;;  %v3974_v61 = vld [vmem:[#allocation13 + $0x6b0] sm:$0xff] }
 0x78c   : > { %9634 = vmatpush3.bf16.msra.mxu1 %v9631_v11  ;;  %9666 = vmatpush3.bf16.msra.mxu0 %v9663_v12  ;;  %v3785_v11 = vld [vmem:[#allocation13 + $0x638] sm:$0xff] }
 0x78d   : > { %9636 = vmatprep.subr.bf16.mxu1 %v9635_v17  ;;  %9668 = vmatprep.subr.bf16.mxu0 %v9667_v18  ;;  %v3878_v12 = vld [vmem:[#allocation16 + $0x630] sm:$0xff]  ;;  %v9703_v14 = vpack.c.bf16 %v3785_v11, %v3784_v8 }
 0x78e   : > { %v3585_v31 = vld [vmem:[#allocation4 + $0xc] sm:$0xff]  ;;  %v11891_v48 = vld [vmem:[#allocation4 + $0x14] sm:$0xff]  ;;  %v9735_v15 = vpack.c.bf16 %v3879_v13, %v3878_v12  ;;  %v3978_v8 = vld [vmem:[#allocation13 + $0x6d0] sm:$0xff] }
 0x78f   : > { %8025 = vmatprep.mubr.f32.mxu1 %v3585_v31  ;;  %8060 = vmatprep.mubr.f32.mxu0 %v3585_v31  ;;  %v3790_v31 = vld [vmem:[#allocation13 + $0x660] sm:$0xff]  ;;  %v3979_v11 = vld [vmem:[#allocation13 + $0x6d8] sm:$0xff] }
 0x790   : > { %9638 = vmatpush3.bf16.msra.mxu1 %v9635_v17  ;;  %9670 = vmatpush3.bf16.msra.mxu0 %v9667_v18  ;;  %v3787_v17 = vld [vmem:[#allocation13 + $0x648] sm:$0xff]  ;;  %v4072_v12 = vld [vmem:[#allocation16 + $0x6d0] sm:$0xff]  ;;  %v4073_v13 = vld [vmem:[#allocation16 + $0x6d8] sm:$0xff] }
 0x791   : > { %9640 = vmatprep.subr.bf16.mxu1 %v9639_v27  ;;  %9672 = vmatprep.subr.bf16.mxu0 %v9671_v24  ;;  %v3880_v18 = vld [vmem:[#allocation16 + $0x640] sm:$0xff] }
 0x792   : > { %v9739_v21 = vpack.c.bf16 %v3881_v19, %v3880_v18  ;;  %v4074_v18 = vld [vmem:[#allocation16 + $0x6e0] sm:$0xff]  ;;  %v4075_v19 = vld [vmem:[#allocation16 + $0x6e8] sm:$0xff] }
 0x794   : > { %9642 = vmatpush3.bf16.msra.mxu1 %v9639_v27  ;;  %9674 = vmatpush3.bf16.msra.mxu0 %v9671_v24  ;;  %v3882_v27 = vld [vmem:[#allocation16 + $0x650] sm:$0xff]  ;;  %v3883_v24 = vld [vmem:[#allocation16 + $0x658] sm:$0xff] }
 0x795   : > { %9644 = vmatprep.subr.bf16.mxu1 %v9643_v34  ;;  %9676 = vmatprep.subr.bf16.mxu0 %v9675_v35  ;;  %v9743_v30 = vpack.c.bf16 %v3883_v24, %v3882_v27  ;;  %v4076_v27 = vld [vmem:[#allocation16 + $0x6f0] sm:$0xff]  ;;  %v4077_v24 = vld [vmem:[#allocation16 + $0x6f8] sm:$0xff] }
 0x798   : > { %9646 = vmatpush3.bf16.msra.mxu1 %v9643_v34  ;;  %9678 = vmatpush3.bf16.msra.mxu0 %v9675_v35  ;;  %v3885_v34 = vld [vmem:[#allocation16 + $0x668] sm:$0xff]  ;;  %v9715_v35 = vpack.c.bf16 %v3791_v32, %v3790_v31  ;;  %v4158_v31 = vld [vmem:[#allocation13 + $0x700] sm:$0xff] }
 0x799   : > { %9648 = vmatprep.subr.bf16.mxu1 %v9647_v39  ;;  %9680 = vmatprep.subr.bf16.mxu0 %v9679_v40  ;;  %v9747_v36 = vpack.c.bf16 %v3885_v34, %v3884_v33  ;;  %v4159_v32 = vld [vmem:[#allocation13 + $0x708] sm:$0xff] }
 0x79a   : > { %v4252_v33 = vld [vmem:[#allocation16 + $0x700] sm:$0xff]  ;;  %v4253_v34 = vld [vmem:[#allocation16 + $0x708] sm:$0xff] }
 0x79c   : > { %9650 = vmatpush3.bf16.msra.mxu1 %v9647_v39  ;;  %9682 = vmatpush3.bf16.msra.mxu0 %v9679_v40  ;;  %v3887_v39 = vld [vmem:[#allocation16 + $0x678] sm:$0xff]  ;;  %v9719_v40 = vpack.c.bf16 %v3793_v38, %v3792_v37  ;;  %v4160_v37 = vld [vmem:[#allocation13 + $0x710] sm:$0xff] }
 0x79d   : > { %9652 = vmatprep.subr.bf16.mxu1 %v9651_v44  ;;  %9684 = vmatprep.subr.bf16.mxu0 %v9683_v45  ;;  %v9751_v41 = vpack.c.bf16 %v3887_v39, %v3886_v54  ;;  %v4161_v38 = vld [vmem:[#allocation13 + $0x718] sm:$0xff] }
 0x79e   : > { %v4254_v54 = vld [vmem:[#allocation16 + $0x710] sm:$0xff]  ;;  %v4255_v39 = vld [vmem:[#allocation16 + $0x718] sm:$0xff] }
 0x7a0   : > { %9654 = vmatpush3.bf16.msra.mxu1 %v9651_v44  ;;  %9686 = vmatpush3.bf16.msra.mxu0 %v9683_v45  ;;  %v4063_v44 = vld [vmem:[#allocation16 + $0x688] sm:$0xff]  ;;  %v9755_v45 = vpack.c.bf16 %v3969_v28, %v3968_v42  ;;  %v4162_v42 = vld [vmem:[#allocation13 + $0x720] sm:$0xff] }
 0x7a1   : > { %9656 = vmatprep.subr.bf16.mxu1 %v9655_v51  ;;  %9688 = vmatprep.subr.bf16.mxu0 %v9687_v52  ;;  %v9787_v47 = vpack.c.bf16 %v4063_v44, %v4062_v43  ;;  %v4163_v28 = vld [vmem:[#allocation13 + $0x728] sm:$0xff]  ;;  %v9855_v43 = vpack.c.bf16 %v4255_v39, %v4254_v54  ;;  %v4471_v39 = vld [vmem:[#allocation19 + $0x138] sm:$0xff] }
 0x7a2   : > { %v4256_v44 = vld [vmem:[#allocation16 + $0x720] sm:$0xff] }
 0x7a4   : > { %9658 = vmatpush3.bf16.msra.mxu1 %v9655_v51  ;;  %9690 = vmatpush3.bf16.msra.mxu0 %v9687_v52  ;;  %v4065_v51 = vld [vmem:[#allocation16 + $0x698] sm:$0xff]  ;;  %v9759_v52 = vpack.c.bf16 %v3971_v49, %v3970_v46  ;;  %v4164_v49 = vld [vmem:[#allocation13 + $0x730] sm:$0xff] }
 0x7a5   : > { %9692 = vmatprep.subr.bf16.mxu1 %v9691_v58  ;;  %9724 = vmatprep.subr.bf16.mxu0 %v9723_v59  ;;  %v9791_v56 = vpack.c.bf16 %v4065_v51, %v4064_v50  ;;  %v4165_v50 = vld [vmem:[#allocation13 + $0x738] sm:$0xff] }
 0x7a6   : > { %v4258_v51 = vld [vmem:[#allocation16 + $0x730] sm:$0xff] }
 0x7a7   : > { %8026 = vmatmul.mubr.f32.vlgmr.msra.gmra.mrb[6].mxu1 %v11891_v48  ;;  %8061 = vmatmul.mubr.f32.vlgmr.msra.gmra.mrb[10].mxu0 %v11891_v48 }
 0x7a8   : > { %9694 = vmatpush3.bf16.msra.mxu1 %v9691_v58  ;;  %8095 = vmatprep.mubr.f32.mxu1 %v11885_v10  ;;  %v4067_v58 = vld [vmem:[#allocation16 + $0x6a8] sm:$0xff] }
 0x7a9   : > { %9726 = vmatpush3.bf16.msra.mxu0 %v9723_v59  ;;  %8130 = vmatprep.mubr.f32.mxu0 %v11885_v10  ;;  %v9707_v10 = vpack.c.bf16 %v3787_v17, %v3786_v16  ;;  %v9763_v59 = vpack.c.bf16 %v3973_v55, %v3972_v53  ;;  %v9795_v60 = vpack.c.bf16 %v4067_v58, %v4066_v57  ;;  %v3980_v16 = vld [vmem:[#allocation13 + $0x6e0] sm:$0xff]  ;;  %v3981_v17 = vld [vmem:[#allocation13 + $0x6e8] sm:$0xff] }
 0x7aa   : > { %9696 = vmatprep.subr.bf16.mxu1 %v9695_v0  ;;  %9728 = vmatprep.subr.bf16.mxu0 %v9727_v1  ;;  %v9831_v53 = vpack.c.bf16 %v4165_v50, %v4164_v49  ;;  %v4167_v57 = vld [vmem:[#allocation13 + $0x748] sm:$0xff]  ;;  %v4474_v49 = vld [vmem:[#allocation19 + $0x150] sm:$0xff] }
 0x7ab   : > { %v4260_v58 = vld [vmem:[#allocation16 + $0x740] sm:$0xff] }
 0x7ac   : > { %9698 = vmatpush3.bf16.msra.mxu1 %v9695_v0  ;;  %v4069_v0 = vld [vmem:[#allocation16 + $0x6b8] sm:$0xff] }
 0x7ad   : > { %9730 = vmatpush3.bf16.msra.mxu0 %v9727_v1  ;;  %9700 = vmatprep.subr.bf16.mxu1 %v9699_v6  ;;  %v9767_v1 = vpack.c.bf16 %v3975_v62, %v3974_v61  ;;  %v9799_v2 = vpack.c.bf16 %v4069_v0, %v4068_v63  ;;  %v4168_v61 = vld [vmem:[#allocation13 + $0x750] sm:$0xff]  ;;  %v4169_v62 = vld [vmem:[#allocation13 + $0x758] sm:$0xff] }
 0x7ae   : > { %9732 = vmatprep.subr.bf16.mxu0 %v9731_v7  ;;  %v4262_v63 = vld [vmem:[#allocation16 + $0x750] sm:$0xff]  ;;  %v4263_v0 = vld [vmem:[#allocation16 + $0x758] sm:$0xff] }
 0x7b0   : > { %9702 = vmatpush3.bf16.msra.mxu1 %v9699_v6  ;;  %v4071_v6 = vld [vmem:[#allocation16 + $0x6c8] sm:$0xff] }
 0x7b1   : > { %9734 = vmatpush3.bf16.msra.mxu0 %v9731_v7  ;;  %9704 = vmatprep.subr.bf16.mxu1 %v9703_v14  ;;  %v9803_v7 = vpack.c.bf16 %v4071_v6, %v4070_v5  ;;  %v4264_v5 = vld [vmem:[#allocation16 + $0x760] sm:$0xff]  ;;  %v4265_v6 = vld [vmem:[#allocation16 + $0x768] sm:$0xff] }
 0x7b2   : > { %9736 = vmatprep.subr.bf16.mxu0 %v9735_v15 }
 0x7b4   : > { %9706 = vmatpush3.bf16.msra.mxu1 %v9703_v14  ;;  %v9775_v14 = vpack.c.bf16 %v3979_v11, %v3978_v8  ;;  %v4172_v8 = vld [vmem:[#allocation13 + $0x770] sm:$0xff]  ;;  %v4173_v11 = vld [vmem:[#allocation13 + $0x778] sm:$0xff] }
 0x7b5   : > { %9738 = vmatpush3.bf16.msra.mxu0 %v9735_v15  ;;  %9708 = vmatprep.subr.bf16.mxu1 %v9707_v10  ;;  %v9807_v15 = vpack.c.bf16 %v4073_v13, %v4072_v12  ;;  %v4266_v12 = vld [vmem:[#allocation16 + $0x770] sm:$0xff]  ;;  %v4267_v13 = vld [vmem:[#allocation16 + $0x778] sm:$0xff] }
 0x7b6   : > { %9740 = vmatprep.subr.bf16.mxu0 %v9739_v21 }
 0x7b8   : > { %9710 = vmatpush3.bf16.msra.mxu1 %v9707_v10  ;;  %v9779_v10 = vpack.c.bf16 %v3981_v17, %v3980_v16  ;;  %v4362_v16 = vld [vmem:[#allocation22 + $0x100] sm:$0xff]  ;;  %v4363_v17 = vld [vmem:[#allocation22 + $0x108] sm:$0xff] }
 0x7b9   : > { %9742 = vmatpush3.bf16.msra.mxu0 %v9739_v21  ;;  %9712 = vmatprep.subr.bf16.mxu1 %v9711_v29  ;;  %v9811_v21 = vpack.c.bf16 %v4075_v19, %v4074_v18  ;;  %v4464_v18 = vld [vmem:[#allocation19 + $0x100] sm:$0xff]  ;;  %v9883_v19 = vpack.c.bf16 %v4363_v17, %v4362_v16  ;;  %v6141_v17 = vld [vmem:[#allocation14 + $0x2] ss:$0 sm:$0xff] }
 0x7ba   : > { %9744 = vmatprep.subr.bf16.mxu0 %v9743_v30 }
 0x7bc   : > { %9714 = vmatpush3.bf16.msra.mxu1 %v9711_v29  ;;  %v9783_v29 = vpack.c.bf16 %v3983_v23, %v3982_v22  ;;  %v4364_v22 = vld [vmem:[#allocation22 + $0x110] sm:$0xff]  ;;  %v4365_v23 = vld [vmem:[#allocation22 + $0x118] sm:$0xff] }
 0x7bd   : > { %9746 = vmatpush3.bf16.msra.mxu0 %v9743_v30  ;;  %9716 = vmatprep.subr.bf16.mxu1 %v9715_v35  ;;  %v9815_v30 = vpack.c.bf16 %v4077_v24, %v4076_v27  ;;  %v4466_v27 = vld [vmem:[#allocation19 + $0x110] sm:$0xff]  ;;  %v9887_v24 = vpack.c.bf16 %v4365_v23, %v4364_v22 }
 0x7be   : > { %9748 = vmatprep.subr.bf16.mxu0 %v9747_v36 }
 0x7c0   : > { %9718 = vmatpush3.bf16.msra.mxu1 %v9715_v35  ;;  %v9819_v35 = vpack.c.bf16 %v4159_v32, %v4158_v31  ;;  %v4367_v31 = vld [vmem:[#allocation22 + $0x128] sm:$0xff]  ;;  %v4468_v32 = vld [vmem:[#allocation19 + $0x120] sm:$0xff] }
 0x7c1   : > { %9750 = vmatpush3.bf16.msra.mxu0 %v9747_v36  ;;  %9720 = vmatprep.subr.bf16.mxu1 %v9719_v40  ;;  %v9851_v36 = vpack.c.bf16 %v4253_v34, %v4252_v33  ;;  %v4469_v34 = vld [vmem:[#allocation19 + $0x128] sm:$0xff] }
 0x7c2   : > { %9752 = vmatprep.subr.bf16.mxu0 %v9751_v41 }
 0x7c4   : > { %9722 = vmatpush3.bf16.msra.mxu1 %v9719_v40  ;;  %v3966_v40 = vld [vmem:[#allocation4 + $0x1c] sm:$0xff] }
 0x7c5   : > { %9754 = vmatpush3.bf16.msra.mxu0 %v9751_v41  ;;  %9756 = vmatprep.subr.bf16.mxu1 %v9755_v45  ;;  %v9823_v41 = vpack.c.bf16 %v4161_v38, %v4160_v37  ;;  %v4369_v37 = vld [vmem:[#allocation22 + $0x138] sm:$0xff]  ;;  %v4470_v38 = vld [vmem:[#allocation19 + $0x130] sm:$0xff] }
 0x7c6   : > { %9788 = vmatprep.subr.bf16.mxu0 %v9787_v47 }
 0x7c7   : > { %8096 = vmatmul.mubr.f32.vlgmr.msra.gmra.mrb[6].mxu1 %v11882_v9 }
 0x7c8   : > { %8131 = vmatmul.mubr.f32.vlgmr.msra.gmra.mrb[10].mxu0 %v11882_v9  ;;  %9758 = vmatpush3.bf16.msra.mxu1 %v9755_v45  ;;  %v4257_v45 = vld [vmem:[#allocation16 + $0x728] sm:$0xff] }
 0x7c9   : > { %8165 = vmatprep.mubr.f32.mxu1 %v11891_v48  ;;  %9790 = vmatpush3.bf16.msra.mxu0 %v9787_v47  ;;  %v9827_v47 = vpack.c.bf16 %v4163_v28, %v4162_v42  ;;  %v9859_v46 = vpack.c.bf16 %v4257_v45, %v4256_v44  ;;  %v4371_v42 = vld [vmem:[#allocation22 + $0x148] sm:$0xff]  ;;  %v4472_v28 = vld [vmem:[#allocation19 + $0x140] sm:$0xff] }
 0x7ca   : > { %8200 = vmatprep.mubr.f32.mxu0 %v11891_v48  ;;  %9760 = vmatprep.subr.bf16.mxu1 %v9759_v52  ;;  %v9771_v48 = vpack.c.bf16 %v3977_v4, %v3976_v3  ;;  %v4170_v3 = vld [vmem:[#allocation13 + $0x760] sm:$0xff]  ;;  %v4171_v4 = vld [vmem:[#allocation13 + $0x768] sm:$0xff]  ;;  %v4473_v44 = vld [vmem:[#allocation19 + $0x148] sm:$0xff] }
 0x7cb   : > { %9792 = vmatprep.subr.bf16.mxu0 %v9791_v56  ;;  %v9931_v45 = vpack.c.bf16 %v4473_v44, %v4472_v28  ;;  %v4578_v28 = vld [vmem:[#allocation13 + $0x7b0] sm:$0xff] }
 0x7cc   : > { %9762 = vmatpush3.bf16.msra.mxu1 %v9759_v52  ;;  %v4259_v52 = vld [vmem:[#allocation16 + $0x738] sm:$0xff]  ;;  %v4678_v44 = vld [vmem:[#allocation16 + $0x7b0] sm:$0xff] }
 0x7cd   : > { %9794 = vmatpush3.bf16.msra.mxu0 %v9791_v56  ;;  %9764 = vmatprep.subr.bf16.mxu1 %v9763_v59  ;;  %v9863_v55 = vpack.c.bf16 %v4259_v52, %v4258_v51  ;;  %v4166_v56 = vld [vmem:[#allocation13 + $0x740] sm:$0xff]  ;;  %v4374_v52 = vld [vmem:[#allocation22 + $0x160] sm:$0xff] }
 0x7ce   : > { %9796 = vmatprep.subr.bf16.mxu0 %v9795_v60  ;;  %v4475_v51 = vld [vmem:[#allocation19 + $0x158] sm:$0xff] }
 0x7d0   : > { %9766 = vmatpush3.bf16.msra.mxu1 %v9763_v59  ;;  %v4261_v59 = vld [vmem:[#allocation16 + $0x748] sm:$0xff] }
 0x7d1   : > { %9798 = vmatpush3.bf16.msra.mxu0 %v9795_v60  ;;  %9768 = vmatprep.subr.bf16.mxu1 %v9767_v1  ;;  %v9867_v60 = vpack.c.bf16 %v4261_v59, %v4260_v58  ;;  %v4477_v58 = vld [vmem:[#allocation19 + $0x168] sm:$0xff]  ;;  %v4376_v59 = vld [vmem:[#allocation22 + $0x170] sm:$0xff] }
 0x7d2   : > { %9800 = vmatprep.subr.bf16.mxu0 %v9799_v2 }
 0x7d4   : > { %9770 = vmatpush3.bf16.msra.mxu1 %v9767_v1  ;;  %v9839_v1 = vpack.c.bf16 %v4169_v62, %v4168_v61  ;;  %v4478_v61 = vld [vmem:[#allocation19 + $0x170] sm:$0xff]  ;;  %v4479_v62 = vld [vmem:[#allocation19 + $0x178] sm:$0xff] }
 0x7d5   : > { %9802 = vmatpush3.bf16.msra.mxu0 %v9799_v2  ;;  %9772 = vmatprep.subr.bf16.mxu1 %v9771_v48  ;;  %v9871_v2 = vpack.c.bf16 %v4263_v0, %v4262_v63  ;;  %v9943_v0 = vpack.c.bf16 %v4479_v62, %v4478_v61  ;;  %v4584_v62 = vld [vmem:[#allocation13 + $0x7e0] sm:$0xff] }
 0x7d6   : > { %9804 = vmatprep.subr.bf16.mxu0 %v9803_v7 }
 0x7d8   : > { %9774 = vmatpush3.bf16.msra.mxu1 %v9771_v48  ;;  %v9843_v48 = vpack.c.bf16 %v4171_v4, %v4170_v3  ;;  %v4672_v3 = vld [vmem:[#allocation16 + $0x780] sm:$0xff] }
 0x7d9   : > { %9806 = vmatpush3.bf16.msra.mxu0 %v9803_v7  ;;  %9776 = vmatprep.subr.bf16.mxu1 %v9775_v14  ;;  %v9875_v7 = vpack.c.bf16 %v4265_v6, %v4264_v5  ;;  %v4673_v5 = vld [vmem:[#allocation16 + $0x788] sm:$0xff] }
 0x7da   : > { %9808 = vmatprep.subr.bf16.mxu0 %v9807_v15  ;;  %v9979_v6 = vpack.c.bf16 %v4673_v5, %v4672_v3  ;;  %v4587_v5 = vld [vmem:[#allocation13 + $0x7f8] sm:$0xff] }
 0x7dc   : > { %9778 = vmatpush3.bf16.msra.mxu1 %v9775_v14  ;;  %v9847_v14 = vpack.c.bf16 %v4173_v11, %v4172_v8 }
 0x7dd   : > { %9810 = vmatpush3.bf16.msra.mxu0 %v9807_v15  ;;  %9780 = vmatprep.subr.bf16.mxu1 %v9779_v10  ;;  %v9879_v15 = vpack.c.bf16 %v4267_v13, %v4266_v12 }
 0x7de   : > { %9812 = vmatprep.subr.bf16.mxu0 %v9811_v21 }
 0x7e0   : > { %9782 = vmatpush3.bf16.msra.mxu1 %v9779_v10  ;;  %v4465_v10 = vld [vmem:[#allocation19 + $0x108] sm:$0xff] }
 0x7e1   : > { %9814 = vmatpush3.bf16.msra.mxu0 %v9811_v21  ;;  %9784 = vmatprep.subr.bf16.mxu1 %v9783_v29  ;;  %v9915_v21 = vpack.c.bf16 %v4465_v10, %v4464_v18 }
 0x7e2   : > { %9816 = vmatprep.subr.bf16.mxu0 %v9815_v30 }
 0x7e4   : > { %9786 = vmatpush3.bf16.msra.mxu1 %v9783_v29  ;;  %v4467_v29 = vld [vmem:[#allocation19 + $0x118] sm:$0xff] }
 0x7e5   : > { %9818 = vmatpush3.bf16.msra.mxu0 %v9815_v30  ;;  %9820 = vmatprep.subr.bf16.mxu1 %v9819_v35  ;;  %v9919_v30 = vpack.c.bf16 %v4467_v29, %v4466_v27  ;;  %v4574_v29 = vld [vmem:[#allocation13 + $0x790] sm:$0xff] }
 0x7e6   : > { %9852 = vmatprep.subr.bf16.mxu0 %v9851_v36 }
 0x7e7   : > { %8166 = vmatmul.mubr.f32.vlgmr.msra.gmra.mrb[6].mxu1 %v3966_v40 }
 0x7e8   : > { %8201 = vmatmul.mubr.f32.vlgmr.msra.gmra.mrb[10].mxu0 %v3966_v40  ;;  %9822 = vmatpush3.bf16.msra.mxu1 %v9819_v35  ;;  %v9923_v35 = vpack.c.bf16 %v4469_v34, %v4468_v32  ;;  %v9927_v40 = vpack.c.bf16 %v4471_v39, %v4470_v38  ;;  %v4675_v32 = vld [vmem:[#allocation16 + $0x798] sm:$0xff]  ;;  %v4676_v39 = vld [vmem:[#allocation16 + $0x7a0] sm:$0xff] }
 0x7e9   : > { %8235 = vmatprep.mubr.f32.mxu1 %v11882_v9  ;;  %9854 = vmatpush3.bf16.msra.mxu0 %v9851_v36  ;;  %v4368_v36 = vld [vmem:[#allocation22 + $0x130] sm:$0xff] }
 0x7ea   : > { %8270 = vmatprep.mubr.f32.mxu0 %v11882_v9  ;;  %9824 = vmatprep.subr.bf16.mxu1 %v9823_v41  ;;  %v9835_v9 = vpack.c.bf16 %v4167_v57, %v4166_v56  ;;  %v9895_v54 = vpack.c.bf16 %v4369_v37, %v4368_v36  ;;  %v4476_v57 = vld [vmem:[#allocation19 + $0x160] sm:$0xff]  ;;  %v4576_v38 = vld [vmem:[#allocation13 + $0x7a0] sm:$0xff] }
 0x7eb   : > { %9856 = vmatprep.subr.bf16.mxu0 %v9855_v43 }
 0x7ec   : > { %9826 = vmatpush3.bf16.msra.mxu1 %v9823_v41  ;;  %v4370_v41 = vld [vmem:[#allocation22 + $0x140] sm:$0xff] }
 0x7ed   : > { %9858 = vmatpush3.bf16.msra.mxu0 %v9855_v43  ;;  %9828 = vmatprep.subr.bf16.mxu1 %v9827_v47  ;;  %v9899_v43 = vpack.c.bf16 %v4371_v42, %v4370_v41 }
 0x7ee   : > { %9860 = vmatprep.subr.bf16.mxu0 %v9859_v46 }
 0x7f0   : > { %9830 = vmatpush3.bf16.msra.mxu1 %v9827_v47  ;;  %v4372_v47 = vld [vmem:[#allocation22 + $0x150] sm:$0xff] }
 0x7f1   : > { %9862 = vmatpush3.bf16.msra.mxu0 %v9859_v46  ;;  %9832 = vmatprep.subr.bf16.mxu1 %v9831_v53  ;;  %v4373_v46 = vld [vmem:[#allocation22 + $0x158] sm:$0xff] }
 0x7f2   : > { %9864 = vmatprep.subr.bf16.mxu0 %v9863_v55  ;;  %v9903_v50 = vpack.c.bf16 %v4373_v46, %v4372_v47  ;;  %v11905_v47 = vld [vmem:[#allocation4 + $0x8] sm:$0xff] }
 0x7f4   : > { %9834 = vmatpush3.bf16.msra.mxu1 %v9831_v53  ;;  %v4375_v53 = vld [vmem:[#allocation22 + $0x168] sm:$0xff] }
 0x7f5   : > { %9866 = vmatpush3.bf16.msra.mxu0 %v9863_v55  ;;  %9836 = vmatprep.subr.bf16.mxu1 %v9835_v9  ;;  %v9935_v55 = vpack.c.bf16 %v4475_v51, %v4474_v49  ;;  %v9907_v56 = vpack.c.bf16 %v4375_v53, %v4374_v52  ;;  %v4581_v51 = vld [vmem:[#allocation13 + $0x7c8] sm:$0xff] }
 0x7f6   : > { %9868 = vmatprep.subr.bf16.mxu0 %v9867_v60  ;;  %v4680_v52 = vld [vmem:[#allocation16 + $0x7c0] sm:$0xff]  ;;  %v4681_v53 = vld [vmem:[#allocation16 + $0x7c8] sm:$0xff] }
 0x7f8   : > { %9838 = vmatpush3.bf16.msra.mxu1 %v9835_v9  ;;  %v9939_v9 = vpack.c.bf16 %v4477_v58, %v4476_v57  ;;  %v4582_v57 = vld [vmem:[#allocation13 + $0x7d0] sm:$0xff]  ;;  %v4583_v58 = vld [vmem:[#allocation13 + $0x7d8] sm:$0xff] }
 0x7f9   : > { %9870 = vmatpush3.bf16.msra.mxu0 %v9867_v60  ;;  %9840 = vmatprep.subr.bf16.mxu1 %v9839_v1  ;;  %v4377_v60 = vld [vmem:[#allocation22 + $0x178] sm:$0xff] }
 0x7fa   : > { %9872 = vmatprep.subr.bf16.mxu0 %v9871_v2  ;;  %v9911_v63 = vpack.c.bf16 %v4377_v60, %v4376_v59  ;;  %v4682_v59 = vld [vmem:[#allocation16 + $0x7d0] sm:$0xff]  ;;  %v9967_v60 = vpack.c.bf16 %v4583_v58, %v4582_v57 }
 0x7fb   : > { %v4789_v57 = vld [vmem:[#allocation13 + $0x878] sm:$0xff] }
 0x7fc   : > { %9842 = vmatpush3.bf16.msra.mxu1 %v9839_v1  ;;  %v4572_v1 = vld [vmem:[#allocation13 + $0x780] sm:$0xff]  ;;  %v4882_v58 = vld [vmem:[#allocation16 + $0x870] sm:$0xff] }
 0x7fd   : > { %9874 = vmatpush3.bf16.msra.mxu0 %v9871_v2  ;;  %9844 = vmatprep.subr.bf16.mxu1 %v9843_v48  ;;  %v4573_v2 = vld [vmem:[#allocation13 + $0x788] sm:$0xff] }
 0x7fe   : > { %9876 = vmatprep.subr.bf16.mxu0 %v9875_v7  ;;  %v9947_v4 = vpack.c.bf16 %v4573_v2, %v4572_v1  ;;  %v4685_v1 = vld [vmem:[#allocation16 + $0x7e8] sm:$0xff] }
 0x800   : > { %9846 = vmatpush3.bf16.msra.mxu1 %v9843_v48  ;;  %v6142_v48 = vld [vmem:[#allocation17 + $0x2] ss:$0 sm:$0xff] }
 0x801   : > { %9878 = vmatpush3.bf16.msra.mxu0 %v9875_v7  ;;  %9848 = vmatprep.subr.bf16.mxu1 %v9847_v14 }
 0x802   : > { %9880 = vmatprep.subr.bf16.mxu0 %v9879_v15 }
 0x804   : > { %9850 = vmatpush3.bf16.msra.mxu1 %v9847_v14 }
 0x805   : > { %9882 = vmatpush3.bf16.msra.mxu0 %v9879_v15  ;;  %9884 = vmatprep.subr.bf16.mxu1 %v9883_v19 }
 0x806   : > { %9916 = vmatprep.subr.bf16.mxu0 %v9915_v21 }
 0x807   : > { %8236 = vmatmul.mubr.f32.vlgmr.msra.gmra.mrb[6].mxu1 %v11877_v26 }
 0x808   : > { %8271 = vmatmul.mubr.f32.vlgmr.msra.gmra.mrb[10].mxu0 %v11877_v26  ;;  %9886 = vmatpush3.bf16.msra.mxu1 %v9883_v19  ;;  %v4366_v26 = vld [vmem:[#allocation22 + $0x120] sm:$0xff] }
 0x809   : > { %9918 = vmatpush3.bf16.msra.mxu0 %v9915_v21  ;;  %9888 = vmatprep.subr.bf16.mxu1 %v9887_v24  ;;  %v9891_v33 = vpack.c.bf16 %v4367_v31, %v4366_v26  ;;  %v4575_v26 = vld [vmem:[#allocation13 + $0x798] sm:$0xff] }
 0x80a   : > { %9920 = vmatprep.subr.bf16.mxu0 %v9919_v30  ;;  %v4674_v31 = vld [vmem:[#allocation16 + $0x790] sm:$0xff]  ;;  %v9951_v36 = vpack.c.bf16 %v4575_v26, %v4574_v29  ;;  %v4873_v29 = vld [vmem:[#allocation16 + $0x828] sm:$0xff] }
 0x80b   : > { %v9983_v37 = vpack.c.bf16 %v4675_v32, %v4674_v31  ;;  %v4780_v31 = vld [vmem:[#allocation13 + $0x830] sm:$0xff]  ;;  %v4781_v32 = vld [vmem:[#allocation13 + $0x838] sm:$0xff] }
 0x80c   : > { %9890 = vmatpush3.bf16.msra.mxu1 %v9887_v24 }
 0x80d   : > { %9922 = vmatpush3.bf16.msra.mxu0 %v9919_v30  ;;  %9892 = vmatprep.subr.bf16.mxu1 %v9891_v33 }
 0x80e   : > { %9924 = vmatprep.subr.bf16.mxu0 %v9923_v35 }
 0x810   : > { %9894 = vmatpush3.bf16.msra.mxu1 %v9891_v33 }
 0x811   : > { %9926 = vmatpush3.bf16.msra.mxu0 %v9923_v35  ;;  %9896 = vmatprep.subr.bf16.mxu1 %v9895_v54 }
 0x812   : > { %9928 = vmatprep.subr.bf16.mxu0 %v9927_v40 }
 0x814   : > { %9898 = vmatpush3.bf16.msra.mxu1 %v9895_v54  ;;  %v4577_v54 = vld [vmem:[#allocation13 + $0x7a8] sm:$0xff] }
 0x815   : > { %9930 = vmatpush3.bf16.msra.mxu0 %v9927_v40  ;;  %9900 = vmatprep.subr.bf16.mxu1 %v9899_v43  ;;  %v4677_v40 = vld [vmem:[#allocation16 + $0x7a8] sm:$0xff]  ;;  %v9955_v41 = vpack.c.bf16 %v4577_v54, %v4576_v38  ;;  %v4876_v54 = vld [vmem:[#allocation16 + $0x840] sm:$0xff] }
 0x816   : > { %9932 = vmatprep.subr.bf16.mxu0 %v9931_v45  ;;  %v9987_v42 = vpack.c.bf16 %v4677_v40, %v4676_v39  ;;  %v4783_v38 = vld [vmem:[#allocation13 + $0x848] sm:$0xff] }
 0x817   : > { %v4877_v39 = vld [vmem:[#allocation16 + $0x848] sm:$0xff] }
 0x818   : > { %9902 = vmatpush3.bf16.msra.mxu1 %v9899_v43  ;;  %v4579_v43 = vld [vmem:[#allocation13 + $0x7b8] sm:$0xff] }
 0x819   : > { %9934 = vmatpush3.bf16.msra.mxu0 %v9931_v45  ;;  %9904 = vmatprep.subr.bf16.mxu1 %v9903_v50  ;;  %v4679_v45 = vld [vmem:[#allocation16 + $0x7b8] sm:$0xff]  ;;  %v9959_v46 = vpack.c.bf16 %v4579_v43, %v4578_v28  ;;  %v4878_v43 = vld [vmem:[#allocation16 + $0x850] sm:$0xff] }
 0x81a   : > { %9936 = vmatprep.subr.bf16.mxu0 %v9935_v55  ;;  %v9991_v49 = vpack.c.bf16 %v4679_v45, %v4678_v44  ;;  %v4785_v28 = vld [vmem:[#allocation13 + $0x858] sm:$0xff] }
 0x81b   : > { %v4879_v45 = vld [vmem:[#allocation16 + $0x858] sm:$0xff] }
 0x81c   : > { %9906 = vmatpush3.bf16.msra.mxu1 %v9903_v50  ;;  %v4580_v50 = vld [vmem:[#allocation13 + $0x7c0] sm:$0xff] }
 0x81d   : > { %9938 = vmatpush3.bf16.msra.mxu0 %v9935_v55  ;;  %9908 = vmatprep.subr.bf16.mxu1 %v9907_v56  ;;  %v9963_v55 = vpack.c.bf16 %v4581_v51, %v4580_v50  ;;  %v4787_v50 = vld [vmem:[#allocation13 + $0x868] sm:$0xff] }
 0x81e   : > { %9940 = vmatprep.subr.bf16.mxu0 %v9939_v9  ;;  %v4880_v51 = vld [vmem:[#allocation16 + $0x860] sm:$0xff] }
 0x820   : > { %9910 = vmatpush3.bf16.msra.mxu1 %v9907_v56  ;;  %v9995_v56 = vpack.c.bf16 %v4681_v53, %v4680_v52  ;;  %v4881_v53 = vld [vmem:[#allocation16 + $0x868] sm:$0xff] }
 0x821   : > { %9942 = vmatpush3.bf16.msra.mxu0 %v9939_v9  ;;  %9912 = vmatprep.subr.bf16.mxu1 %v9911_v63  ;;  %v4683_v9 = vld [vmem:[#allocation16 + $0x7d8] sm:$0xff] }
 0x822   : > { %9944 = vmatprep.subr.bf16.mxu0 %v9943_v0  ;;  %v9999_v61 = vpack.c.bf16 %v4683_v9, %v4682_v59  ;;  %v4883_v9 = vld [vmem:[#allocation16 + $0x878] sm:$0xff] }
 0x824   : > { %9914 = vmatpush3.bf16.msra.mxu1 %v9911_v63  ;;  %v4585_v63 = vld [vmem:[#allocation13 + $0x7e8] sm:$0xff] }
 0x825   : > { %9946 = vmatpush3.bf16.msra.mxu0 %v9943_v0  ;;  %9948 = vmatprep.subr.bf16.mxu1 %v9947_v4  ;;  %v4684_v0 = vld [vmem:[#allocation16 + $0x7e0] sm:$0xff]  ;;  %v9971_v2 = vpack.c.bf16 %v4585_v63, %v4584_v62 }
 0x826   : > { %9980 = vmatprep.subr.bf16.mxu0 %v9979_v6  ;;  %v10003_v3 = vpack.c.bf16 %v4685_v1, %v4684_v0  ;;  %v4965_v62 = vld [vmem:[#allocation13 + $0x888] sm:$0xff] }
 0x827   : > { %v5058_v63 = vld [vmem:[#allocation16 + $0x880] sm:$0xff]  ;;  %v5059_v1 = vld [vmem:[#allocation16 + $0x888] sm:$0xff] }
 0x8da   : > { %v8237_v7 = vpop.f32.mrb[6].mxu1 }
 0x8db   : > { %v8272_v8 = vpop.f32.mrb[10].mxu0  ;;  %v4240_v11 = vpop.f32.mrb[7].mxu1  ;;  %v10347_v18 = vadd.f32 %v8237_v7, %v6141_v17 }
 0x8dc   : > { %v10349_v12 = vadd.f32 %v8272_v8, %v6142_v48  ;;  %v4334_v13 = vpop.f32.mrb[11].mxu0  ;;  %v10348_v19 = vadd.f32 %v6141_v17, %v4240_v11  ;;  %v4774_v11 = vld [vmem:[#allocation13 + $0x800] sm:$0xff]  ;;  %v4776_v17 = vld [vmem:[#allocation13 + $0x810] sm:$0xff] }
 0x8dd   : > { %v10350_v14 = vadd.f32 %v6142_v48, %v4334_v13  ;;  %v4687_v48 = vld [vmem:[#allocation16 + $0x7f8] sm:$0xff]  ;;  %v4868_v13 = vld [vmem:[#allocation16 + $0x800] sm:$0xff] }
 0x8de   : > { %v6144_v15 = vmul.f32 -1.442695, %v10349_v12  ;;  %v4775_v12 = vld [vmem:[#allocation13 + $0x808] sm:$0xff] }
 0x8df   : > { %v6143_v16 = vmul.f32 -1.442695, %v10350_v14  ;;  %v4869_v14 = vld [vmem:[#allocation16 + $0x808] sm:$0xff] }
 0x8e0   : > { %10651 = vpow2.f32 %v6144_v15  ;;  %v10011_v15 = vpack.c.bf16 %v4775_v12, %v4774_v11  ;;  %v4966_v11 = vld [vmem:[#allocation13 + $0x890] sm:$0xff]  ;;  %v10682_v12 = vld [vmem:[#allocation4 + $0x10] sm:$0xff] }
 0x8e1   : > { %10653 = vpow2.f32 %v6143_v16  ;;  %v10043_v16 = vpack.c.bf16 %v4869_v14, %v4868_v13  ;;  %v4967_v14 = vld [vmem:[#allocation13 + $0x898] sm:$0xff] }
 0x8e2   : > { %10655 = vtanh.f32 %v10347_v18  ;;  %v4777_v18 = vld [vmem:[#allocation13 + $0x818] sm:$0xff] }
 0x8e3   : > { %10657 = vtanh.f32 %v10348_v19  ;;  %v4870_v19 = vld [vmem:[#allocation16 + $0x810] sm:$0xff] }
 0x8ea   : > { %v10652_v10 = vpop.eup %10651 }
 0x8eb   : > { %v10654_v21 = vpop.eup %10653  ;;  %v4354_v22 = vadd.f32 1.0, %v10652_v10  ;;  %v4871_v10 = vld [vmem:[#allocation16 + $0x818] sm:$0xff] }
 0x8ec   : > { %v4353_v23 = vadd.f32 1.0, %v10654_v21  ;;  %v10656_v27 = vpop.eup %10655  ;;  %v10015_v21 = vpack.c.bf16 %v4777_v18, %v4776_v17 }
 0x8ed   : > { %10659 = vrcp.f32 %v4354_v22  ;;  %v10658_v24 = vpop.eup %10657  ;;  %v10047_v22 = vpack.c.bf16 %v4871_v10, %v4870_v19  ;;  %v4968_v19 = vld [vmem:[#allocation13 + $0x8a0] sm:$0xff]  ;;  %v10079_v10 = vpack.c.bf16 %v4967_v14, %v4966_v11  ;;  %v5253_v11 = vld [vmem:[#allocation16 + $0x928] sm:$0xff] }
 0x8ee   : > { %10661 = vrcp.f32 %v4353_v23  ;;  %v4778_v23 = vld [vmem:[#allocation13 + $0x820] sm:$0xff]  ;;  %v5160_v14 = vld [vmem:[#allocation13 + $0x930] sm:$0xff] }
 0x8f7   : > { %v10660_v30 = vpop.eup %10659 }
 0x8f8   : > { %v10662_v33 = vpop.eup %10661  ;;  %v4360_v34 = vmul.f32 %v10660_v30, %v10656_v27  ;;  %v4779_v27 = vld [vmem:[#allocation13 + $0x828] sm:$0xff] }
 0x8f9   : > { %v4359_v35 = vmul.f32 %v10662_v33, %v10658_v24  ;;  %v4872_v24 = vld [vmem:[#allocation16 + $0x820] sm:$0xff]  ;;  %v10019_v30 = vpack.c.bf16 %v4779_v27, %v4778_v23  ;;  %v4874_v33 = vld [vmem:[#allocation16 + $0x830] sm:$0xff]  ;;  %v5063_v27 = vld [vmem:[#allocation16 + $0x8a8] sm:$0xff] }
 0x8fa   : > { %v10051_v26 = vpack.c.bf16 %v4873_v29, %v4872_v24  ;;  %v5062_v23 = vld [vmem:[#allocation16 + $0x8a0] sm:$0xff] }
 0x8fb   : > { %8305 = vmatprep.mubr.f32.mxu1 %v4359_v35  ;;  %8340 = vmatprep.mubr.f32.mxu0 %v4359_v35  ;;  %v10023_v35 = vpack.c.bf16 %v4781_v32, %v4780_v31  ;;  %v10115_v29 = vpack.c.bf16 %v5063_v27, %v5062_v23  ;;  %v5064_v31 = vld [vmem:[#allocation16 + $0x8b0] sm:$0xff]  ;;  %v5065_v32 = vld [vmem:[#allocation16 + $0x8b8] sm:$0xff]  ;;  %v5256_v23 = vld [vmem:[#allocation16 + $0x940] sm:$0xff] }
 0x8fc   : > { %8306 = vmatmul.mubr.f32.vlgmr.msra.gmra.mrb[2].mxu1 %v4360_v34  ;;  %8341 = vmatmul.mubr.f32.vlgmr.msra.gmra.mrb[12].mxu0 %v4360_v34  ;;  %v4875_v34 = vld [vmem:[#allocation16 + $0x838] sm:$0xff]  ;;  %v5257_v27 = vld [vmem:[#allocation16 + $0x948] sm:$0xff] }
 0x8fd   : > { %9950 = vmatpush3.bf16.msra.mxu1 %v9947_v4  ;;  %9982 = vmatpush3.bf16.msra.mxu0 %v9979_v6  ;;  %v4586_v4 = vld [vmem:[#allocation13 + $0x7f0] sm:$0xff] }
 0x8fe   : > { %9952 = vmatprep.subr.bf16.mxu1 %v9951_v36  ;;  %9984 = vmatprep.subr.bf16.mxu0 %v9983_v37  ;;  %v4686_v6 = vld [vmem:[#allocation16 + $0x7f0] sm:$0xff]  ;;  %v9975_v7 = vpack.c.bf16 %v4587_v5, %v4586_v4 }
 0x8ff   : > { %8375 = vmatprep.mubr.f32.mxu1 %v11905_v47  ;;  %8410 = vmatprep.mubr.f32.mxu0 %v11905_v47  ;;  %v10007_v8 = vpack.c.bf16 %v4687_v48, %v4686_v6 }
 0x901   : > { %9954 = vmatpush3.bf16.msra.mxu1 %v9951_v36  ;;  %9986 = vmatpush3.bf16.msra.mxu0 %v9983_v37  ;;  %v10055_v36 = vpack.c.bf16 %v4875_v34, %v4874_v33  ;;  %v4782_v37 = vld [vmem:[#allocation13 + $0x840] sm:$0xff]  ;;  %v10119_v34 = vpack.c.bf16 %v5065_v32, %v5064_v31 }
 0x902   : > { %9956 = vmatprep.subr.bf16.mxu1 %v9955_v41  ;;  %9988 = vmatprep.subr.bf16.mxu0 %v9987_v42  ;;  %v10027_v40 = vpack.c.bf16 %v4783_v38, %v4782_v37  ;;  %v5066_v37 = vld [vmem:[#allocation16 + $0x8c0] sm:$0xff]  ;;  %v5067_v38 = vld [vmem:[#allocation16 + $0x8c8] sm:$0xff]  ;;  %v5259_v31 = vld [vmem:[#allocation16 + $0x958] sm:$0xff] }
 0x905   : > { %9958 = vmatpush3.bf16.msra.mxu1 %v9955_v41  ;;  %9990 = vmatpush3.bf16.msra.mxu0 %v9987_v42  ;;  %v10059_v41 = vpack.c.bf16 %v4877_v39, %v4876_v54  ;;  %v4784_v42 = vld [vmem:[#allocation13 + $0x850] sm:$0xff]  ;;  %v10123_v39 = vpack.c.bf16 %v5067_v38, %v5066_v37 }
 0x906   : > { %9960 = vmatprep.subr.bf16.mxu1 %v9959_v46  ;;  %9992 = vmatprep.subr.bf16.mxu0 %v9991_v49  ;;  %v10031_v44 = vpack.c.bf16 %v4785_v28, %v4784_v42  ;;  %v5068_v42 = vld [vmem:[#allocation16 + $0x8d0] sm:$0xff]  ;;  %v5069_v28 = vld [vmem:[#allocation16 + $0x8d8] sm:$0xff]  ;;  %v5261_v37 = vld [vmem:[#allocation16 + $0x968] sm:$0xff] }
 0x909   : > { %9962 = vmatpush3.bf16.msra.mxu1 %v9959_v46  ;;  %9994 = vmatpush3.bf16.msra.mxu0 %v9991_v49  ;;  %v10063_v46 = vpack.c.bf16 %v4879_v45, %v4878_v43  ;;  %v4786_v49 = vld [vmem:[#allocation13 + $0x860] sm:$0xff] }
 0x90a   : > { %9964 = vmatprep.subr.bf16.mxu1 %v9963_v55  ;;  %9996 = vmatprep.subr.bf16.mxu0 %v9995_v56  ;;  %v10035_v52 = vpack.c.bf16 %v4787_v50, %v4786_v49  ;;  %v4976_v45 = vld [vmem:[#allocation13 + $0x8e0] sm:$0xff]  ;;  %v5071_v50 = vld [vmem:[#allocation16 + $0x8e8] sm:$0xff] }
 0x90b   : > { %v5070_v49 = vld [vmem:[#allocation16 + $0x8e0] sm:$0xff] }
 0x90d   : > { %9966 = vmatpush3.bf16.msra.mxu1 %v9963_v55  ;;  %9998 = vmatpush3.bf16.msra.mxu0 %v9995_v56  ;;  %v10067_v55 = vpack.c.bf16 %v4881_v53, %v4880_v51  ;;  %v4788_v56 = vld [vmem:[#allocation13 + $0x870] sm:$0xff] }
 0x90e   : > { %9968 = vmatprep.subr.bf16.mxu1 %v9967_v60  ;;  %10000 = vmatprep.subr.bf16.mxu0 %v9999_v61  ;;  %v10039_v59 = vpack.c.bf16 %v4789_v57, %v4788_v56  ;;  %v4978_v53 = vld [vmem:[#allocation13 + $0x8f0] sm:$0xff]  ;;  %v5073_v57 = vld [vmem:[#allocation16 + $0x8f8] sm:$0xff] }
 0x90f   : > { %v5072_v56 = vld [vmem:[#allocation16 + $0x8f0] sm:$0xff] }
 0x911   : > { %9970 = vmatpush3.bf16.msra.mxu1 %v9967_v60  ;;  %10002 = vmatpush3.bf16.msra.mxu0 %v9999_v61  ;;  %v10071_v60 = vpack.c.bf16 %v4883_v9, %v4882_v58  ;;  %v4964_v61 = vld [vmem:[#allocation13 + $0x880] sm:$0xff] }
 0x912   : > { %9972 = vmatprep.subr.bf16.mxu1 %v9971_v2  ;;  %10004 = vmatprep.subr.bf16.mxu0 %v10003_v3  ;;  %v10075_v0 = vpack.c.bf16 %v4965_v62, %v4964_v61  ;;  %v5154_v9 = vld [vmem:[#allocation13 + $0x900] sm:$0xff]  ;;  %v5249_v62 = vld [vmem:[#allocation16 + $0x908] sm:$0xff] }
 0x913   : > { %v5248_v61 = vld [vmem:[#allocation16 + $0x900] sm:$0xff] }
 0x915   : > { %9974 = vmatpush3.bf16.msra.mxu1 %v9971_v2  ;;  %10006 = vmatpush3.bf16.msra.mxu0 %v10003_v3  ;;  %v10107_v2 = vpack.c.bf16 %v5059_v1, %v5058_v63  ;;  %v6146_v3 = vld [vmem:[#allocation20 + $0x2] ss:$0 sm:$0xff]  ;;  %v5156_v1 = vld [vmem:[#allocation13 + $0x910] sm:$0xff] }
 0x916   : > { %9976 = vmatprep.subr.bf16.mxu1 %v9975_v7  ;;  %10008 = vmatprep.subr.bf16.mxu0 %v10007_v8 }
 0x919   : > { %9978 = vmatpush3.bf16.msra.mxu1 %v9975_v7  ;;  %10010 = vmatpush3.bf16.msra.mxu0 %v10007_v8  ;;  %v10681_v7 = vld [vmem:[#allocation4 + $0x18] sm:$0xff] }
 0x91a   : > { %10012 = vmatprep.subr.bf16.mxu1 %v10011_v15  ;;  %10044 = vmatprep.subr.bf16.mxu0 %v10043_v16 }
 0x91c   : > { %8376 = vmatmul.mubr.f32.vlgmr.msra.gmra.mrb[8].mxu1 %v11905_v47  ;;  %8411 = vmatmul.mubr.f32.vlgmr.msra.gmra.mrb[14].mxu0 %v11905_v47 }
 0x91d   : > { %10014 = vmatpush3.bf16.msra.mxu1 %v10011_v15  ;;  %10046 = vmatpush3.bf16.msra.mxu0 %v10043_v16  ;;  %v5060_v15 = vld [vmem:[#allocation16 + $0x890] sm:$0xff]  ;;  %v5061_v16 = vld [vmem:[#allocation16 + $0x898] sm:$0xff] }
 0x91e   : > { %10016 = vmatprep.subr.bf16.mxu1 %v10015_v21  ;;  %10048 = vmatprep.subr.bf16.mxu0 %v10047_v22 }
 0x91f   : > { %8445 = vmatprep.mubr.f32.mxu1 %v11905_v47  ;;  %8480 = vmatprep.mubr.f32.mxu0 %v11905_v47 }
 0x921   : > { %10018 = vmatpush3.bf16.msra.mxu1 %v10015_v21  ;;  %10050 = vmatpush3.bf16.msra.mxu0 %v10047_v22  ;;  %v10111_v21 = vpack.c.bf16 %v5061_v16, %v5060_v15  ;;  %v4969_v22 = vld [vmem:[#allocation13 + $0x8a8] sm:$0xff]  ;;  %v5161_v15 = vld [vmem:[#allocation13 + $0x938] sm:$0xff] }
 0x922   : > { %10020 = vmatprep.subr.bf16.mxu1 %v10019_v30  ;;  %10052 = vmatprep.subr.bf16.mxu0 %v10051_v26  ;;  %v10083_v24 = vpack.c.bf16 %v4969_v22, %v4968_v19  ;;  %v5254_v16 = vld [vmem:[#allocation16 + $0x930] sm:$0xff]  ;;  %v10151_v19 = vpack.c.bf16 %v5161_v15, %v5160_v14  ;;  %v5163_v22 = vld [vmem:[#allocation13 + $0x948] sm:$0xff] }
 0x923   : > { %v5355_v14 = vld [vmem:[#allocation13 + $0x9d8] sm:$0xff] }
 0x924   : > { %v5448_v15 = vld [vmem:[#allocation16 + $0x9d0] sm:$0xff] }
 0x925   : > { %10022 = vmatpush3.bf16.msra.mxu1 %v10019_v30  ;;  %10054 = vmatpush3.bf16.msra.mxu0 %v10051_v26  ;;  %v4970_v30 = vld [vmem:[#allocation13 + $0x8b0] sm:$0xff]  ;;  %v4971_v26 = vld [vmem:[#allocation13 + $0x8b8] sm:$0xff] }
 0x926   : > { %10024 = vmatprep.subr.bf16.mxu1 %v10023_v35  ;;  %10056 = vmatprep.subr.bf16.mxu0 %v10055_v36  ;;  %v10087_v33 = vpack.c.bf16 %v4971_v26, %v4970_v30  ;;  %v5165_v30 = vld [vmem:[#allocation13 + $0x958] sm:$0xff] }
 0x927   : > { %v5258_v26 = vld [vmem:[#allocation16 + $0x950] sm:$0xff] }
 0x929   : > { %10026 = vmatpush3.bf16.msra.mxu1 %v10023_v35  ;;  %10058 = vmatpush3.bf16.msra.mxu0 %v10055_v36  ;;  %v4972_v35 = vld [vmem:[#allocation13 + $0x8c0] sm:$0xff]  ;;  %v4973_v36 = vld [vmem:[#allocation13 + $0x8c8] sm:$0xff] }
 0x92a   : > { %10028 = vmatprep.subr.bf16.mxu1 %v10027_v40  ;;  %10060 = vmatprep.subr.bf16.mxu0 %v10059_v41  ;;  %v10091_v54 = vpack.c.bf16 %v4973_v36, %v4972_v35  ;;  %v5167_v35 = vld [vmem:[#allocation13 + $0x968] sm:$0xff] }
 0x92b   : > { %v5260_v36 = vld [vmem:[#allocation16 + $0x960] sm:$0xff] }
 0x92d   : > { %10030 = vmatpush3.bf16.msra.mxu1 %v10027_v40  ;;  %10062 = vmatpush3.bf16.msra.mxu0 %v10059_v41  ;;  %v4974_v40 = vld [vmem:[#allocation13 + $0x8d0] sm:$0xff]  ;;  %v4975_v41 = vld [vmem:[#allocation13 + $0x8d8] sm:$0xff] }
 0x92e   : > { %10032 = vmatprep.subr.bf16.mxu1 %v10031_v44  ;;  %10064 = vmatprep.subr.bf16.mxu0 %v10063_v46  ;;  %v10095_v43 = vpack.c.bf16 %v4975_v41, %v4974_v40  ;;  %v5169_v40 = vld [vmem:[#allocation13 + $0x978] sm:$0xff] }
 0x92f   : > { %v5262_v41 = vld [vmem:[#allocation16 + $0x970] sm:$0xff] }
 0x931   : > { %10034 = vmatpush3.bf16.msra.mxu1 %v10031_v44  ;;  %10066 = vmatpush3.bf16.msra.mxu0 %v10063_v46  ;;  %v10127_v44 = vpack.c.bf16 %v5069_v28, %v5068_v42  ;;  %v4977_v46 = vld [vmem:[#allocation13 + $0x8e8] sm:$0xff]  ;;  %v5263_v42 = vld [vmem:[#allocation16 + $0x978] sm:$0xff] }
 0x932   : > { %10036 = vmatprep.subr.bf16.mxu1 %v10035_v52  ;;  %10068 = vmatprep.subr.bf16.mxu0 %v10067_v55  ;;  %v10099_v51 = vpack.c.bf16 %v4977_v46, %v4976_v45  ;;  %v5345_v45 = vld [vmem:[#allocation13 + $0x988] sm:$0xff] }
 0x933   : > { %v5438_v46 = vld [vmem:[#allocation16 + $0x980] sm:$0xff] }
 0x935   : > { %10038 = vmatpush3.bf16.msra.mxu1 %v10035_v52  ;;  %10070 = vmatpush3.bf16.msra.mxu0 %v10067_v55  ;;  %v10131_v52 = vpack.c.bf16 %v5071_v50, %v5070_v49  ;;  %v4979_v55 = vld [vmem:[#allocation13 + $0x8f8] sm:$0xff]  ;;  %v5439_v49 = vld [vmem:[#allocation16 + $0x988] sm:$0xff] }
 0x936   : > { %10040 = vmatprep.subr.bf16.mxu1 %v10039_v59  ;;  %10072 = vmatprep.subr.bf16.mxu0 %v10071_v60  ;;  %v10103_v58 = vpack.c.bf16 %v4979_v55, %v4978_v53  ;;  %v5347_v53 = vld [vmem:[#allocation13 + $0x998] sm:$0xff] }
 0x937   : > { %v5440_v55 = vld [vmem:[#allocation16 + $0x990] sm:$0xff] }
 0x939   : > { %10042 = vmatpush3.bf16.msra.mxu1 %v10039_v59  ;;  %10074 = vmatpush3.bf16.msra.mxu0 %v10071_v60  ;;  %v10135_v59 = vpack.c.bf16 %v5073_v57, %v5072_v56  ;;  %v5155_v60 = vld [vmem:[#allocation13 + $0x908] sm:$0xff]  ;;  %v5441_v56 = vld [vmem:[#allocation16 + $0x998] sm:$0xff] }
 0x93a   : > { %10076 = vmatprep.subr.bf16.mxu1 %v10075_v0  ;;  %10108 = vmatprep.subr.bf16.mxu0 %v10107_v2  ;;  %v10139_v63 = vpack.c.bf16 %v5155_v60, %v5154_v9  ;;  %v5349_v9 = vld [vmem:[#allocation13 + $0x9a8] sm:$0xff] }
 0x93b   : > { %v5442_v60 = vld [vmem:[#allocation16 + $0x9a0] sm:$0xff] }
 0x9cf   : > { %v8342_v4 = vpop.f32.mrb[12].mxu0 }
 0x9d0   : > { %v4560_v5 = vadd.f32 %v8342_v4, %v6146_v3  ;;  %v4554_v6 = vpop.f32.mrb[13].mxu0  ;;  %v5251_v4 = vld [vmem:[#allocation16 + $0x918] sm:$0xff] }
 0x9d1   : > { %v4555_v48 = vadd.f32 %v6146_v3, %v4554_v6  ;;  %v5250_v3 = vld [vmem:[#allocation16 + $0x910] sm:$0xff] }
 0x9d2   : > { %v4564_v8 = vadd.f32 %v10681_v7, %v4560_v5  ;;  %v10175_v6 = vpack.c.bf16 %v5251_v4, %v5250_v3  ;;  %v5159_v7 = vld [vmem:[#allocation13 + $0x928] sm:$0xff]  ;;  %v5445_v3 = vld [vmem:[#allocation16 + $0x9b8] sm:$0xff] }
 0x9d3   : > { %v4563_v13 = vadd.f32 %v10682_v12, %v4555_v48  ;;  %v5158_v48 = vld [vmem:[#allocation13 + $0x920] sm:$0xff] }
 0x9d4   : > { %v11914_v17 = vmul.f32 %v4564_v8, %v11845_v25  ;;  %v5252_v8 = vld [vmem:[#allocation16 + $0x920] sm:$0xff]  ;;  %v10147_v12 = vpack.c.bf16 %v5159_v7, %v5158_v48 }
 0x9d5   : > { %v4565_v18 = vmul.f32 %v4563_v13, %v11843_v20  ;;  %v10179_v13 = vpack.c.bf16 %v5253_v11, %v5252_v8  ;;  %v5353_v48 = vld [vmem:[#allocation13 + $0x9c8] sm:$0xff] }
 0x9d6   : > { %4568 = vst [vmem:[#allocation4 + $0x18] sm:$0xff] %v11914_v17  ;;  %v5446_v7 = vld [vmem:[#allocation16 + $0x9c0] sm:$0xff]  ;;  %v5447_v8 = vld [vmem:[#allocation16 + $0x9c8] sm:$0xff] }
 0x9d7   : > { %4567 = vst [vmem:[#allocation4 + $0x10] sm:$0xff] %v4565_v18  ;;  %8446 = vmatmul.mubr.f32.vlgmr.msra.gmra.mrb[8].mxu1 %v4565_v18  ;;  %8481 = vmatmul.mubr.f32.vlgmr.msra.gmra.mrb[14].mxu0 %v4565_v18 }
 0x9d8   : > { %10078 = vmatpush3.bf16.msra.mxu1 %v10075_v0  ;;  %10110 = vmatpush3.bf16.msra.mxu0 %v10107_v2  ;;  %v10171_v0 = vpack.c.bf16 %v5249_v62, %v5248_v61  ;;  %v5157_v2 = vld [vmem:[#allocation13 + $0x918] sm:$0xff]  ;;  %v5443_v61 = vld [vmem:[#allocation16 + $0x9a8] sm:$0xff] }
 0x9d9   : > { %8515 = vmatprep.mubr.f32.mxu1 %v4565_v18  ;;  %8550 = vmatprep.mubr.f32.mxu0 %v4565_v18  ;;  %v10143_v5 = vpack.c.bf16 %v5157_v2, %v5156_v1  ;;  %v5255_v18 = vld [vmem:[#allocation16 + $0x938] sm:$0xff]  ;;  %v5444_v2 = vld [vmem:[#allocation16 + $0x9b0] sm:$0xff] }
 0x9da   : > { %10080 = vmatprep.subr.bf16.mxu1 %v10079_v10  ;;  %10112 = vmatprep.subr.bf16.mxu0 %v10111_v21  ;;  %v5351_v1 = vld [vmem:[#allocation13 + $0x9b8] sm:$0xff] }
 0x9dc   : > { %10082 = vmatpush3.bf16.msra.mxu1 %v10079_v10  ;;  %10114 = vmatpush3.bf16.msra.mxu0 %v10111_v21  ;;  %v10183_v10 = vpack.c.bf16 %v5255_v18, %v5254_v16  ;;  %v5162_v21 = vld [vmem:[#allocation13 + $0x940] sm:$0xff] }
 0x9dd   : > { %10084 = vmatprep.subr.bf16.mxu1 %v10083_v24  ;;  %10116 = vmatprep.subr.bf16.mxu0 %v10115_v29  ;;  %v5449_v16 = vld [vmem:[#allocation16 + $0x9d8] sm:$0xff] }
 0x9e0   : > { %10086 = vmatpush3.bf16.msra.mxu1 %v10083_v24  ;;  %10118 = vmatpush3.bf16.msra.mxu0 %v10115_v29  ;;  %v10187_v24 = vpack.c.bf16 %v5257_v27, %v5256_v23  ;;  %v5164_v29 = vld [vmem:[#allocation13 + $0x950] sm:$0xff] }
 0x9e1   : > { %10088 = vmatprep.subr.bf16.mxu1 %v10087_v33  ;;  %10120 = vmatprep.subr.bf16.mxu0 %v10119_v34  ;;  %v10159_v32 = vpack.c.bf16 %v5165_v30, %v5164_v29  ;;  %v5451_v23 = vld [vmem:[#allocation16 + $0x9e8] sm:$0xff]  ;;  %v5359_v29 = vld [vmem:[#allocation13 + $0x9f8] sm:$0xff] }
 0x9e2   : > { %v5452_v30 = vld [vmem:[#allocation16 + $0x9f0] sm:$0xff] }
 0x9e4   : > { %10090 = vmatpush3.bf16.msra.mxu1 %v10087_v33  ;;  %10122 = vmatpush3.bf16.msra.mxu0 %v10119_v34  ;;  %v10191_v33 = vpack.c.bf16 %v5259_v31, %v5258_v26  ;;  %v5166_v34 = vld [vmem:[#allocation13 + $0x960] sm:$0xff] }
 0x9e5   : > { %10092 = vmatprep.subr.bf16.mxu1 %v10091_v54  ;;  %10124 = vmatprep.subr.bf16.mxu0 %v10123_v39  ;;  %v10163_v38 = vpack.c.bf16 %v5167_v35, %v5166_v34  ;;  %v5453_v26 = vld [vmem:[#allocation16 + $0x9f8] sm:$0xff]  ;;  %v5549_v34 = vld [vmem:[#allocation22 + $0x188] sm:$0xff] }
 0x9e8   : > { %10094 = vmatpush3.bf16.msra.mxu1 %v10091_v54  ;;  %10126 = vmatpush3.bf16.msra.mxu0 %v10123_v39  ;;  %v10195_v54 = vpack.c.bf16 %v5261_v37, %v5260_v36  ;;  %v5168_v39 = vld [vmem:[#allocation13 + $0x970] sm:$0xff]  ;;  %v5550_v36 = vld [vmem:[#allocation22 + $0x190] sm:$0xff]  ;;  %v5551_v37 = vld [vmem:[#allocation22 + $0x198] sm:$0xff] }
 0x9e9   : > { %10096 = vmatprep.subr.bf16.mxu1 %v10095_v43  ;;  %10128 = vmatprep.subr.bf16.mxu0 %v10127_v44  ;;  %v10167_v28 = vpack.c.bf16 %v5169_v40, %v5168_v39  ;;  %v5553_v39 = vld [vmem:[#allocation22 + $0x1a8] sm:$0xff] }
 0x9ec   : > { %10098 = vmatpush3.bf16.msra.mxu1 %v10095_v43  ;;  %10130 = vmatpush3.bf16.msra.mxu0 %v10127_v44  ;;  %v10199_v43 = vpack.c.bf16 %v5263_v42, %v5262_v41  ;;  %v5344_v44 = vld [vmem:[#allocation13 + $0x980] sm:$0xff] }
 0x9ed   : > { %10100 = vmatprep.subr.bf16.mxu1 %v10099_v51  ;;  %10132 = vmatprep.subr.bf16.mxu0 %v10131_v52  ;;  %v10203_v50 = vpack.c.bf16 %v5345_v45, %v5344_v44  ;;  %v5554_v41 = vld [vmem:[#allocation22 + $0x1b0] sm:$0xff]  ;;  %v5555_v42 = vld [vmem:[#allocation22 + $0x1b8] sm:$0xff] }
 0x9ee   : > { %v5558_v45 = vld [vmem:[#allocation22 + $0x1d0] sm:$0xff] }
 0x9f0   : > { %10102 = vmatpush3.bf16.msra.mxu1 %v10099_v51  ;;  %10134 = vmatpush3.bf16.msra.mxu0 %v10131_v52  ;;  %v10235_v51 = vpack.c.bf16 %v5439_v49, %v5438_v46  ;;  %v5346_v52 = vld [vmem:[#allocation13 + $0x990] sm:$0xff]  ;;  %v5559_v46 = vld [vmem:[#allocation22 + $0x1d8] sm:$0xff] }
 0x9f1   : > { %10104 = vmatprep.subr.bf16.mxu1 %v10103_v58  ;;  %10136 = vmatprep.subr.bf16.mxu0 %v10135_v59  ;;  %v10207_v57 = vpack.c.bf16 %v5347_v53, %v5346_v52  ;;  %v10287_v49 = vpack.c.bf16 %v5559_v46, %v5558_v45  ;;  %v5562_v53 = vld [vmem:[#allocation22 + $0x1f0] sm:$0xff] }
 0x9f4   : > { %10106 = vmatpush3.bf16.msra.mxu1 %v10103_v58  ;;  %10138 = vmatpush3.bf16.msra.mxu0 %v10135_v59  ;;  %v10239_v58 = vpack.c.bf16 %v5441_v56, %v5440_v55  ;;  %v5348_v59 = vld [vmem:[#allocation13 + $0x9a0] sm:$0xff] }
 0x9f5   : > { %10140 = vmatprep.subr.bf16.mxu1 %v10139_v63  ;;  %10172 = vmatprep.subr.bf16.mxu0 %v10171_v0  ;;  %v10211_v62 = vpack.c.bf16 %v5349_v9, %v5348_v59  ;;  %v5563_v55 = vld [vmem:[#allocation22 + $0x1f8] sm:$0xff] }
 0x9f6   : > { %v10295_v56 = vpack.c.bf16 %v5563_v55, %v5562_v53  ;;  %v5653_v59 = vld [vmem:[#allocation25 + $0x10] sm:$0xff] }
 0x9f7   : > { %8516 = vmatmul.mubr.f32.vlgmr.msra.gmra.mrb[8].mxu1 %v11914_v17  ;;  %8551 = vmatmul.mubr.f32.vlgmr.msra.gmra.mrb[14].mxu0 %v11914_v17 }
 0x9f8   : > { %10142 = vmatpush3.bf16.msra.mxu1 %v10139_v63  ;;  %8585 = vmatprep.mubr.f32.mxu1 %v11914_v17  ;;  %v10243_v63 = vpack.c.bf16 %v5443_v61, %v5442_v60  ;;  %v5654_v60 = vld [vmem:[#allocation25 + $0x18] sm:$0xff] }
 0x9f9   : > { %10174 = vmatpush3.bf16.msra.mxu0 %v10171_v0  ;;  %8620 = vmatprep.mubr.f32.mxu0 %v11914_v17  ;;  %v10155_v17 = vpack.c.bf16 %v5163_v22, %v5162_v21  ;;  %v5350_v0 = vld [vmem:[#allocation13 + $0x9b0] sm:$0xff]  ;;  %v5357_v21 = vld [vmem:[#allocation13 + $0x9e8] sm:$0xff]  ;;  %v10303_v61 = vpack.c.bf16 %v5654_v60, %v5653_v59 }
 0x9fa   : > { %10144 = vmatprep.subr.bf16.mxu1 %v10143_v5  ;;  %10176 = vmatprep.subr.bf16.mxu0 %v10175_v6  ;;  %v10215_v4 = vpack.c.bf16 %v5351_v1, %v5350_v0  ;;  %v5450_v22 = vld [vmem:[#allocation16 + $0x9e0] sm:$0xff] }
 0x9fb   : > { %v5657_v1 = vld [vmem:[#allocation25 + $0x30] sm:$0xff] }
 0x9fc   : > { %10146 = vmatpush3.bf16.msra.mxu1 %v10143_v5  ;;  %v10247_v5 = vpack.c.bf16 %v5445_v3, %v5444_v2  ;;  %v5658_v2 = vld [vmem:[#allocation25 + $0x38] sm:$0xff] }
 0x9fd   : > { %10178 = vmatpush3.bf16.msra.mxu0 %v10175_v6  ;;  %10148 = vmatprep.subr.bf16.mxu1 %v10147_v12  ;;  %v5352_v6 = vld [vmem:[#allocation13 + $0x9c0] sm:$0xff]  ;;  %v10311_v3 = vpack.c.bf16 %v5658_v2, %v5657_v1 }
 0x9fe   : > { %10180 = vmatprep.subr.bf16.mxu0 %v10179_v13  ;;  %v10219_v11 = vpack.c.bf16 %v5353_v48, %v5352_v6  ;;  %v5661_v48 = vld [vmem:[#allocation25 + $0x50] sm:$0xff] }
 0xa00   : > { %10150 = vmatpush3.bf16.msra.mxu1 %v10147_v12  ;;  %v10251_v12 = vpack.c.bf16 %v5447_v8, %v5446_v7  ;;  %v5662_v7 = vld [vmem:[#allocation25 + $0x58] sm:$0xff] }
 0xa01   : > { %10182 = vmatpush3.bf16.msra.mxu0 %v10179_v13  ;;  %10152 = vmatprep.subr.bf16.mxu1 %v10151_v19  ;;  %v5354_v13 = vld [vmem:[#allocation13 + $0x9d0] sm:$0xff]  ;;  %v10319_v8 = vpack.c.bf16 %v5662_v7, %v5661_v48 }
 0xa02   : > { %10184 = vmatprep.subr.bf16.mxu0 %v10183_v10  ;;  %v10223_v18 = vpack.c.bf16 %v5355_v14, %v5354_v13 }
 0xa04   : > { %10154 = vmatpush3.bf16.msra.mxu1 %v10151_v19  ;;  %v10255_v19 = vpack.c.bf16 %v5449_v16, %v5448_v15 }
 0xa05   : > { %10186 = vmatpush3.bf16.msra.mxu0 %v10183_v10  ;;  %10156 = vmatprep.subr.bf16.mxu1 %v10155_v17  ;;  %v5356_v10 = vld [vmem:[#allocation13 + $0x9e0] sm:$0xff] }
 0xa06   : > { %10188 = vmatprep.subr.bf16.mxu0 %v10187_v24  ;;  %v10227_v27 = vpack.c.bf16 %v5357_v21, %v5356_v10  ;;  %v6147_v21 = vld [vmem:[#allocation14 + $0x3] ss:$0 sm:$0xff] }
 0xa08   : > { %10158 = vmatpush3.bf16.msra.mxu1 %v10155_v17  ;;  %v10259_v17 = vpack.c.bf16 %v5451_v23, %v5450_v22 }
 0xa09   : > { %10190 = vmatpush3.bf16.msra.mxu0 %v10187_v24  ;;  %10160 = vmatprep.subr.bf16.mxu1 %v10159_v32  ;;  %v5358_v24 = vld [vmem:[#allocation13 + $0x9f0] sm:$0xff] }
 0xa0a   : > { %10192 = vmatprep.subr.bf16.mxu0 %v10191_v33  ;;  %v10231_v31 = vpack.c.bf16 %v5359_v29, %v5358_v24 }
 0xa0c   : > { %10162 = vmatpush3.bf16.msra.mxu1 %v10159_v32  ;;  %v10263_v32 = vpack.c.bf16 %v5453_v26, %v5452_v30 }
 0xa0d   : > { %10194 = vmatpush3.bf16.msra.mxu0 %v10191_v33  ;;  %10164 = vmatprep.subr.bf16.mxu1 %v10163_v38  ;;  %v5548_v33 = vld [vmem:[#allocation22 + $0x180] sm:$0xff] }
 0xa0e   : > { %10196 = vmatprep.subr.bf16.mxu0 %v10195_v54  ;;  %v10267_v35 = vpack.c.bf16 %v5549_v34, %v5548_v33 }
 0xa10   : > { %10166 = vmatpush3.bf16.msra.mxu1 %v10163_v38  ;;  %v10271_v38 = vpack.c.bf16 %v5551_v37, %v5550_v36  ;;  %v5664_v36 = vld [vmem:[#allocation25 + $0x68] sm:$0xff] }
 0xa11   : > { %10198 = vmatpush3.bf16.msra.mxu0 %v10195_v54  ;;  %10168 = vmatprep.subr.bf16.mxu1 %v10167_v28  ;;  %v5552_v54 = vld [vmem:[#allocation22 + $0x1a0] sm:$0xff] }
 0xa12   : > { %10200 = vmatprep.subr.bf16.mxu0 %v10199_v43  ;;  %v10275_v40 = vpack.c.bf16 %v5553_v39, %v5552_v54  ;;  %v5666_v54 = vld [vmem:[#allocation25 + $0x78] sm:$0xff] }
 0xa14   : > { %10170 = vmatpush3.bf16.msra.mxu1 %v10167_v28  ;;  %v10279_v28 = vpack.c.bf16 %v5555_v42, %v5554_v41  ;;  %v6139_v41 = vld [vmem:[#allocation23 + $0x1] ss:$0 sm:$0xff] }
 0xa15   : > { %10202 = vmatpush3.bf16.msra.mxu0 %v10199_v43  ;;  %10204 = vmatprep.subr.bf16.mxu1 %v10203_v50  ;;  %v5557_v43 = vld [vmem:[#allocation22 + $0x1c8] sm:$0xff] }
 0xa16   : > { %10236 = vmatprep.subr.bf16.mxu0 %v10235_v51 }
 0xa17   : > { %8586 = vmatmul.mubr.f32.vlgmr.msra.gmra.mrb[8].mxu1 %v11905_v47 }
 0xa18   : > { %8621 = vmatmul.mubr.f32.vlgmr.msra.gmra.mrb[14].mxu0 %v11905_v47  ;;  %10206 = vmatpush3.bf16.msra.mxu1 %v10203_v50  ;;  %v5560_v50 = vld [vmem:[#allocation22 + $0x1e0] sm:$0xff] }
 0xa19   : > { %10238 = vmatpush3.bf16.msra.mxu0 %v10235_v51  ;;  %10208 = vmatprep.subr.bf16.mxu1 %v10207_v57  ;;  %v5561_v51 = vld [vmem:[#allocation22 + $0x1e8] sm:$0xff] }
 0xa1a   : > { %10240 = vmatprep.subr.bf16.mxu0 %v10239_v58  ;;  %8655 = vmatprep.mubr.f32.mxu1 %v11905_v47  ;;  %v10291_v52 = vpack.c.bf16 %v5561_v51, %v5560_v50 }
 0xa1b   : > { %8690 = vmatprep.mubr.f32.mxu0 %v11905_v47 }
 0xa1c   : > { %10210 = vmatpush3.bf16.msra.mxu1 %v10207_v57  ;;  %v5651_v57 = vld [vmem:[#allocation25] sm:$0xff] }
 0xa1d   : > { %10242 = vmatpush3.bf16.msra.mxu0 %v10239_v58  ;;  %10212 = vmatprep.subr.bf16.mxu1 %v10211_v62  ;;  %v5652_v58 = vld [vmem:[#allocation25 + $0x8] sm:$0xff] }
 0xa1e   : > { %10244 = vmatprep.subr.bf16.mxu0 %v10243_v63  ;;  %v10299_v9 = vpack.c.bf16 %v5652_v58, %v5651_v57 }
 0xa20   : > { %10214 = vmatpush3.bf16.msra.mxu1 %v10211_v62  ;;  %v5655_v62 = vld [vmem:[#allocation25 + $0x20] sm:$0xff] }
 0xa21   : > { %10246 = vmatpush3.bf16.msra.mxu0 %v10243_v63  ;;  %10216 = vmatprep.subr.bf16.mxu1 %v10215_v4  ;;  %v5656_v63 = vld [vmem:[#allocation25 + $0x28] sm:$0xff] }
 0xa22   : > { %10248 = vmatprep.subr.bf16.mxu0 %v10247_v5  ;;  %v10307_v0 = vpack.c.bf16 %v5656_v63, %v5655_v62 }
 0xa24   : > { %10218 = vmatpush3.bf16.msra.mxu1 %v10215_v4  ;;  %v5659_v4 = vld [vmem:[#allocation25 + $0x40] sm:$0xff] }
 0xa25   : > { %10250 = vmatpush3.bf16.msra.mxu0 %v10247_v5  ;;  %10220 = vmatprep.subr.bf16.mxu1 %v10219_v11  ;;  %v5660_v5 = vld [vmem:[#allocation25 + $0x48] sm:$0xff] }
 0xa26   : > { %10252 = vmatprep.subr.bf16.mxu0 %v10251_v12  ;;  %v10315_v6 = vpack.c.bf16 %v5660_v5, %v5659_v4 }
 0xa28   : > { %10222 = vmatpush3.bf16.msra.mxu1 %v10219_v11  ;;  %v6148_v11 = vld [vmem:[#allocation17 + $0x3] ss:$0 sm:$0xff] }
 0xa29   : > { %10254 = vmatpush3.bf16.msra.mxu0 %v10251_v12  ;;  %10224 = vmatprep.subr.bf16.mxu1 %v10223_v18 }
 0xa2a   : > { %10256 = vmatprep.subr.bf16.mxu0 %v10255_v19 }
 0xa2c   : > { %10226 = vmatpush3.bf16.msra.mxu1 %v10223_v18 }
 0xa2d   : > { %10258 = vmatpush3.bf16.msra.mxu0 %v10255_v19  ;;  %10228 = vmatprep.subr.bf16.mxu1 %v10227_v27 }
 0xa2e   : > { %10260 = vmatprep.subr.bf16.mxu0 %v10259_v17 }
 0xa30   : > { %10230 = vmatpush3.bf16.msra.mxu1 %v10227_v27 }
 0xa31   : > { %10262 = vmatpush3.bf16.msra.mxu0 %v10259_v17  ;;  %10232 = vmatprep.subr.bf16.mxu1 %v10231_v31 }
 0xa32   : > { %10264 = vmatprep.subr.bf16.mxu0 %v10263_v32 }
 0xa34   : > { %10234 = vmatpush3.bf16.msra.mxu1 %v10231_v31 }
 0xa35   : > { %10266 = vmatpush3.bf16.msra.mxu0 %v10263_v32  ;;  %10268 = vmatprep.subr.bf16.mxu1 %v10267_v35 }
 0xa36   : > { %10300 = vmatprep.subr.bf16.mxu0 %v10299_v9 }
 0xa37   : > { %8656 = vmatmul.mubr.f32.vlgmr.msra.gmra.mrb[8].mxu1 %v11905_v47 }
 0xa38   : > { %8691 = vmatmul.mubr.f32.vlgmr.msra.gmra.mrb[14].mxu0 %v11905_v47  ;;  %10270 = vmatpush3.bf16.msra.mxu1 %v10267_v35  ;;  %v5556_v47 = vld [vmem:[#allocation22 + $0x1c0] sm:$0xff] }
 0xa39   : > { %10272 = vmatprep.subr.bf16.mxu1 %v10271_v38  ;;  %v10283_v44 = vpack.c.bf16 %v5557_v43, %v5556_v47  ;;  %10302 = vmatpush3.bf16.msra.mxu0 %v10299_v9  ;;  %v5663_v35 = vld [vmem:[#allocation25 + $0x60] sm:$0xff] }
 0xa3a   : > { %10304 = vmatprep.subr.bf16.mxu0 %v10303_v61  ;;  %v10323_v37 = vpack.c.bf16 %v5664_v36, %v5663_v35 }
 0xa3c   : > { %10274 = vmatpush3.bf16.msra.mxu1 %v10271_v38  ;;  %v5665_v38 = vld [vmem:[#allocation25 + $0x70] sm:$0xff] }
 0xa3d   : > { %10276 = vmatprep.subr.bf16.mxu1 %v10275_v40  ;;  %10306 = vmatpush3.bf16.msra.mxu0 %v10303_v61  ;;  %v10327_v39 = vpack.c.bf16 %v5666_v54, %v5665_v38 }
 0xa3e   : > { %10308 = vmatprep.subr.bf16.mxu0 %v10307_v0 }
 0xa40   : > { %10278 = vmatpush3.bf16.msra.mxu1 %v10275_v40  ;;  %v6133_v40 = vld [vmem:[#allocation23] ss:$0 sm:$0xff] }
 0xa41   : > { %10280 = vmatprep.subr.bf16.mxu1 %v10279_v28  ;;  %10310 = vmatpush3.bf16.msra.mxu0 %v10307_v0  ;;  %v10339_v42 = vadd.f32 %v6139_v41, %v6133_v40 }
 0xa42   : > { %10312 = vmatprep.subr.bf16.mxu0 %v10311_v3 }
 0xa44   : > { %10282 = vmatpush3.bf16.msra.mxu1 %v10279_v28  ;;  %v6145_v28 = vld [vmem:[#allocation23 + $0x2] ss:$0 sm:$0xff] }
 0xa45   : > { %10284 = vmatprep.subr.bf16.mxu1 %v10283_v44  ;;  %10314 = vmatpush3.bf16.msra.mxu0 %v10311_v3  ;;  %v10340_v47 = vadd.f32 %v10339_v42, %v6145_v28 }
 0xa46   : > { %10316 = vmatprep.subr.bf16.mxu0 %v10315_v6 }
 0xa48   : > { %10286 = vmatpush3.bf16.msra.mxu1 %v10283_v44  ;;  %v6151_v44 = vld [vmem:[#allocation23 + $0x3] ss:$0 sm:$0xff] }
 0xa49   : > { %10288 = vmatprep.subr.bf16.mxu1 %v10287_v49  ;;  %10318 = vmatpush3.bf16.msra.mxu0 %v10315_v6 }
 0xa4a   : > { %10320 = vmatprep.subr.bf16.mxu0 %v10319_v8 }
 0xa4c   : > { %10290 = vmatpush3.bf16.msra.mxu1 %v10287_v49 }
 0xa4d   : > { %10292 = vmatprep.subr.bf16.mxu1 %v10291_v52  ;;  %10322 = vmatpush3.bf16.msra.mxu0 %v10319_v8 }
 0xa4e   : > { %10324 = vmatprep.subr.bf16.mxu0 %v10323_v37 }
 0xa50   : > { %10294 = vmatpush3.bf16.msra.mxu1 %v10291_v52 }
 0xa51   : > { %10296 = vmatprep.subr.bf16.mxu1 %v10295_v56  ;;  %10326 = vmatpush3.bf16.msra.mxu0 %v10323_v37 }
 0xa52   : > { %10328 = vmatprep.subr.bf16.mxu0 %v10327_v39 }
 0xa54   : > { %10298 = vmatpush3.bf16.msra.mxu1 %v10295_v56 }
 0xa55   : > { %10330 = vmatpush3.bf16.msra.mxu0 %v10327_v39 }
 0xb0a   : > { %v8657_v12 = vpop.f32.mrb[8].mxu1 }
 0xb0b   : > { %v8692_v13 = vpop.f32.mrb[14].mxu0  ;;  %v5426_v14 = vpop.f32.mrb[9].mxu1  ;;  %v10351_v22 = vadd.f32 %v8657_v12, %v6147_v21 }
 0xb0c   : > { %v10353_v15 = vadd.f32 %v8692_v13, %v6148_v11  ;;  %v5520_v16 = vpop.f32.mrb[15].mxu0  ;;  %v10352_v23 = vadd.f32 %v6147_v21, %v5426_v14 }
 0xb0d   : > { %v10354_v18 = vadd.f32 %v6148_v11, %v5520_v16 }
 0xb0e   : > { %v6150_v19 = vmul.f32 -1.442695, %v10353_v15 }
 0xb0f   : > { %v6149_v10 = vmul.f32 -1.442695, %v10354_v18 }
 0xb10   : > { %10663 = vpow2.f32 %v6150_v19 }
 0xb11   : > { %10665 = vpow2.f32 %v6149_v10 }
 0xb12   : > { %10667 = vtanh.f32 %v10351_v22 }
 0xb13   : > { %10669 = vtanh.f32 %v10352_v23 }
 0xb1a   : > { %v10664_v27 = vpop.eup %10663 }
 0xb1b   : > { %v10666_v17 = vpop.eup %10665  ;;  %v5540_v24 = vadd.f32 1.0, %v10664_v27 }
 0xb1c   : > { %v5539_v29 = vadd.f32 1.0, %v10666_v17  ;;  %v10668_v30 = vpop.eup %10667 }
 0xb1d   : > { %10671 = vrcp.f32 %v5540_v24  ;;  %v10670_v26 = vpop.eup %10669 }
 0xb1e   : > { %10673 = vrcp.f32 %v5539_v29 }
 0xb27   : > { %v10672_v31 = vpop.eup %10671 }
 0xb28   : > { %v10674_v32 = vpop.eup %10673  ;;  %v5546_v33 = vmul.f32 %v10672_v31, %v10668_v30 }
 0xb29   : > { %v5545_v34 = vmul.f32 %v10674_v32, %v10670_v26 }
 0xb2b   : > { %8725 = vmatprep.mubr.f32.mxu1 %v5545_v34 }
 0xb2c   : > { %8726 = vmatmul.mubr.f32.vlgmr.msra.gmra.mrb[2].mxu1 %v5546_v33 }
 0xbff   : > { %v8727_v43 = vpop.f32.mrb[2].mxu1 }
 0xc00   : > { %v10337_v45 = vadd.f32 %v10340_v47, %v8727_v43  ;;  %v5638_v46 = vpop.f32.mrb[3].mxu1 }
 0xc01   : > { %v10341_v49 = vadd.f32 %v10340_v47, %v5638_v46 }
 0xc02   : > { %v10338_v50 = vadd.f32 %v10337_v45, %v6151_v44 }
 0xc03   : > { %v10342_v51 = vadd.f32 %v10341_v49, %v6151_v44 }
 0xc04   : > { %v5650_v53 = vmul.f32 %v10338_v50, %v11845_v25 }
 0xc05   : > { %v5649_v52 = vmul.f32 %v10342_v51, %v11843_v20 }
 0xc07   : > { %8760 = vmatprep.mubr.f32.mxu0 %v5649_v52 }
 0xc08   : > { %8761 = vmatmul.mubr.f32.vlgmr.msra.gmra.mrb[16].mxu0 %v5650_v53 }
 0xc09   : > { %11092 = shalt.err (!%p11089_p4)
}
 0xc0a   : > { %s11093_s10 = scalar_lea.hbm %s11939_s6, 256  ;;  %s11097_s20 = scalar_lea.hbm %s12134_s5, 512 }
 0xc0b   : > { %p11094_p9 = scmp.ne.s32.totalorder %s11939_s6, %s11093_s10  ;;  %p11098_p5 = scmp.lt.u32.totalorder %s11939_s6, %s12134_s5 }
 0xc0c   : > { %p11099_p1 = scmp.lt.u32.totalorder %s11097_s20, %s11093_s10  ;;  %p11101_p11 = scmp.lt.u32.totalorder %s11093_s10, %s11939_s6 }
 0xc0d   : > { %p11095_p0 = pnand %p11094_p9, %p12135_p8 }
 0xc0e   : > { %p11100_p10 = por %p11099_p1, %p11098_p5 }
 0xc0f   : > { %p11096_p7 = pneg %p11095_p0 }
 0xc10   : > { %p11102_p3 = por %p11101_p11, %p11100_p10 }
 0xc12   : > { %p11103_p12 = pnand %p11102_p3, %p11096_p7 }
 0xc14   : > { %11106 = shalt.err (!%p11103_p12)
}
 0xc15   : > { %s11248_s21 = smov 128   ;;  %s11249_s3 = smov 8   ;;  %v6152_v55 = vld [vmem:[#allocation26] ss:$0 sm:$0xff]  ;;  %v896_v56 = vld [vmem:[%s770_s9 + $0x8] sm:$0xff] }
 0xc16   : > { %10478 = dma.vmem_to_hbm [thread:$0]  (%p12135_p8), %s11932_s0, 256, %s11939_s6, %s5772_s18, %s11248_s21, %s11248_s21, %s11249_s3   ;;  %v5752_v62 = vmul.f32 %v11845_v25, %v896_v56 }
 0xc17   : > { %v895_v59 = vld [vmem:[%s770_s9] sm:$0xff]  ;;  %s874_s19 = scalar_lea.vmem [#allocation28], %s11783_s2  ;;  %s12136_s0 = sld [smem:[#allocation59_spill]] }
 0xc18   : > { %s5785_s27 = sshll.u32 %s874_s19, 4  ;;  %v5751_v0 = vmul.f32 %v11843_v20, %v895_v59  ;;  %s5767_s18 = scalar_lea.sflag [#allocation7], %s11780_s30  ;;  %s11977_s27 = int_to_ptr.vmem [resolvable:$true] %s5785_s27 }
 0xc19   : > { %s11107_s10 = scalar_lea.vmem %s11977_s27, 256  ;;  %s11250_s7 = smov [#allocation28]  }
 0xc1a   : > { %p11108_p6 = scmp.ne.s32.totalorder %s11977_s27, %s11107_s10  ;;  %s11111_s24 = sshll.u32 %s11250_s7, 4  ;;  %s11112_s24 = int_to_ptr.vmem [resolvable:$false] %s11111_s24 }
 0xc1b   : > { %s11113_s20 = scalar_lea.vmem %s11112_s24, 512  ;;  %p11114_p4 = scmp.lt.s32.totalorder %s11977_s27, %s11112_s24 }
 0xc1c   : > { %p11109_p2 = pnand %p11108_p6, %p12135_p8  ;;  %p11115_p9 = scmp.lt.s32.totalorder %s11113_s20, %s11107_s10 }
 0xc1d   : > { %s11984_s6 = scalar_lea.hbm %s12136_s0, %s6164_s8 }
 0xc1e   : > { %p11110_p13 = pneg %p11109_p2  ;;  %p11116_p0 = por %p11115_p9, %p11114_p4 }
 0xc20   : > { %p11117_p7 = pnand %p11116_p0, %p11110_p13 }
 0xcdb   : > { %v8762_v57 = vpop.f32.mrb[16].mxu0 }
 0xcdc   : > { %v5746_v58 = vadd.f32 %v8762_v57, %v6152_v55  ;;  %v5740_v9 = vpop.f32.mrb[17].mxu0 }
 0xcdd   : > { %v5741_v60 = vadd.f32 %v6152_v55, %v5740_v9 }
 0xcde   : > { %v5750_v61 = vmul.f32 %v5746_v58, %v11845_v25 }
 0xcdf   : > { %v5749_v63 = vmul.f32 %v5741_v60, %v11843_v20 }
 0xce0   : > { %v5754_v1 = vadd.f32 %v5752_v62, %v5750_v61 }
 0xce1   : > { %v5753_v2 = vadd.f32 %v5751_v0, %v5749_v63 }
 0xce2   : > { %5763 = vst [vmem:[%s874_s19 + $0x8] sm:$0xff] %v5754_v1 }
 0xce3   : > { %5762 = vst [vmem:[%s874_s19] sm:$0xff] %v5753_v2 }
 0xce4   : > { %11120 = shalt.err (!%p11117_p7)
}
 0xce5   : > { %s11121_s1 = scalar_lea.hbm %s11984_s6, 256  ;;  %s11125_s29 = scalar_lea.hbm %s12136_s0, 512 }
 0xce6   : > { %p11122_p5 = scmp.ne.s32.totalorder %s11984_s6, %s11121_s1  ;;  %p11126_p11 = scmp.lt.u32.totalorder %s11984_s6, %s12136_s0 }
 0xce7   : > { %p11127_p3 = scmp.lt.u32.totalorder %s11125_s29, %s11121_s1  ;;  %p11129_p6 = scmp.lt.u32.totalorder %s11121_s1, %s11984_s6 }
 0xce8   : > { %p11123_p1 = pnand %p11122_p5, %p12135_p8 }
 0xce9   : > { %p11128_p12 = por %p11127_p3, %p11126_p11 }
 0xcea   : > { %p11124_p10 = pneg %p11123_p1 }
 0xceb   : > { %p11130_p2 = por %p11129_p6, %p11128_p12 }
 0xced   : > { %p11131_p13 = pnand %p11130_p2, %p11124_p10 }
 0xcef   : > { %11134 = shalt.err (!%p11131_p13)
}
 0xcf0   : > { %10477 = dma.vmem_to_hbm [thread:$0]  (%p12135_p8), %s11977_s27, 256, %s11984_s6, %s5767_s18, %s11248_s21, %s11248_s21, %s11249_s3  }
 0xcf1 PF: > { %s12137_s9 = sld [smem:[#allocation42_spill]]  ;;  %p12138_p4 = scmp.ne.s32.totalorder %s12110_s22, 0 }
 0xcf2   : > { %p12139_p9 = scmp.ge.s32.totalorder %s11225_s26, 2 }
 0xcf4   : > { %p10526_p0 = pnand %p12139_p9, %p12138_p4 }
 0xcf7   : > { %s5816_s10 = sand.u32 1, %s12137_s9  }
 0xcf8   : > { %s5817_s7 = scalar_lea.sflag [#allocation7], %s5816_s10 }
 0xcf9   : > { %11196 = dma.done.wait (!%p10526_p0), %s5817_s7, 256  }
 0xcfa   : > { %11198 = vsyncadd (!%p10526_p0), %s5817_s7, 4294967040  ;;  %s5826_s4 = scalar_lea.sflag [#allocation30], %s5816_s10 }
 0xcfb   : > { %11200 = dma.done.wait (!%p10526_p0), %s5826_s4, 256  }
 0xcfc   : > { %11202 = vsyncadd (!%p10526_p0), %s5826_s4, 4294967040  ;;  %s45_s26 = sadd.s32 1, %s11225_s26   ;;  %s12140_s21 = sld [smem:[#allocation43_spill]] }
 0xcfd   : > { %p42_p7 = scmp.ge.s32.totalorder %s45_s26, 4   ;;  %s12141_s22 = smov %s11213_s23 }
 0xcfe   : > { %s12142_s23 = smov %s11683_s16  ;;  %s12143_s24 = smov %s11221_s25 }
 0xcff   : > { %s12144_s25 = smov %s12146_s15  ;;  %44 = sbr.rel (!%p42_p7) target bundleno = 31 (0x1f), region = 280 }
 0xd06   :  { %5831 = vsyncpa [#allocation6], 1 }
 0xd07   :  { %5833 = vsyncpa [#allocation6 + $0x1], 1 }
 0xd08   :  { %5834 = vsyncpa [#allocation9], 1 }
 0xd09   :  { %5836 = vsyncpa [#allocation9 + $0x1], 1 }
 0xd0a   :  { %5837 = vsyncpa [#allocation12], 1 }
 0xd0b   :  { %5838 = vsyncpa [#allocation15], 1 }
 0xd0c   :  { %5839 = vsyncpa [#allocation18], 1 }
 0xd0d   :  { %5840 = vsyncpa [#allocation21], 1 }
 0xd0e   :  { %5841 = vsyncpa [#allocation24], 1 }
 0xd0f   :  { %5842 = vsyncpa [#allocation27], 1 }
 0xd10   :  { %5843 = vsyncpa [#allocation7], 1 }
 0xd11   :  { %5845 = vsyncpa [#allocation7 + $0x1], 1 }
 0xd12   :  { %5846 = vsyncpa [#allocation30], 1 }
 0xd13   :  { %5848 = vsyncpa [#allocation30 + $0x1], 1 }

</bundles_post_ra>
